<compile_context>
chip_gen: v6e
topology: v6e:2x2x1
jax: 0.10.0
libtpu: 0.0.40
codegen_flags: <defaults>
</compile_context>

<pallas_src>
import jax
import jax.numpy as jnp
from jax import lax
from jax.experimental import pallas as pl
from jax.experimental.pallas import tpu as pltpu

# ---- small, module-consistent config ----
VOCAB  = 64     # vocab_size (synthetic)
EMB    = 128    # embedding_dim
HID    = 128    # hidden_dim
LAYERS = 2      # n_layers
OUT    = 1      # output_size
T      = 8      # sequence length
BB     = 8      # batch per grid block (per TensorCore slab)
G      = 2      # grid size: number of independent micro-batches
B      = BB * G # total batch


def _gates(z, c):
    """PyTorch-convention LSTM gate math. Gate order: i, f, g, o. All f32 on the VPU/EUP."""
    i = jax.nn.sigmoid(z[:, 0 * HID:1 * HID])
    f = jax.nn.sigmoid(z[:, 1 * HID:2 * HID])
    g = jnp.tanh(z[:, 2 * HID:3 * HID])
    o = jax.nn.sigmoid(z[:, 3 * HID:4 * HID])
    c_new = f * c + i * g
    h_new = o * jnp.tanh(c_new)
    return h_new, c_new


def sentiment_rnn_kernel(tok_ref,                         # (1, T*BB, 1) int32, time-major block
                         emb_ref,                         # (VOCAB, EMB) bf16
                         wih0_ref, whh0_ref, b0_ref,      # layer 0: (EMB,4H) bf16, (HID,4H) bf16, (1,4H) f32
                         w1_ref, b1_ref,                  # layer 1: stacked (2H,4H) bf16, (1,4H) f32
                         fcw_ref, fcb_ref,                # fc: (1,HID) f32, (1,OUT) f32
                         hinit_ref, cinit_ref,            # (LAYERS, BB, HID) f32 blocks
                         sig_ref, hn_ref, cn_ref,         # outputs (blocks)
                         z0_ref):                         # scratch (T, BB, 4H) f32
    # ---- pre-loop: fused embedding gather + layer-0 input projection (no recurrence dep) ----
    tok = tok_ref[0]                                                         # (T*BB, 1)
    # bf16 one-hot gather: exact selection, 1/3 the MXU passes of an f32xf32 matmul.
    onehot = (tok == lax.broadcasted_iota(jnp.int32, (T * BB, VOCAB), 1)).astype(jnp.bfloat16)
    # f32 accumulate + single trivial downcast (kept for guaranteed-clean matmul lowering).
    x_all = jnp.dot(onehot, emb_ref[...],
                    preferred_element_type=jnp.float32).astype(jnp.bfloat16)  # (T*BB, EMB)
    z0_all = (jnp.dot(x_all, wih0_ref[...], preferred_element_type=jnp.float32)
              + b0_ref[...])                                                  # (T*BB, 4H) f32
    z0_ref[...] = z0_all.reshape(T, BB, 4 * HID)     # per-step (BB,4H) tile-aligned slabs

    b1 = b1_ref[...]   # hoist the (1,4H) bias broadcast out of the loop

    def step(t, carry):
        h0, c0, h1, c1 = carry
        # layer 0: input projection precomputed -> single recurrent matmul on the serial path.
        # Weight read stays at the dot call site (no vreg hoist) so the MXU can latch it.
        z0 = z0_ref[t] + jnp.dot(h0.astype(jnp.bfloat16), whh0_ref[...],
                                 preferred_element_type=jnp.float32)
        h0, c0 = _gates(z0, c0)
        # layer 1: single fused matmul over [h0_t, h1_{t-1}] with stacked [w_ih1; w_hh1]
        # TODO(synk): inter-layer LSTM dropout (p=0.5) and nn.Dropout(0.3) are identity in eval mode.
        x1 = jnp.concatenate([h0, h1], axis=-1).astype(jnp.bfloat16)         # (BB, 2H)
        z1 = jnp.dot(x1, w1_ref[...], preferred_element_type=jnp.float32) + b1
        h1, c1 = _gates(z1, c1)
        return (h0, c0, h1, c1)

    init = (hinit_ref[0], cinit_ref[0], hinit_ref[1], cinit_ref[1])
    h0f, c0f, h1f, c1f = lax.fori_loop(0, T, step, init, unroll=True)

    # hidden = (h_n, c_n), each (n_layers, BB, H) block
    hn_ref[0] = h0f
    hn_ref[1] = h1f
    cn_ref[0] = c0f
    cn_ref[1] = c1f

    # fc + sigmoid on the last-timestep top-layer output, as a VPU mul + lane reduce (OUT == 1)
    logit = jnp.sum(h1f * fcw_ref[...], axis=-1, keepdims=True) + fcb_ref[...]
    sig_ref[...] = jax.nn.sigmoid(logit)


def sentiment_rnn_forward(tokens, hidden, params):
    """tokens: int32 (B, T); hidden: tuple of (LAYERS, B, HID) f32 arrays."""
    h0, c0 = hidden
    # Per-micro-batch time-major token layout: block g, row t*BB + b holds tokens[g*BB + b, t].
    tok_tm = (tokens.reshape(G, BB, T)
                    .transpose(0, 2, 1)
                    .reshape(G, T * BB, 1)
                    .astype(jnp.int32))

    bf16 = jnp.bfloat16
    ins = (
        tok_tm,
        params["embedding"].astype(bf16),
        params["w_ih_l0"].T.astype(bf16),
        params["w_hh_l0"].T.astype(bf16),
        (params["b_ih_l0"] + params["b_hh_l0"]).reshape(1, 4 * HID).astype(jnp.float32),
        jnp.concatenate([params["w_ih_l1"].T, params["w_hh_l1"].T], axis=0).astype(bf16),
        (params["b_ih_l1"] + params["b_hh_l1"]).reshape(1, 4 * HID).astype(jnp.float32),
        params["fc_w"].reshape(1, HID).astype(jnp.float32),
        params["fc_b"].reshape(1, OUT).astype(jnp.float32),
        h0, c0,
    )

    vmem_full = pl.BlockSpec(memory_space=pltpu.MemorySpace.VMEM)  # whole array resident in VMEM
    state_spec = pl.BlockSpec((LAYERS, BB, HID), lambda g: (0, g, 0))

    in_specs = [
        pl.BlockSpec((1, T * BB, 1), lambda g: (g, 0, 0)),   # tokens: per-micro-batch block
        vmem_full,                                           # embedding
        vmem_full,                                           # w_ih_l0
        vmem_full,                                           # w_hh_l0
        vmem_full,                                           # b0
        vmem_full,                                           # stacked w1
        vmem_full,                                           # b1
        vmem_full,                                           # fc_w
        vmem_full,                                           # fc_b
        state_spec,                                          # h init block
        state_spec,                                          # c init block
    ]

    out_shape = (
        jax.ShapeDtypeStruct((B, OUT), jnp.float32),          # sigmoid(fc(h_last))
        jax.ShapeDtypeStruct((LAYERS, B, HID), jnp.float32),  # h_n
        jax.ShapeDtypeStruct((LAYERS, B, HID), jnp.float32),  # c_n
    )
    out_specs = (
        pl.BlockSpec((BB, OUT), lambda g: (g, 0)),
        pl.BlockSpec((LAYERS, BB, HID), lambda g: (0, g, 0)),
        pl.BlockSpec((LAYERS, BB, HID), lambda g: (0, g, 0)),
    )

    sig, hn, cn = pl.pallas_call(
        sentiment_rnn_kernel,
        out_shape=out_shape,
        grid_spec=pltpu.PrefetchScalarGridSpec(
            num_scalar_prefetch=0,
            grid=(G,),                               # independent micro-batches
            in_specs=in_specs,
            out_specs=out_specs,
            scratch_shapes=[pltpu.VMEM((T, BB, 4 * HID), jnp.float32)],
        ),
        compiler_params=pltpu.CompilerParams(
            dimension_semantics=("parallel",),       # v7x: one micro-batch per TensorCore
        ),
    )(*ins)

    sig_out = sig[:, 0]           # (B,) — matches sig_out[:, -1] for OUT == 1
    return sig_out, (hn, cn)


def init_params(key):
    ks = jax.random.split(key, 11)
    s = 0.1
    return {
        "embedding": jax.random.normal(ks[0], (VOCAB, EMB), jnp.float32) * s,
        "w_ih_l0": jax.random.normal(ks[1], (4 * HID, EMB), jnp.float32) * s,
        "w_hh_l0": jax.random.normal(ks[2], (4 * HID, HID), jnp.float32) * s,
        "b_ih_l0": jax.random.normal(ks[3], (4 * HID,), jnp.float32) * s,
        "b_hh_l0": jax.random.normal(ks[4], (4 * HID,), jnp.float32) * s,
        "w_ih_l1": jax.random.normal(ks[5], (4 * HID, HID), jnp.float32) * s,
        "w_hh_l1": jax.random.normal(ks[6], (4 * HID, HID), jnp.float32) * s,
        "b_ih_l1": jax.random.normal(ks[7], (4 * HID,), jnp.float32) * s,
        "b_hh_l1": jax.random.normal(ks[8], (4 * HID,), jnp.float32) * s,
        "fc_w": jax.random.normal(ks[9], (OUT, HID), jnp.float32) * s,
        "fc_b": jax.random.normal(ks[10], (OUT,), jnp.float32) * s,
    }


def init_hidden(batch_size):
    return (jnp.zeros((LAYERS, batch_size, HID), jnp.float32),
            jnp.zeros((LAYERS, batch_size, HID), jnp.float32))


if __name__ == "__main__":
    key = jax.random.PRNGKey(0)
    k_param, k_tok = jax.random.split(key)

    params = init_params(k_param)
    tokens = jax.random.randint(k_tok, (B, T), 0, VOCAB, dtype=jnp.int32)
    hidden = init_hidden(B)

    # The in-kernel one-hot gather maps out-of-range ids to a zero embedding; guard like
    # PyTorch's nn.Embedding would.
    assert bool(jnp.all((tokens >= 0) & (tokens < VOCAB)))

    sig_out, (h_n, c_n) = sentiment_rnn_forward(tokens, hidden, params)
    jax.block_until_ready((sig_out, h_n, c_n))

    assert sig_out.shape == (B,)
    assert h_n.shape == (LAYERS, B, HID) and c_n.shape == (LAYERS, B, HID)
    assert bool(jnp.all(jnp.isfinite(sig_out)))
    print("KERNEL_OK")
</pallas_src>

<mosaic_0001>
module attributes {stable_mosaic.version = 11 : i64} {
  func.func @sentiment_rnn_kernel(%arg0: i32, %arg1: memref<1x64x1xi32, #tpu.memory_space<vmem>>, %arg2: memref<64x128xbf16, #tpu.memory_space<vmem>>, %arg3: memref<128x512xbf16, #tpu.memory_space<vmem>>, %arg4: memref<128x512xbf16, #tpu.memory_space<vmem>>, %arg5: memref<1x512xf32, #tpu.memory_space<vmem>>, %arg6: memref<256x512xbf16, #tpu.memory_space<vmem>>, %arg7: memref<1x512xf32, #tpu.memory_space<vmem>>, %arg8: memref<1x128xf32, #tpu.memory_space<vmem>>, %arg9: memref<1x1xf32, #tpu.memory_space<vmem>>, %arg10: memref<2x8x128xf32, #tpu.memory_space<vmem>>, %arg11: memref<2x8x128xf32, #tpu.memory_space<vmem>>, %arg12: memref<8x1xf32, #tpu.memory_space<vmem>>, %arg13: memref<2x8x128xf32, #tpu.memory_space<vmem>>, %arg14: memref<2x8x128xf32, #tpu.memory_space<vmem>>, %arg15: memref<8x8x512xf32, #tpu.memory_space<vmem>>) attributes {dimension_semantics = [#tpu.dimension_semantics<parallel>], iteration_bounds = array<i64: 2>, scalar_prefetch = 0 : i64, scratch_operands = 1 : i64, tpu.core_type = #tpu.core_type<tc>, window_params = [{transform_indices = @transform_0, window_bounds = array<i64: 1, 64, 1>}, {pipeline_mode = #tpu.pipeline_mode<synchronous>, transform_indices = @transform_1, window_bounds = array<i64: 64, 128>}, {pipeline_mode = #tpu.pipeline_mode<synchronous>, transform_indices = @transform_2, window_bounds = array<i64: 128, 512>}, {pipeline_mode = #tpu.pipeline_mode<synchronous>, transform_indices = @transform_3, window_bounds = array<i64: 128, 512>}, {pipeline_mode = #tpu.pipeline_mode<synchronous>, transform_indices = @transform_4, window_bounds = array<i64: 1, 512>}, {pipeline_mode = #tpu.pipeline_mode<synchronous>, transform_indices = @transform_5, window_bounds = array<i64: 256, 512>}, {pipeline_mode = #tpu.pipeline_mode<synchronous>, transform_indices = @transform_6, window_bounds = array<i64: 1, 512>}, {pipeline_mode = #tpu.pipeline_mode<synchronous>, transform_indices = @transform_7, window_bounds = array<i64: 1, 128>}, {pipeline_mode = #tpu.pipeline_mode<synchronous>, transform_indices = @transform_8, window_bounds = array<i64: 1, 1>}, {transform_indices = @transform_9, window_bounds = array<i64: 2, 8, 128>}, {transform_indices = @transform_10, window_bounds = array<i64: 2, 8, 128>}, {transform_indices = @transform_11, window_bounds = array<i64: 8, 1>}, {transform_indices = @transform_12, window_bounds = array<i64: 2, 8, 128>}, {transform_indices = @transform_13, window_bounds = array<i64: 2, 8, 128>}]} {
    %c0 = arith.constant 0 : index
    %c0_0 = arith.constant 0 : index
    %c0_1 = arith.constant 0 : index
    %0 = vector.load %arg1[%c0, %c0_0, %c0_1] : memref<1x64x1xi32, #tpu.memory_space<vmem>>, vector<1x64x1xi32>
    %1 = vector.shape_cast %0 : vector<1x64x1xi32> to vector<64x1xi32>
    %2 = tpu.iota {dimensions = array<i32: 1>} : vector<64x64xi32>
    %3 = vector.broadcast %1 : vector<64x1xi32> to vector<64x64xi32>
    %4 = arith.cmpi eq, %3, %2 : vector<64x64xi32>
    %5 = arith.extui %4 : vector<64x64xi1> to vector<64x64xi32>
    %6 = arith.sitofp %5 : vector<64x64xi32> to vector<64x64xf32>
    %7 = arith.truncf %6 : vector<64x64xf32> to vector<64x64xbf16>
    %c0_2 = arith.constant 0 : index
    %c0_3 = arith.constant 0 : index
    %8 = vector.load %arg2[%c0_2, %c0_3] : memref<64x128xbf16, #tpu.memory_space<vmem>>, vector<64x128xbf16>
    %cst = arith.constant dense<0.000000e+00> : vector<64x128xf32>
    %9 = tpu.matmul %7, %8, %cst {dimension_numbers = #tpu.dot_dimension_numbers<[1], [0], [0], [1], [0, 0, 1, 1], [], []>} : vector<64x64xbf16>, vector<64x128xbf16>, vector<64x128xf32> -> vector<64x128xf32>
    %10 = arith.truncf %9 : vector<64x128xf32> to vector<64x128xbf16>
    %c0_4 = arith.constant 0 : index
    %c0_5 = arith.constant 0 : index
    %11 = vector.load %arg3[%c0_4, %c0_5] : memref<128x512xbf16, #tpu.memory_space<vmem>>, vector<128x512xbf16>
    %cst_6 = arith.constant dense<0.000000e+00> : vector<64x512xf32>
    %12 = tpu.matmul %10, %11, %cst_6 {dimension_numbers = #tpu.dot_dimension_numbers<[1], [0], [0], [1], [0, 0, 1, 1], [], []>} : vector<64x128xbf16>, vector<128x512xbf16>, vector<64x512xf32> -> vector<64x512xf32>
    %c0_7 = arith.constant 0 : index
    %c0_8 = arith.constant 0 : index
    %13 = vector.load %arg5[%c0_7, %c0_8] : memref<1x512xf32, #tpu.memory_space<vmem>>, vector<1x512xf32>
    %14 = vector.broadcast %13 : vector<1x512xf32> to vector<64x512xf32>
    %15 = arith.addf %12, %14 : vector<64x512xf32>
    %16 = vector.shape_cast %15 : vector<64x512xf32> to vector<8x8x512xf32>
    %c0_9 = arith.constant 0 : index
    %c0_10 = arith.constant 0 : index
    %c0_11 = arith.constant 0 : index
    %17 = vector.load %arg15[%c0_9, %c0_10, %c0_11] : memref<8x8x512xf32, #tpu.memory_space<vmem>>, vector<8x8x512xf32>
    tpu.vector_store %arg15[%c0_9, %c0_10, %c0_11], %16 {strides = array<i32>} : memref<8x8x512xf32, #tpu.memory_space<vmem>>, vector<8x8x512xf32>,
    %c0_12 = arith.constant 0 : index
    %c0_13 = arith.constant 0 : index
    %18 = vector.load %arg7[%c0_12, %c0_13] : memref<1x512xf32, #tpu.memory_space<vmem>>, vector<1x512xf32>
    %c0_14 = arith.constant 0 : index
    %c0_15 = arith.constant 0 : index
    %c0_16 = arith.constant 0 : index
    %19 = vector.load %arg10[%c0_14, %c0_15, %c0_16] : memref<2x8x128xf32, #tpu.memory_space<vmem>>, vector<1x8x128xf32>
    %20 = vector.shape_cast %19 : vector<1x8x128xf32> to vector<8x128xf32>
    %c0_17 = arith.constant 0 : index
    %c0_18 = arith.constant 0 : index
    %c0_19 = arith.constant 0 : index
    %21 = vector.load %arg11[%c0_17, %c0_18, %c0_19] : memref<2x8x128xf32, #tpu.memory_space<vmem>>, vector<1x8x128xf32>
    %22 = vector.shape_cast %21 : vector<1x8x128xf32> to vector<8x128xf32>
    %c1 = arith.constant 1 : index
    %c0_20 = arith.constant 0 : index
    %c0_21 = arith.constant 0 : index
    %23 = vector.load %arg10[%c1, %c0_20, %c0_21] : memref<2x8x128xf32, #tpu.memory_space<vmem>>, vector<1x8x128xf32>
    %24 = vector.shape_cast %23 : vector<1x8x128xf32> to vector<8x128xf32>
    %c1_22 = arith.constant 1 : index
    %c0_23 = arith.constant 0 : index
    %c0_24 = arith.constant 0 : index
    %25 = vector.load %arg11[%c1_22, %c0_23, %c0_24] : memref<2x8x128xf32, #tpu.memory_space<vmem>>, vector<1x8x128xf32>
    %26 = vector.shape_cast %25 : vector<1x8x128xf32> to vector<8x128xf32>
    %c0_i32 = arith.constant 0 : i32
    %27 = arith.index_cast %c0_i32 : i32 to index
    %c0_25 = arith.constant 0 : index
    %c0_26 = arith.constant 0 : index
    %28 = vector.load %arg15[%27, %c0_25, %c0_26] : memref<8x8x512xf32, #tpu.memory_space<vmem>>, vector<1x8x512xf32>
    %29 = vector.shape_cast %28 : vector<1x8x512xf32> to vector<8x512xf32>
    %30 = arith.truncf %20 : vector<8x128xf32> to vector<8x128xbf16>
    %c0_27 = arith.constant 0 : index
    %c0_28 = arith.constant 0 : index
    %31 = vector.load %arg4[%c0_27, %c0_28] : memref<128x512xbf16, #tpu.memory_space<vmem>>, vector<128x512xbf16>
    %cst_29 = arith.constant dense<0.000000e+00> : vector<8x512xf32>
    %32 = tpu.matmul %30, %31, %cst_29 {dimension_numbers = #tpu.dot_dimension_numbers<[1], [0], [0], [1], [0, 0, 1, 1], [], []>} : vector<8x128xbf16>, vector<128x512xbf16>, vector<8x512xf32> -> vector<8x512xf32>
    %33 = arith.addf %29, %32 : vector<8x512xf32>
    %34 = vector.extract_strided_slice %33 {offsets = [0, 0], sizes = [8, 128], strides = [1, 1]} : vector<8x512xf32> to vector<8x128xf32>
    %35 = arith.negf %34 : vector<8x128xf32>
    %36 = math.exp %35 : vector<8x128xf32>
    %cst_30 = arith.constant 1.000000e+00 : f32
    %37 = vector.broadcast %cst_30 : f32 to vector<8x128xf32>
    %38 = arith.addf %37, %36 : vector<8x128xf32>
    %39 = arith.divf %37, %38 : vector<8x128xf32>
    %40 = vector.extract_strided_slice %33 {offsets = [0, 128], sizes = [8, 128], strides = [1, 1]} : vector<8x512xf32> to vector<8x128xf32>
    %41 = arith.negf %40 : vector<8x128xf32>
    %42 = math.exp %41 : vector<8x128xf32>
    %cst_31 = arith.constant 1.000000e+00 : f32
    %43 = vector.broadcast %cst_31 : f32 to vector<8x128xf32>
    %44 = arith.addf %43, %42 : vector<8x128xf32>
    %45 = arith.divf %43, %44 : vector<8x128xf32>
    %46 = vector.extract_strided_slice %33 {offsets = [0, 256], sizes = [8, 128], strides = [1, 1]} : vector<8x512xf32> to vector<8x128xf32>
    %47 = math.tanh %46 : vector<8x128xf32>
    %48 = vector.extract_strided_slice %33 {offsets = [0, 384], sizes = [8, 128], strides = [1, 1]} : vector<8x512xf32> to vector<8x128xf32>
    %49 = arith.negf %48 : vector<8x128xf32>
    %50 = math.exp %49 : vector<8x128xf32>
    %cst_32 = arith.constant 1.000000e+00 : f32
    %51 = vector.broadcast %cst_32 : f32 to vector<8x128xf32>
    %52 = arith.addf %51, %50 : vector<8x128xf32>
    %53 = arith.divf %51, %52 : vector<8x128xf32>
    %54 = arith.mulf %45, %22 : vector<8x128xf32>
    %55 = arith.mulf %39, %47 : vector<8x128xf32>
    %56 = arith.addf %54, %55 : vector<8x128xf32>
    %57 = math.tanh %56 : vector<8x128xf32>
    %58 = arith.mulf %53, %57 : vector<8x128xf32>
    %59 = tpu.concatenate %58, %24 in 1 : vector<8x128xf32>, vector<8x128xf32> -> vector<8x256xf32>
    %60 = arith.truncf %59 : vector<8x256xf32> to vector<8x256xbf16>
    %c0_33 = arith.constant 0 : index
    %c0_34 = arith.constant 0 : index
    %61 = vector.load %arg6[%c0_33, %c0_34] : memref<256x512xbf16, #tpu.memory_space<vmem>>, vector<256x512xbf16>
    %cst_35 = arith.constant dense<0.000000e+00> : vector<8x512xf32>
    %62 = tpu.matmul %60, %61, %cst_35 {dimension_numbers = #tpu.dot_dimension_numbers<[1], [0], [0], [1], [0, 0, 1, 1], [], []>} : vector<8x256xbf16>, vector<256x512xbf16>, vector<8x512xf32> -> vector<8x512xf32>
    %63 = vector.broadcast %18 : vector<1x512xf32> to vector<8x512xf32>
    %64 = arith.addf %62, %63 : vector<8x512xf32>
    %65 = vector.extract_strided_slice %64 {offsets = [0, 0], sizes = [8, 128], strides = [1, 1]} : vector<8x512xf32> to vector<8x128xf32>
    %66 = arith.negf %65 : vector<8x128xf32>
    %67 = math.exp %66 : vector<8x128xf32>
    %cst_36 = arith.constant 1.000000e+00 : f32
    %68 = vector.broadcast %cst_36 : f32 to vector<8x128xf32>
    %69 = arith.addf %68, %67 : vector<8x128xf32>
    %70 = arith.divf %68, %69 : vector<8x128xf32>
    %71 = vector.extract_strided_slice %64 {offsets = [0, 128], sizes = [8, 128], strides = [1, 1]} : vector<8x512xf32> to vector<8x128xf32>
    %72 = arith.negf %71 : vector<8x128xf32>
    %73 = math.exp %72 : vector<8x128xf32>
    %cst_37 = arith.constant 1.000000e+00 : f32
    %74 = vector.broadcast %cst_37 : f32 to vector<8x128xf32>
    %75 = arith.addf %74, %73 : vector<8x128xf32>
    %76 = arith.divf %74, %75 : vector<8x128xf32>
    %77 = vector.extract_strided_slice %64 {offsets = [0, 256], sizes = [8, 128], strides = [1, 1]} : vector<8x512xf32> to vector<8x128xf32>
    %78 = math.tanh %77 : vector<8x128xf32>
    %79 = vector.extract_strided_slice %64 {offsets = [0, 384], sizes = [8, 128], strides = [1, 1]} : vector<8x512xf32> to vector<8x128xf32>
    %80 = arith.negf %79 : vector<8x128xf32>
    %81 = math.exp %80 : vector<8x128xf32>
    %cst_38 = arith.constant 1.000000e+00 : f32
    %82 = vector.broadcast %cst_38 : f32 to vector<8x128xf32>
    %83 = arith.addf %82, %81 : vector<8x128xf32>
    %84 = arith.divf %82, %83 : vector<8x128xf32>
    %85 = arith.mulf %76, %26 : vector<8x128xf32>
    %86 = arith.mulf %70, %78 : vector<8x128xf32>
    %87 = arith.addf %85, %86 : vector<8x128xf32>
    %88 = math.tanh %87 : vector<8x128xf32>
    %89 = arith.mulf %84, %88 : vector<8x128xf32>
    %c1_i32 = arith.constant 1 : i32
    %90 = arith.index_cast %c1_i32 : i32 to index
    %c0_39 = arith.constant 0 : index
    %c0_40 = arith.constant 0 : index
    %91 = vector.load %arg15[%90, %c0_39, %c0_40] : memref<8x8x512xf32, #tpu.memory_space<vmem>>, vector<1x8x512xf32>
    %92 = vector.shape_cast %91 : vector<1x8x512xf32> to vector<8x512xf32>
    %93 = arith.truncf %58 : vector<8x128xf32> to vector<8x128xbf16>
    %c0_41 = arith.constant 0 : index
    %c0_42 = arith.constant 0 : index
    %94 = vector.load %arg4[%c0_41, %c0_42] : memref<128x512xbf16, #tpu.memory_space<vmem>>, vector<128x512xbf16>
    %cst_43 = arith.constant dense<0.000000e+00> : vector<8x512xf32>
    %95 = tpu.matmul %93, %94, %cst_43 {dimension_numbers = #tpu.dot_dimension_numbers<[1], [0], [0], [1], [0, 0, 1, 1], [], []>} : vector<8x128xbf16>, vector<128x512xbf16>, vector<8x512xf32> -> vector<8x512xf32>
    %96 = arith.addf %92, %95 : vector<8x512xf32>
    %97 = vector.extract_strided_slice %96 {offsets = [0, 0], sizes = [8, 128], strides = [1, 1]} : vector<8x512xf32> to vector<8x128xf32>
    %98 = arith.negf %97 : vector<8x128xf32>
    %99 = math.exp %98 : vector<8x128xf32>
    %cst_44 = arith.constant 1.000000e+00 : f32
    %100 = vector.broadcast %cst_44 : f32 to vector<8x128xf32>
    %101 = arith.addf %100, %99 : vector<8x128xf32>
    %102 = arith.divf %100, %101 : vector<8x128xf32>
    %103 = vector.extract_strided_slice %96 {offsets = [0, 128], sizes = [8, 128], strides = [1, 1]} : vector<8x512xf32> to vector<8x128xf32>
    %104 = arith.negf %103 : vector<8x128xf32>
    %105 = math.exp %104 : vector<8x128xf32>
    %cst_45 = arith.constant 1.000000e+00 : f32
    %106 = vector.broadcast %cst_45 : f32 to vector<8x128xf32>
    %107 = arith.addf %106, %105 : vector<8x128xf32>
    %108 = arith.divf %106, %107 : vector<8x128xf32>
    %109 = vector.extract_strided_slice %96 {offsets = [0, 256], sizes = [8, 128], strides = [1, 1]} : vector<8x512xf32> to vector<8x128xf32>
    %110 = math.tanh %109 : vector<8x128xf32>
    %111 = vector.extract_strided_slice %96 {offsets = [0, 384], sizes = [8, 128], strides = [1, 1]} : vector<8x512xf32> to vector<8x128xf32>
    %112 = arith.negf %111 : vector<8x128xf32>
    %113 = math.exp %112 : vector<8x128xf32>
    %cst_46 = arith.constant 1.000000e+00 : f32
    %114 = vector.broadcast %cst_46 : f32 to vector<8x128xf32>
    %115 = arith.addf %114, %113 : vector<8x128xf32>
    %116 = arith.divf %114, %115 : vector<8x128xf32>
    %117 = arith.mulf %108, %56 : vector<8x128xf32>
    %118 = arith.mulf %102, %110 : vector<8x128xf32>
    %119 = arith.addf %117, %118 : vector<8x128xf32>
    %120 = math.tanh %119 : vector<8x128xf32>
    %121 = arith.mulf %116, %120 : vector<8x128xf32>
    %122 = tpu.concatenate %121, %89 in 1 : vector<8x128xf32>, vector<8x128xf32> -> vector<8x256xf32>
    %123 = arith.truncf %122 : vector<8x256xf32> to vector<8x256xbf16>
    %c0_47 = arith.constant 0 : index
    %c0_48 = arith.constant 0 : index
    %124 = vector.load %arg6[%c0_47, %c0_48] : memref<256x512xbf16, #tpu.memory_space<vmem>>, vector<256x512xbf16>
    %cst_49 = arith.constant dense<0.000000e+00> : vector<8x512xf32>
    %125 = tpu.matmul %123, %124, %cst_49 {dimension_numbers = #tpu.dot_dimension_numbers<[1], [0], [0], [1], [0, 0, 1, 1], [], []>} : vector<8x256xbf16>, vector<256x512xbf16>, vector<8x512xf32> -> vector<8x512xf32>
    %126 = vector.broadcast %18 : vector<1x512xf32> to vector<8x512xf32>
    %127 = arith.addf %125, %126 : vector<8x512xf32>
    %128 = vector.extract_strided_slice %127 {offsets = [0, 0], sizes = [8, 128], strides = [1, 1]} : vector<8x512xf32> to vector<8x128xf32>
    %129 = arith.negf %128 : vector<8x128xf32>
    %130 = math.exp %129 : vector<8x128xf32>
    %cst_50 = arith.constant 1.000000e+00 : f32
    %131 = vector.broadcast %cst_50 : f32 to vector<8x128xf32>
    %132 = arith.addf %131, %130 : vector<8x128xf32>
    %133 = arith.divf %131, %132 : vector<8x128xf32>
    %134 = vector.extract_strided_slice %127 {offsets = [0, 128], sizes = [8, 128], strides = [1, 1]} : vector<8x512xf32> to vector<8x128xf32>
    %135 = arith.negf %134 : vector<8x128xf32>
    %136 = math.exp %135 : vector<8x128xf32>
    %cst_51 = arith.constant 1.000000e+00 : f32
    %137 = vector.broadcast %cst_51 : f32 to vector<8x128xf32>
    %138 = arith.addf %137, %136 : vector<8x128xf32>
    %139 = arith.divf %137, %138 : vector<8x128xf32>
    %140 = vector.extract_strided_slice %127 {offsets = [0, 256], sizes = [8, 128], strides = [1, 1]} : vector<8x512xf32> to vector<8x128xf32>
    %141 = math.tanh %140 : vector<8x128xf32>
    %142 = vector.extract_strided_slice %127 {offsets = [0, 384], sizes = [8, 128], strides = [1, 1]} : vector<8x512xf32> to vector<8x128xf32>
    %143 = arith.negf %142 : vector<8x128xf32>
    %144 = math.exp %143 : vector<8x128xf32>
    %cst_52 = arith.constant 1.000000e+00 : f32
    %145 = vector.broadcast %cst_52 : f32 to vector<8x128xf32>
    %146 = arith.addf %145, %144 : vector<8x128xf32>
    %147 = arith.divf %145, %146 : vector<8x128xf32>
    %148 = arith.mulf %139, %87 : vector<8x128xf32>
    %149 = arith.mulf %133, %141 : vector<8x128xf32>
    %150 = arith.addf %148, %149 : vector<8x128xf32>
    %151 = math.tanh %150 : vector<8x128xf32>
    %152 = arith.mulf %147, %151 : vector<8x128xf32>
    %c2_i32 = arith.constant 2 : i32
    %153 = arith.index_cast %c2_i32 : i32 to index
    %c0_53 = arith.constant 0 : index
    %c0_54 = arith.constant 0 : index
    %154 = vector.load %arg15[%153, %c0_53, %c0_54] : memref<8x8x512xf32, #tpu.memory_space<vmem>>, vector<1x8x512xf32>
    %155 = vector.shape_cast %154 : vector<1x8x512xf32> to vector<8x512xf32>
    %156 = arith.truncf %121 : vector<8x128xf32> to vector<8x128xbf16>
    %c0_55 = arith.constant 0 : index
    %c0_56 = arith.constant 0 : index
    %157 = vector.load %arg4[%c0_55, %c0_56] : memref<128x512xbf16, #tpu.memory_space<vmem>>, vector<128x512xbf16>
    %cst_57 = arith.constant dense<0.000000e+00> : vector<8x512xf32>
    %158 = tpu.matmul %156, %157, %cst_57 {dimension_numbers = #tpu.dot_dimension_numbers<[1], [0], [0], [1], [0, 0, 1, 1], [], []>} : vector<8x128xbf16>, vector<128x512xbf16>, vector<8x512xf32> -> vector<8x512xf32>
    %159 = arith.addf %155, %158 : vector<8x512xf32>
    %160 = vector.extract_strided_slice %159 {offsets = [0, 0], sizes = [8, 128], strides = [1, 1]} : vector<8x512xf32> to vector<8x128xf32>
    %161 = arith.negf %160 : vector<8x128xf32>
    %162 = math.exp %161 : vector<8x128xf32>
    %cst_58 = arith.constant 1.000000e+00 : f32
    %163 = vector.broadcast %cst_58 : f32 to vector<8x128xf32>
    %164 = arith.addf %163, %162 : vector<8x128xf32>
    %165 = arith.divf %163, %164 : vector<8x128xf32>
    %166 = vector.extract_strided_slice %159 {offsets = [0, 128], sizes = [8, 128], strides = [1, 1]} : vector<8x512xf32> to vector<8x128xf32>
    %167 = arith.negf %166 : vector<8x128xf32>
    %168 = math.exp %167 : vector<8x128xf32>
    %cst_59 = arith.constant 1.000000e+00 : f32
    %169 = vector.broadcast %cst_59 : f32 to vector<8x128xf32>
    %170 = arith.addf %169, %168 : vector<8x128xf32>
    %171 = arith.divf %169, %170 : vector<8x128xf32>
    %172 = vector.extract_strided_slice %159 {offsets = [0, 256], sizes = [8, 128], strides = [1, 1]} : vector<8x512xf32> to vector<8x128xf32>
    %173 = math.tanh %172 : vector<8x128xf32>
    %174 = vector.extract_strided_slice %159 {offsets = [0, 384], sizes = [8, 128], strides = [1, 1]} : vector<8x512xf32> to vector<8x128xf32>
    %175 = arith.negf %174 : vector<8x128xf32>
    %176 = math.exp %175 : vector<8x128xf32>
    %cst_60 = arith.constant 1.000000e+00 : f32
    %177 = vector.broadcast %cst_60 : f32 to vector<8x128xf32>
    %178 = arith.addf %177, %176 : vector<8x128xf32>
    %179 = arith.divf %177, %178 : vector<8x128xf32>
    %180 = arith.mulf %171, %119 : vector<8x128xf32>
    %181 = arith.mulf %165, %173 : vector<8x128xf32>
    %182 = arith.addf %180, %181 : vector<8x128xf32>
    %183 = math.tanh %182 : vector<8x128xf32>
    %184 = arith.mulf %179, %183 : vector<8x128xf32>
    %185 = tpu.concatenate %184, %152 in 1 : vector<8x128xf32>, vector<8x128xf32> -> vector<8x256xf32>
    %186 = arith.truncf %185 : vector<8x256xf32> to vector<8x256xbf16>
    %c0_61 = arith.constant 0 : index
    %c0_62 = arith.constant 0 : index
    %187 = vector.load %arg6[%c0_61, %c0_62] : memref<256x512xbf16, #tpu.memory_space<vmem>>, vector<256x512xbf16>
    %cst_63 = arith.constant dense<0.000000e+00> : vector<8x512xf32>
    %188 = tpu.matmul %186, %187, %cst_63 {dimension_numbers = #tpu.dot_dimension_numbers<[1], [0], [0], [1], [0, 0, 1, 1], [], []>} : vector<8x256xbf16>, vector<256x512xbf16>, vector<8x512xf32> -> vector<8x512xf32>
    %189 = vector.broadcast %18 : vector<1x512xf32> to vector<8x512xf32>
    %190 = arith.addf %188, %189 : vector<8x512xf32>
    %191 = vector.extract_strided_slice %190 {offsets = [0, 0], sizes = [8, 128], strides = [1, 1]} : vector<8x512xf32> to vector<8x128xf32>
    %192 = arith.negf %191 : vector<8x128xf32>
    %193 = math.exp %192 : vector<8x128xf32>
    %cst_64 = arith.constant 1.000000e+00 : f32
    %194 = vector.broadcast %cst_64 : f32 to vector<8x128xf32>
    %195 = arith.addf %194, %193 : vector<8x128xf32>
    %196 = arith.divf %194, %195 : vector<8x128xf32>
    %197 = vector.extract_strided_slice %190 {offsets = [0, 128], sizes = [8, 128], strides = [1, 1]} : vector<8x512xf32> to vector<8x128xf32>
    %198 = arith.negf %197 : vector<8x128xf32>
    %199 = math.exp %198 : vector<8x128xf32>
    %cst_65 = arith.constant 1.000000e+00 : f32
    %200 = vector.broadcast %cst_65 : f32 to vector<8x128xf32>
    %201 = arith.addf %200, %199 : vector<8x128xf32>
    %202 = arith.divf %200, %201 : vector<8x128xf32>
    %203 = vector.extract_strided_slice %190 {offsets = [0, 256], sizes = [8, 128], strides = [1, 1]} : vector<8x512xf32> to vector<8x128xf32>
    %204 = math.tanh %203 : vector<8x128xf32>
    %205 = vector.extract_strided_slice %190 {offsets = [0, 384], sizes = [8, 128], strides = [1, 1]} : vector<8x512xf32> to vector<8x128xf32>
    %206 = arith.negf %205 : vector<8x128xf32>
    %207 = math.exp %206 : vector<8x128xf32>
    %cst_66 = arith.constant 1.000000e+00 : f32
    %208 = vector.broadcast %cst_66 : f32 to vector<8x128xf32>
    %209 = arith.addf %208, %207 : vector<8x128xf32>
    %210 = arith.divf %208, %209 : vector<8x128xf32>
    %211 = arith.mulf %202, %150 : vector<8x128xf32>
    %212 = arith.mulf %196, %204 : vector<8x128xf32>
    %213 = arith.addf %211, %212 : vector<8x128xf32>
    %214 = math.tanh %213 : vector<8x128xf32>
    %215 = arith.mulf %210, %214 : vector<8x128xf32>
    %c3_i32 = arith.constant 3 : i32
    %216 = arith.index_cast %c3_i32 : i32 to index
    %c0_67 = arith.constant 0 : index
    %c0_68 = arith.constant 0 : index
    %217 = vector.load %arg15[%216, %c0_67, %c0_68] : memref<8x8x512xf32, #tpu.memory_space<vmem>>, vector<1x8x512xf32>
    %218 = vector.shape_cast %217 : vector<1x8x512xf32> to vector<8x512xf32>
    %219 = arith.truncf %184 : vector<8x128xf32> to vector<8x128xbf16>
    %c0_69 = arith.constant 0 : index
    %c0_70 = arith.constant 0 : index
    %220 = vector.load %arg4[%c0_69, %c0_70] : memref<128x512xbf16, #tpu.memory_space<vmem>>, vector<128x512xbf16>
    %cst_71 = arith.constant dense<0.000000e+00> : vector<8x512xf32>
    %221 = tpu.matmul %219, %220, %cst_71 {dimension_numbers = #tpu.dot_dimension_numbers<[1], [0], [0], [1], [0, 0, 1, 1], [], []>} : vector<8x128xbf16>, vector<128x512xbf16>, vector<8x512xf32> -> vector<8x512xf32>
    %222 = arith.addf %218, %221 : vector<8x512xf32>
    %223 = vector.extract_strided_slice %222 {offsets = [0, 0], sizes = [8, 128], strides = [1, 1]} : vector<8x512xf32> to vector<8x128xf32>
    %224 = arith.negf %223 : vector<8x128xf32>
    %225 = math.exp %224 : vector<8x128xf32>
    %cst_72 = arith.constant 1.000000e+00 : f32
    %226 = vector.broadcast %cst_72 : f32 to vector<8x128xf32>
    %227 = arith.addf %226, %225 : vector<8x128xf32>
    %228 = arith.divf %226, %227 : vector<8x128xf32>
    %229 = vector.extract_strided_slice %222 {offsets = [0, 128], sizes = [8, 128], strides = [1, 1]} : vector<8x512xf32> to vector<8x128xf32>
    %230 = arith.negf %229 : vector<8x128xf32>
    %231 = math.exp %230 : vector<8x128xf32>
    %cst_73 = arith.constant 1.000000e+00 : f32
    %232 = vector.broadcast %cst_73 : f32 to vector<8x128xf32>
    %233 = arith.addf %232, %231 : vector<8x128xf32>
    %234 = arith.divf %232, %233 : vector<8x128xf32>
    %235 = vector.extract_strided_slice %222 {offsets = [0, 256], sizes = [8, 128], strides = [1, 1]} : vector<8x512xf32> to vector<8x128xf32>
    %236 = math.tanh %235 : vector<8x128xf32>
    %237 = vector.extract_strided_slice %222 {offsets = [0, 384], sizes = [8, 128], strides = [1, 1]} : vector<8x512xf32> to vector<8x128xf32>
    %238 = arith.negf %237 : vector<8x128xf32>
    %239 = math.exp %238 : vector<8x128xf32>
    %cst_74 = arith.constant 1.000000e+00 : f32
    %240 = vector.broadcast %cst_74 : f32 to vector<8x128xf32>
    %241 = arith.addf %240, %239 : vector<8x128xf32>
    %242 = arith.divf %240, %241 : vector<8x128xf32>
    %243 = arith.mulf %234, %182 : vector<8x128xf32>
    %244 = arith.mulf %228, %236 : vector<8x128xf32>
    %245 = arith.addf %243, %244 : vector<8x128xf32>
    %246 = math.tanh %245 : vector<8x128xf32>
    %247 = arith.mulf %242, %246 : vector<8x128xf32>
    %248 = tpu.concatenate %247, %215 in 1 : vector<8x128xf32>, vector<8x128xf32> -> vector<8x256xf32>
    %249 = arith.truncf %248 : vector<8x256xf32> to vector<8x256xbf16>
    %c0_75 = arith.constant 0 : index
    %c0_76 = arith.constant 0 : index
    %250 = vector.load %arg6[%c0_75, %c0_76] : memref<256x512xbf16, #tpu.memory_space<vmem>>, vector<256x512xbf16>
    %cst_77 = arith.constant dense<0.000000e+00> : vector<8x512xf32>
    %251 = tpu.matmul %249, %250, %cst_77 {dimension_numbers = #tpu.dot_dimension_numbers<[1], [0], [0], [1], [0, 0, 1, 1], [], []>} : vector<8x256xbf16>, vector<256x512xbf16>, vector<8x512xf32> -> vector<8x512xf32>
    %252 = vector.broadcast %18 : vector<1x512xf32> to vector<8x512xf32>
    %253 = arith.addf %251, %252 : vector<8x512xf32>
    %254 = vector.extract_strided_slice %253 {offsets = [0, 0], sizes = [8, 128], strides = [1, 1]} : vector<8x512xf32> to vector<8x128xf32>
    %255 = arith.negf %254 : vector<8x128xf32>
    %256 = math.exp %255 : vector<8x128xf32>
    %cst_78 = arith.constant 1.000000e+00 : f32
    %257 = vector.broadcast %cst_78 : f32 to vector<8x128xf32>
    %258 = arith.addf %257, %256 : vector<8x128xf32>
    %259 = arith.divf %257, %258 : vector<8x128xf32>
    %260 = vector.extract_strided_slice %253 {offsets = [0, 128], sizes = [8, 128], strides = [1, 1]} : vector<8x512xf32> to vector<8x128xf32>
    %261 = arith.negf %260 : vector<8x128xf32>
    %262 = math.exp %261 : vector<8x128xf32>
    %cst_79 = arith.constant 1.000000e+00 : f32
    %263 = vector.broadcast %cst_79 : f32 to vector<8x128xf32>
    %264 = arith.addf %263, %262 : vector<8x128xf32>
    %265 = arith.divf %263, %264 : vector<8x128xf32>
    %266 = vector.extract_strided_slice %253 {offsets = [0, 256], sizes = [8, 128], strides = [1, 1]} : vector<8x512xf32> to vector<8x128xf32>
    %267 = math.tanh %266 : vector<8x128xf32>
    %268 = vector.extract_strided_slice %253 {offsets = [0, 384], sizes = [8, 128], strides = [1, 1]} : vector<8x512xf32> to vector<8x128xf32>
    %269 = arith.negf %268 : vector<8x128xf32>
    %270 = math.exp %269 : vector<8x128xf32>
    %cst_80 = arith.constant 1.000000e+00 : f32
    %271 = vector.broadcast %cst_80 : f32 to vector<8x128xf32>
    %272 = arith.addf %271, %270 : vector<8x128xf32>
    %273 = arith.divf %271, %272 : vector<8x128xf32>
    %274 = arith.mulf %265, %213 : vector<8x128xf32>
    %275 = arith.mulf %259, %267 : vector<8x128xf32>
    %276 = arith.addf %274, %275 : vector<8x128xf32>
    %277 = math.tanh %276 : vector<8x128xf32>
    %278 = arith.mulf %273, %277 : vector<8x128xf32>
    %c4_i32 = arith.constant 4 : i32
    %279 = arith.index_cast %c4_i32 : i32 to index
    %c0_81 = arith.constant 0 : index
    %c0_82 = arith.constant 0 : index
    %280 = vector.load %arg15[%279, %c0_81, %c0_82] : memref<8x8x512xf32, #tpu.memory_space<vmem>>, vector<1x8x512xf32>
    %281 = vector.shape_cast %280 : vector<1x8x512xf32> to vector<8x512xf32>
    %282 = arith.truncf %247 : vector<8x128xf32> to vector<8x128xbf16>
    %c0_83 = arith.constant 0 : index
    %c0_84 = arith.constant 0 : index
    %283 = vector.load %arg4[%c0_83, %c0_84] : memref<128x512xbf16, #tpu.memory_space<vmem>>, vector<128x512xbf16>
    %cst_85 = arith.constant dense<0.000000e+00> : vector<8x512xf32>
    %284 = tpu.matmul %282, %283, %cst_85 {dimension_numbers = #tpu.dot_dimension_numbers<[1], [0], [0], [1], [0, 0, 1, 1], [], []>} : vector<8x128xbf16>, vector<128x512xbf16>, vector<8x512xf32> -> vector<8x512xf32>
    %285 = arith.addf %281, %284 : vector<8x512xf32>
    %286 = vector.extract_strided_slice %285 {offsets = [0, 0], sizes = [8, 128], strides = [1, 1]} : vector<8x512xf32> to vector<8x128xf32>
    %287 = arith.negf %286 : vector<8x128xf32>
    %288 = math.exp %287 : vector<8x128xf32>
    %cst_86 = arith.constant 1.000000e+00 : f32
    %289 = vector.broadcast %cst_86 : f32 to vector<8x128xf32>
    %290 = arith.addf %289, %288 : vector<8x128xf32>
    %291 = arith.divf %289, %290 : vector<8x128xf32>
    %292 = vector.extract_strided_slice %285 {offsets = [0, 128], sizes = [8, 128], strides = [1, 1]} : vector<8x512xf32> to vector<8x128xf32>
    %293 = arith.negf %292 : vector<8x128xf32>
    %294 = math.exp %293 : vector<8x128xf32>
    %cst_87 = arith.constant 1.000000e+00 : f32
    %295 = vector.broadcast %cst_87 : f32 to vector<8x128xf32>
    %296 = arith.addf %295, %294 : vector<8x128xf32>
    %297 = arith.divf %295, %296 : vector<8x128xf32>
    %298 = vector.extract_strided_slice %285 {offsets = [0, 256], sizes = [8, 128], strides = [1, 1]} : vector<8x512xf32> to vector<8x128xf32>
    %299 = math.tanh %298 : vector<8x128xf32>
    %300 = vector.extract_strided_slice %285 {offsets = [0, 384], sizes = [8, 128], strides = [1, 1]} : vector<8x512xf32> to vector<8x128xf32>
    %301 = arith.negf %300 : vector<8x128xf32>
    %302 = math.exp %301 : vector<8x128xf32>
    %cst_88 = arith.constant 1.000000e+00 : f32
    %303 = vector.broadcast %cst_88 : f32 to vector<8x128xf32>
    %304 = arith.addf %303, %302 : vector<8x128xf32>
    %305 = arith.divf %303, %304 : vector<8x128xf32>
    %306 = arith.mulf %297, %245 : vector<8x128xf32>
    %307 = arith.mulf %291, %299 : vector<8x128xf32>
    %308 = arith.addf %306, %307 : vector<8x128xf32>
    %309 = math.tanh %308 : vector<8x128xf32>
    %310 = arith.mulf %305, %309 : vector<8x128xf32>
    %311 = tpu.concatenate %310, %278 in 1 : vector<8x128xf32>, vector<8x128xf32> -> vector<8x256xf32>
    %312 = arith.truncf %311 : vector<8x256xf32> to vector<8x256xbf16>
    %c0_89 = arith.constant 0 : index
    %c0_90 = arith.constant 0 : index
    %313 = vector.load %arg6[%c0_89, %c0_90] : memref<256x512xbf16, #tpu.memory_space<vmem>>, vector<256x512xbf16>
    %cst_91 = arith.constant dense<0.000000e+00> : vector<8x512xf32>
    %314 = tpu.matmul %312, %313, %cst_91 {dimension_numbers = #tpu.dot_dimension_numbers<[1], [0], [0], [1], [0, 0, 1, 1], [], []>} : vector<8x256xbf16>, vector<256x512xbf16>, vector<8x512xf32> -> vector<8x512xf32>
    %315 = vector.broadcast %18 : vector<1x512xf32> to vector<8x512xf32>
    %316 = arith.addf %314, %315 : vector<8x512xf32>
    %317 = vector.extract_strided_slice %316 {offsets = [0, 0], sizes = [8, 128], strides = [1, 1]} : vector<8x512xf32> to vector<8x128xf32>
    %318 = arith.negf %317 : vector<8x128xf32>
    %319 = math.exp %318 : vector<8x128xf32>
    %cst_92 = arith.constant 1.000000e+00 : f32
    %320 = vector.broadcast %cst_92 : f32 to vector<8x128xf32>
    %321 = arith.addf %320, %319 : vector<8x128xf32>
    %322 = arith.divf %320, %321 : vector<8x128xf32>
    %323 = vector.extract_strided_slice %316 {offsets = [0, 128], sizes = [8, 128], strides = [1, 1]} : vector<8x512xf32> to vector<8x128xf32>
    %324 = arith.negf %323 : vector<8x128xf32>
    %325 = math.exp %324 : vector<8x128xf32>
    %cst_93 = arith.constant 1.000000e+00 : f32
    %326 = vector.broadcast %cst_93 : f32 to vector<8x128xf32>
    %327 = arith.addf %326, %325 : vector<8x128xf32>
    %328 = arith.divf %326, %327 : vector<8x128xf32>
    %329 = vector.extract_strided_slice %316 {offsets = [0, 256], sizes = [8, 128], strides = [1, 1]} : vector<8x512xf32> to vector<8x128xf32>
    %330 = math.tanh %329 : vector<8x128xf32>
    %331 = vector.extract_strided_slice %316 {offsets = [0, 384], sizes = [8, 128], strides = [1, 1]} : vector<8x512xf32> to vector<8x128xf32>
    %332 = arith.negf %331 : vector<8x128xf32>
    %333 = math.exp %332 : vector<8x128xf32>
    %cst_94 = arith.constant 1.000000e+00 : f32
    %334 = vector.broadcast %cst_94 : f32 to vector<8x128xf32>
    %335 = arith.addf %334, %333 : vector<8x128xf32>
    %336 = arith.divf %334, %335 : vector<8x128xf32>
    %337 = arith.mulf %328, %276 : vector<8x128xf32>
    %338 = arith.mulf %322, %330 : vector<8x128xf32>
    %339 = arith.addf %337, %338 : vector<8x128xf32>
    %340 = math.tanh %339 : vector<8x128xf32>
    %341 = arith.mulf %336, %340 : vector<8x128xf32>
    %c5_i32 = arith.constant 5 : i32
    %342 = arith.index_cast %c5_i32 : i32 to index
    %c0_95 = arith.constant 0 : index
    %c0_96 = arith.constant 0 : index
    %343 = vector.load %arg15[%342, %c0_95, %c0_96] : memref<8x8x512xf32, #tpu.memory_space<vmem>>, vector<1x8x512xf32>
    %344 = vector.shape_cast %343 : vector<1x8x512xf32> to vector<8x512xf32>
    %345 = arith.truncf %310 : vector<8x128xf32> to vector<8x128xbf16>
    %c0_97 = arith.constant 0 : index
    %c0_98 = arith.constant 0 : index
    %346 = vector.load %arg4[%c0_97, %c0_98] : memref<128x512xbf16, #tpu.memory_space<vmem>>, vector<128x512xbf16>
    %cst_99 = arith.constant dense<0.000000e+00> : vector<8x512xf32>
    %347 = tpu.matmul %345, %346, %cst_99 {dimension_numbers = #tpu.dot_dimension_numbers<[1], [0], [0], [1], [0, 0, 1, 1], [], []>} : vector<8x128xbf16>, vector<128x512xbf16>, vector<8x512xf32> -> vector<8x512xf32>
    %348 = arith.addf %344, %347 : vector<8x512xf32>
    %349 = vector.extract_strided_slice %348 {offsets = [0, 0], sizes = [8, 128], strides = [1, 1]} : vector<8x512xf32> to vector<8x128xf32>
    %350 = arith.negf %349 : vector<8x128xf32>
    %351 = math.exp %350 : vector<8x128xf32>
    %cst_100 = arith.constant 1.000000e+00 : f32
    %352 = vector.broadcast %cst_100 : f32 to vector<8x128xf32>
    %353 = arith.addf %352, %351 : vector<8x128xf32>
    %354 = arith.divf %352, %353 : vector<8x128xf32>
    %355 = vector.extract_strided_slice %348 {offsets = [0, 128], sizes = [8, 128], strides = [1, 1]} : vector<8x512xf32> to vector<8x128xf32>
    %356 = arith.negf %355 : vector<8x128xf32>
    %357 = math.exp %356 : vector<8x128xf32>
    %cst_101 = arith.constant 1.000000e+00 : f32
    %358 = vector.broadcast %cst_101 : f32 to vector<8x128xf32>
    %359 = arith.addf %358, %357 : vector<8x128xf32>
    %360 = arith.divf %358, %359 : vector<8x128xf32>
    %361 = vector.extract_strided_slice %348 {offsets = [0, 256], sizes = [8, 128], strides = [1, 1]} : vector<8x512xf32> to vector<8x128xf32>
    %362 = math.tanh %361 : vector<8x128xf32>
    %363 = vector.extract_strided_slice %348 {offsets = [0, 384], sizes = [8, 128], strides = [1, 1]} : vector<8x512xf32> to vector<8x128xf32>
    %364 = arith.negf %363 : vector<8x128xf32>
    %365 = math.exp %364 : vector<8x128xf32>
    %cst_102 = arith.constant 1.000000e+00 : f32
    %366 = vector.broadcast %cst_102 : f32 to vector<8x128xf32>
    %367 = arith.addf %366, %365 : vector<8x128xf32>
    %368 = arith.divf %366, %367 : vector<8x128xf32>
    %369 = arith.mulf %360, %308 : vector<8x128xf32>
    %370 = arith.mulf %354, %362 : vector<8x128xf32>
    %371 = arith.addf %369, %370 : vector<8x128xf32>
    %372 = math.tanh %371 : vector<8x128xf32>
    %373 = arith.mulf %368, %372 : vector<8x128xf32>
    %374 = tpu.concatenate %373, %341 in 1 : vector<8x128xf32>, vector<8x128xf32> -> vector<8x256xf32>
    %375 = arith.truncf %374 : vector<8x256xf32> to vector<8x256xbf16>
    %c0_103 = arith.constant 0 : index
    %c0_104 = arith.constant 0 : index
    %376 = vector.load %arg6[%c0_103, %c0_104] : memref<256x512xbf16, #tpu.memory_space<vmem>>, vector<256x512xbf16>
    %cst_105 = arith.constant dense<0.000000e+00> : vector<8x512xf32>
    %377 = tpu.matmul %375, %376, %cst_105 {dimension_numbers = #tpu.dot_dimension_numbers<[1], [0], [0], [1], [0, 0, 1, 1], [], []>} : vector<8x256xbf16>, vector<256x512xbf16>, vector<8x512xf32> -> vector<8x512xf32>
    %378 = vector.broadcast %18 : vector<1x512xf32> to vector<8x512xf32>
    %379 = arith.addf %377, %378 : vector<8x512xf32>
    %380 = vector.extract_strided_slice %379 {offsets = [0, 0], sizes = [8, 128], strides = [1, 1]} : vector<8x512xf32> to vector<8x128xf32>
    %381 = arith.negf %380 : vector<8x128xf32>
    %382 = math.exp %381 : vector<8x128xf32>
    %cst_106 = arith.constant 1.000000e+00 : f32
    %383 = vector.broadcast %cst_106 : f32 to vector<8x128xf32>
    %384 = arith.addf %383, %382 : vector<8x128xf32>
    %385 = arith.divf %383, %384 : vector<8x128xf32>
    %386 = vector.extract_strided_slice %379 {offsets = [0, 128], sizes = [8, 128], strides = [1, 1]} : vector<8x512xf32> to vector<8x128xf32>
    %387 = arith.negf %386 : vector<8x128xf32>
    %388 = math.exp %387 : vector<8x128xf32>
    %cst_107 = arith.constant 1.000000e+00 : f32
    %389 = vector.broadcast %cst_107 : f32 to vector<8x128xf32>
    %390 = arith.addf %389, %388 : vector<8x128xf32>
    %391 = arith.divf %389, %390 : vector<8x128xf32>
    %392 = vector.extract_strided_slice %379 {offsets = [0, 256], sizes = [8, 128], strides = [1, 1]} : vector<8x512xf32> to vector<8x128xf32>
    %393 = math.tanh %392 : vector<8x128xf32>
    %394 = vector.extract_strided_slice %379 {offsets = [0, 384], sizes = [8, 128], strides = [1, 1]} : vector<8x512xf32> to vector<8x128xf32>
    %395 = arith.negf %394 : vector<8x128xf32>
    %396 = math.exp %395 : vector<8x128xf32>
    %cst_108 = arith.constant 1.000000e+00 : f32
    %397 = vector.broadcast %cst_108 : f32 to vector<8x128xf32>
    %398 = arith.addf %397, %396 : vector<8x128xf32>
    %399 = arith.divf %397, %398 : vector<8x128xf32>
    %400 = arith.mulf %391, %339 : vector<8x128xf32>
    %401 = arith.mulf %385, %393 : vector<8x128xf32>
    %402 = arith.addf %400, %401 : vector<8x128xf32>
    %403 = math.tanh %402 : vector<8x128xf32>
    %404 = arith.mulf %399, %403 : vector<8x128xf32>
    %c6_i32 = arith.constant 6 : i32
    %405 = arith.index_cast %c6_i32 : i32 to index
    %c0_109 = arith.constant 0 : index
    %c0_110 = arith.constant 0 : index
    %406 = vector.load %arg15[%405, %c0_109, %c0_110] : memref<8x8x512xf32, #tpu.memory_space<vmem>>, vector<1x8x512xf32>
    %407 = vector.shape_cast %406 : vector<1x8x512xf32> to vector<8x512xf32>
    %408 = arith.truncf %373 : vector<8x128xf32> to vector<8x128xbf16>
    %c0_111 = arith.constant 0 : index
    %c0_112 = arith.constant 0 : index
    %409 = vector.load %arg4[%c0_111, %c0_112] : memref<128x512xbf16, #tpu.memory_space<vmem>>, vector<128x512xbf16>
    %cst_113 = arith.constant dense<0.000000e+00> : vector<8x512xf32>
    %410 = tpu.matmul %408, %409, %cst_113 {dimension_numbers = #tpu.dot_dimension_numbers<[1], [0], [0], [1], [0, 0, 1, 1], [], []>} : vector<8x128xbf16>, vector<128x512xbf16>, vector<8x512xf32> -> vector<8x512xf32>
    %411 = arith.addf %407, %410 : vector<8x512xf32>
    %412 = vector.extract_strided_slice %411 {offsets = [0, 0], sizes = [8, 128], strides = [1, 1]} : vector<8x512xf32> to vector<8x128xf32>
    %413 = arith.negf %412 : vector<8x128xf32>
    %414 = math.exp %413 : vector<8x128xf32>
    %cst_114 = arith.constant 1.000000e+00 : f32
    %415 = vector.broadcast %cst_114 : f32 to vector<8x128xf32>
    %416 = arith.addf %415, %414 : vector<8x128xf32>
    %417 = arith.divf %415, %416 : vector<8x128xf32>
    %418 = vector.extract_strided_slice %411 {offsets = [0, 128], sizes = [8, 128], strides = [1, 1]} : vector<8x512xf32> to vector<8x128xf32>
    %419 = arith.negf %418 : vector<8x128xf32>
    %420 = math.exp %419 : vector<8x128xf32>
    %cst_115 = arith.constant 1.000000e+00 : f32
    %421 = vector.broadcast %cst_115 : f32 to vector<8x128xf32>
    %422 = arith.addf %421, %420 : vector<8x128xf32>
    %423 = arith.divf %421, %422 : vector<8x128xf32>
    %424 = vector.extract_strided_slice %411 {offsets = [0, 256], sizes = [8, 128], strides = [1, 1]} : vector<8x512xf32> to vector<8x128xf32>
    %425 = math.tanh %424 : vector<8x128xf32>
    %426 = vector.extract_strided_slice %411 {offsets = [0, 384], sizes = [8, 128], strides = [1, 1]} : vector<8x512xf32> to vector<8x128xf32>
    %427 = arith.negf %426 : vector<8x128xf32>
    %428 = math.exp %427 : vector<8x128xf32>
    %cst_116 = arith.constant 1.000000e+00 : f32
    %429 = vector.broadcast %cst_116 : f32 to vector<8x128xf32>
    %430 = arith.addf %429, %428 : vector<8x128xf32>
    %431 = arith.divf %429, %430 : vector<8x128xf32>
    %432 = arith.mulf %423, %371 : vector<8x128xf32>
    %433 = arith.mulf %417, %425 : vector<8x128xf32>
    %434 = arith.addf %432, %433 : vector<8x128xf32>
    %435 = math.tanh %434 : vector<8x128xf32>
    %436 = arith.mulf %431, %435 : vector<8x128xf32>
    %437 = tpu.concatenate %436, %404 in 1 : vector<8x128xf32>, vector<8x128xf32> -> vector<8x256xf32>
    %438 = arith.truncf %437 : vector<8x256xf32> to vector<8x256xbf16>
    %c0_117 = arith.constant 0 : index
    %c0_118 = arith.constant 0 : index
    %439 = vector.load %arg6[%c0_117, %c0_118] : memref<256x512xbf16, #tpu.memory_space<vmem>>, vector<256x512xbf16>
    %cst_119 = arith.constant dense<0.000000e+00> : vector<8x512xf32>
    %440 = tpu.matmul %438, %439, %cst_119 {dimension_numbers = #tpu.dot_dimension_numbers<[1], [0], [0], [1], [0, 0, 1, 1], [], []>} : vector<8x256xbf16>, vector<256x512xbf16>, vector<8x512xf32> -> vector<8x512xf32>
    %441 = vector.broadcast %18 : vector<1x512xf32> to vector<8x512xf32>
    %442 = arith.addf %440, %441 : vector<8x512xf32>
    %443 = vector.extract_strided_slice %442 {offsets = [0, 0], sizes = [8, 128], strides = [1, 1]} : vector<8x512xf32> to vector<8x128xf32>
    %444 = arith.negf %443 : vector<8x128xf32>
    %445 = math.exp %444 : vector<8x128xf32>
    %cst_120 = arith.constant 1.000000e+00 : f32
    %446 = vector.broadcast %cst_120 : f32 to vector<8x128xf32>
    %447 = arith.addf %446, %445 : vector<8x128xf32>
    %448 = arith.divf %446, %447 : vector<8x128xf32>
    %449 = vector.extract_strided_slice %442 {offsets = [0, 128], sizes = [8, 128], strides = [1, 1]} : vector<8x512xf32> to vector<8x128xf32>
    %450 = arith.negf %449 : vector<8x128xf32>
    %451 = math.exp %450 : vector<8x128xf32>
    %cst_121 = arith.constant 1.000000e+00 : f32
    %452 = vector.broadcast %cst_121 : f32 to vector<8x128xf32>
    %453 = arith.addf %452, %451 : vector<8x128xf32>
    %454 = arith.divf %452, %453 : vector<8x128xf32>
    %455 = vector.extract_strided_slice %442 {offsets = [0, 256], sizes = [8, 128], strides = [1, 1]} : vector<8x512xf32> to vector<8x128xf32>
    %456 = math.tanh %455 : vector<8x128xf32>
    %457 = vector.extract_strided_slice %442 {offsets = [0, 384], sizes = [8, 128], strides = [1, 1]} : vector<8x512xf32> to vector<8x128xf32>
    %458 = arith.negf %457 : vector<8x128xf32>
    %459 = math.exp %458 : vector<8x128xf32>
    %cst_122 = arith.constant 1.000000e+00 : f32
    %460 = vector.broadcast %cst_122 : f32 to vector<8x128xf32>
    %461 = arith.addf %460, %459 : vector<8x128xf32>
    %462 = arith.divf %460, %461 : vector<8x128xf32>
    %463 = arith.mulf %454, %402 : vector<8x128xf32>
    %464 = arith.mulf %448, %456 : vector<8x128xf32>
    %465 = arith.addf %463, %464 : vector<8x128xf32>
    %466 = math.tanh %465 : vector<8x128xf32>
    %467 = arith.mulf %462, %466 : vector<8x128xf32>
    %c7_i32 = arith.constant 7 : i32
    %468 = arith.index_cast %c7_i32 : i32 to index
    %c0_123 = arith.constant 0 : index
    %c0_124 = arith.constant 0 : index
    %469 = vector.load %arg15[%468, %c0_123, %c0_124] : memref<8x8x512xf32, #tpu.memory_space<vmem>>, vector<1x8x512xf32>
    %470 = vector.shape_cast %469 : vector<1x8x512xf32> to vector<8x512xf32>
    %471 = arith.truncf %436 : vector<8x128xf32> to vector<8x128xbf16>
    %c0_125 = arith.constant 0 : index
    %c0_126 = arith.constant 0 : index
    %472 = vector.load %arg4[%c0_125, %c0_126] : memref<128x512xbf16, #tpu.memory_space<vmem>>, vector<128x512xbf16>
    %cst_127 = arith.constant dense<0.000000e+00> : vector<8x512xf32>
    %473 = tpu.matmul %471, %472, %cst_127 {dimension_numbers = #tpu.dot_dimension_numbers<[1], [0], [0], [1], [0, 0, 1, 1], [], []>} : vector<8x128xbf16>, vector<128x512xbf16>, vector<8x512xf32> -> vector<8x512xf32>
    %474 = arith.addf %470, %473 : vector<8x512xf32>
    %475 = vector.extract_strided_slice %474 {offsets = [0, 0], sizes = [8, 128], strides = [1, 1]} : vector<8x512xf32> to vector<8x128xf32>
    %476 = arith.negf %475 : vector<8x128xf32>
    %477 = math.exp %476 : vector<8x128xf32>
    %cst_128 = arith.constant 1.000000e+00 : f32
    %478 = vector.broadcast %cst_128 : f32 to vector<8x128xf32>
    %479 = arith.addf %478, %477 : vector<8x128xf32>
    %480 = arith.divf %478, %479 : vector<8x128xf32>
    %481 = vector.extract_strided_slice %474 {offsets = [0, 128], sizes = [8, 128], strides = [1, 1]} : vector<8x512xf32> to vector<8x128xf32>
    %482 = arith.negf %481 : vector<8x128xf32>
    %483 = math.exp %482 : vector<8x128xf32>
    %cst_129 = arith.constant 1.000000e+00 : f32
    %484 = vector.broadcast %cst_129 : f32 to vector<8x128xf32>
    %485 = arith.addf %484, %483 : vector<8x128xf32>
    %486 = arith.divf %484, %485 : vector<8x128xf32>
    %487 = vector.extract_strided_slice %474 {offsets = [0, 256], sizes = [8, 128], strides = [1, 1]} : vector<8x512xf32> to vector<8x128xf32>
    %488 = math.tanh %487 : vector<8x128xf32>
    %489 = vector.extract_strided_slice %474 {offsets = [0, 384], sizes = [8, 128], strides = [1, 1]} : vector<8x512xf32> to vector<8x128xf32>
    %490 = arith.negf %489 : vector<8x128xf32>
    %491 = math.exp %490 : vector<8x128xf32>
    %cst_130 = arith.constant 1.000000e+00 : f32
    %492 = vector.broadcast %cst_130 : f32 to vector<8x128xf32>
    %493 = arith.addf %492, %491 : vector<8x128xf32>
    %494 = arith.divf %492, %493 : vector<8x128xf32>
    %495 = arith.mulf %486, %434 : vector<8x128xf32>
    %496 = arith.mulf %480, %488 : vector<8x128xf32>
    %497 = arith.addf %495, %496 : vector<8x128xf32>
    %498 = math.tanh %497 : vector<8x128xf32>
    %499 = arith.mulf %494, %498 : vector<8x128xf32>
    %500 = tpu.concatenate %499, %467 in 1 : vector<8x128xf32>, vector<8x128xf32> -> vector<8x256xf32>
    %501 = arith.truncf %500 : vector<8x256xf32> to vector<8x256xbf16>
    %c0_131 = arith.constant 0 : index
    %c0_132 = arith.constant 0 : index
    %502 = vector.load %arg6[%c0_131, %c0_132] : memref<256x512xbf16, #tpu.memory_space<vmem>>, vector<256x512xbf16>
    %cst_133 = arith.constant dense<0.000000e+00> : vector<8x512xf32>
    %503 = tpu.matmul %501, %502, %cst_133 {dimension_numbers = #tpu.dot_dimension_numbers<[1], [0], [0], [1], [0, 0, 1, 1], [], []>} : vector<8x256xbf16>, vector<256x512xbf16>, vector<8x512xf32> -> vector<8x512xf32>
    %504 = vector.broadcast %18 : vector<1x512xf32> to vector<8x512xf32>
    %505 = arith.addf %503, %504 : vector<8x512xf32>
    %506 = vector.extract_strided_slice %505 {offsets = [0, 0], sizes = [8, 128], strides = [1, 1]} : vector<8x512xf32> to vector<8x128xf32>
    %507 = arith.negf %506 : vector<8x128xf32>
    %508 = math.exp %507 : vector<8x128xf32>
    %cst_134 = arith.constant 1.000000e+00 : f32
    %509 = vector.broadcast %cst_134 : f32 to vector<8x128xf32>
    %510 = arith.addf %509, %508 : vector<8x128xf32>
    %511 = arith.divf %509, %510 : vector<8x128xf32>
    %512 = vector.extract_strided_slice %505 {offsets = [0, 128], sizes = [8, 128], strides = [1, 1]} : vector<8x512xf32> to vector<8x128xf32>
    %513 = arith.negf %512 : vector<8x128xf32>
    %514 = math.exp %513 : vector<8x128xf32>
    %cst_135 = arith.constant 1.000000e+00 : f32
    %515 = vector.broadcast %cst_135 : f32 to vector<8x128xf32>
    %516 = arith.addf %515, %514 : vector<8x128xf32>
    %517 = arith.divf %515, %516 : vector<8x128xf32>
    %518 = vector.extract_strided_slice %505 {offsets = [0, 256], sizes = [8, 128], strides = [1, 1]} : vector<8x512xf32> to vector<8x128xf32>
    %519 = math.tanh %518 : vector<8x128xf32>
    %520 = vector.extract_strided_slice %505 {offsets = [0, 384], sizes = [8, 128], strides = [1, 1]} : vector<8x512xf32> to vector<8x128xf32>
    %521 = arith.negf %520 : vector<8x128xf32>
    %522 = math.exp %521 : vector<8x128xf32>
    %cst_136 = arith.constant 1.000000e+00 : f32
    %523 = vector.broadcast %cst_136 : f32 to vector<8x128xf32>
    %524 = arith.addf %523, %522 : vector<8x128xf32>
    %525 = arith.divf %523, %524 : vector<8x128xf32>
    %526 = arith.mulf %517, %465 : vector<8x128xf32>
    %527 = arith.mulf %511, %519 : vector<8x128xf32>
    %528 = arith.addf %526, %527 : vector<8x128xf32>
    %529 = math.tanh %528 : vector<8x128xf32>
    %530 = arith.mulf %525, %529 : vector<8x128xf32>
    %c8_i32 = arith.constant 8 : i32
    %c0_137 = arith.constant 0 : index
    %c0_138 = arith.constant 0 : index
    %c0_139 = arith.constant 0 : index
    %531 = vector.load %arg13[%c0_137, %c0_138, %c0_139] : memref<2x8x128xf32, #tpu.memory_space<vmem>>, vector<1x8x128xf32>
    %532 = vector.shape_cast %531 : vector<1x8x128xf32> to vector<8x128xf32>
    %533 = vector.shape_cast %499 : vector<8x128xf32> to vector<1x8x128xf32>
    tpu.vector_store %arg13[%c0_137, %c0_138, %c0_139], %533 {strides = array<i32>} : memref<2x8x128xf32, #tpu.memory_space<vmem>>, vector<1x8x128xf32>,
    %c1_140 = arith.constant 1 : index
    %c0_141 = arith.constant 0 : index
    %c0_142 = arith.constant 0 : index
    %534 = vector.load %arg13[%c1_140, %c0_141, %c0_142] : memref<2x8x128xf32, #tpu.memory_space<vmem>>, vector<1x8x128xf32>
    %535 = vector.shape_cast %534 : vector<1x8x128xf32> to vector<8x128xf32>
    %536 = vector.shape_cast %530 : vector<8x128xf32> to vector<1x8x128xf32>
    tpu.vector_store %arg13[%c1_140, %c0_141, %c0_142], %536 {strides = array<i32>} : memref<2x8x128xf32, #tpu.memory_space<vmem>>, vector<1x8x128xf32>,
    %c0_143 = arith.constant 0 : index
    %c0_144 = arith.constant 0 : index
    %c0_145 = arith.constant 0 : index
    %537 = vector.load %arg14[%c0_143, %c0_144, %c0_145] : memref<2x8x128xf32, #tpu.memory_space<vmem>>, vector<1x8x128xf32>
    %538 = vector.shape_cast %537 : vector<1x8x128xf32> to vector<8x128xf32>
    %539 = vector.shape_cast %497 : vector<8x128xf32> to vector<1x8x128xf32>
    tpu.vector_store %arg14[%c0_143, %c0_144, %c0_145], %539 {strides = array<i32>} : memref<2x8x128xf32, #tpu.memory_space<vmem>>, vector<1x8x128xf32>,
    %c1_146 = arith.constant 1 : index
    %c0_147 = arith.constant 0 : index
    %c0_148 = arith.constant 0 : index
    %540 = vector.load %arg14[%c1_146, %c0_147, %c0_148] : memref<2x8x128xf32, #tpu.memory_space<vmem>>, vector<1x8x128xf32>
    %541 = vector.shape_cast %540 : vector<1x8x128xf32> to vector<8x128xf32>
    %542 = vector.shape_cast %528 : vector<8x128xf32> to vector<1x8x128xf32>
    tpu.vector_store %arg14[%c1_146, %c0_147, %c0_148], %542 {strides = array<i32>} : memref<2x8x128xf32, #tpu.memory_space<vmem>>, vector<1x8x128xf32>,
    %c0_149 = arith.constant 0 : index
    %c0_150 = arith.constant 0 : index
    %543 = vector.load %arg8[%c0_149, %c0_150] : memref<1x128xf32, #tpu.memory_space<vmem>>, vector<1x128xf32>
    %544 = vector.broadcast %543 : vector<1x128xf32> to vector<8x128xf32>
    %545 = arith.mulf %530, %544 : vector<8x128xf32>
    %cst_151 = arith.constant dense<0.000000e+00> : vector<8xf32>
    %546 = vector.multi_reduction <add>, %545, %cst_151 [1] : vector<8x128xf32> to vector<8xf32>
    %547 = vector.shape_cast %546 : vector<8xf32> to vector<8x1xf32>
    %c0_152 = arith.constant 0 : index
    %c0_153 = arith.constant 0 : index
    %548 = vector.load %arg9[%c0_152, %c0_153] : memref<1x1xf32, #tpu.memory_space<vmem>>, vector<1x1xf32>
    %549 = vector.broadcast %548 : vector<1x1xf32> to vector<8x1xf32>
    %550 = arith.addf %547, %549 : vector<8x1xf32>
    %551 = arith.negf %550 : vector<8x1xf32>
    %552 = math.exp %551 : vector<8x1xf32>
    %cst_154 = arith.constant 1.000000e+00 : f32
    %553 = vector.broadcast %cst_154 : f32 to vector<8x1xf32>
    %554 = arith.addf %553, %552 : vector<8x1xf32>
    %555 = arith.divf %553, %554 : vector<8x1xf32>
    %c0_155 = arith.constant 0 : index
    %c0_156 = arith.constant 0 : index
    %556 = vector.load %arg12[%c0_155, %c0_156] : memref<8x1xf32, #tpu.memory_space<vmem>>, vector<8x1xf32>
    tpu.vector_store %arg12[%c0_155, %c0_156], %555 {strides = array<i32>} : memref<8x1xf32, #tpu.memory_space<vmem>>, vector<8x1xf32>,
    return
  }
  func.func @transform_0(%arg0: i32) -> (i32, i32, i32) {
    %c0_i32 = arith.constant 0 : i32
    %c0_i32_0 = arith.constant 0 : i32
    %c0_i32_1 = arith.constant 0 : i32
    return %arg0, %c0_i32, %c0_i32_0 : i32, i32, i32
  }
  func.func @transform_1(%arg0: i32) -> (i32, i32) {
    %c0_i32 = arith.constant 0 : i32
    %c0_i32_0 = arith.constant 0 : i32
    %c0_i32_1 = arith.constant 0 : i32
    return %c0_i32, %c0_i32_0 : i32, i32
  }
  func.func @transform_2(%arg0: i32) -> (i32, i32) {
    %c0_i32 = arith.constant 0 : i32
    %c0_i32_0 = arith.constant 0 : i32
    %c0_i32_1 = arith.constant 0 : i32
    return %c0_i32, %c0_i32_0 : i32, i32
  }
  func.func @transform_3(%arg0: i32) -> (i32, i32) {
    %c0_i32 = arith.constant 0 : i32
    %c0_i32_0 = arith.constant 0 : i32
    %c0_i32_1 = arith.constant 0 : i32
    return %c0_i32, %c0_i32_0 : i32, i32
  }
  func.func @transform_4(%arg0: i32) -> (i32, i32) {
    %c0_i32 = arith.constant 0 : i32
    %c0_i32_0 = arith.constant 0 : i32
    %c0_i32_1 = arith.constant 0 : i32
    return %c0_i32, %c0_i32_0 : i32, i32
  }
  func.func @transform_5(%arg0: i32) -> (i32, i32) {
    %c0_i32 = arith.constant 0 : i32
    %c0_i32_0 = arith.constant 0 : i32
    %c0_i32_1 = arith.constant 0 : i32
    return %c0_i32, %c0_i32_0 : i32, i32
  }
  func.func @transform_6(%arg0: i32) -> (i32, i32) {
    %c0_i32 = arith.constant 0 : i32
    %c0_i32_0 = arith.constant 0 : i32
    %c0_i32_1 = arith.constant 0 : i32
    return %c0_i32, %c0_i32_0 : i32, i32
  }
  func.func @transform_7(%arg0: i32) -> (i32, i32) {
    %c0_i32 = arith.constant 0 : i32
    %c0_i32_0 = arith.constant 0 : i32
    %c0_i32_1 = arith.constant 0 : i32
    return %c0_i32, %c0_i32_0 : i32, i32
  }
  func.func @transform_8(%arg0: i32) -> (i32, i32) {
    %c0_i32 = arith.constant 0 : i32
    %c0_i32_0 = arith.constant 0 : i32
    %c0_i32_1 = arith.constant 0 : i32
    return %c0_i32, %c0_i32_0 : i32, i32
  }
  func.func @transform_9(%arg0: i32) -> (i32, i32, i32) {
    %c0_i32 = arith.constant 0 : i32
    %c0_i32_0 = arith.constant 0 : i32
    %c0_i32_1 = arith.constant 0 : i32
    return %c0_i32, %arg0, %c0_i32_0 : i32, i32, i32
  }
  func.func @transform_10(%arg0: i32) -> (i32, i32, i32) {
    %c0_i32 = arith.constant 0 : i32
    %c0_i32_0 = arith.constant 0 : i32
    %c0_i32_1 = arith.constant 0 : i32
    return %c0_i32, %arg0, %c0_i32_0 : i32, i32, i32
  }
  func.func @transform_11(%arg0: i32) -> (i32, i32) {
    %c0_i32 = arith.constant 0 : i32
    %c0_i32_0 = arith.constant 0 : i32
    return %arg0, %c0_i32 : i32, i32
  }
  func.func @transform_12(%arg0: i32) -> (i32, i32, i32) {
    %c0_i32 = arith.constant 0 : i32
    %c0_i32_0 = arith.constant 0 : i32
    %c0_i32_1 = arith.constant 0 : i32
    return %c0_i32, %arg0, %c0_i32_0 : i32, i32, i32
  }
  func.func @transform_13(%arg0: i32) -> (i32, i32, i32) {
    %c0_i32 = arith.constant 0 : i32
    %c0_i32_0 = arith.constant 0 : i32
    %c0_i32_1 = arith.constant 0 : i32
    return %c0_i32, %arg0, %c0_i32_0 : i32, i32, i32
  }
}

</mosaic_0001>

<bundles_post_ra>
// kernel: tpu_custom_call.1
= control target key start
LH: loop header
LB: loop body
LE: loop exit
PB: predicated region body
PF: predicated region fallthrough
CT: control target
= control target key end

     0   :  { %s6966_s0 = inlined_call_operand.vmem [shape: s32[2,64,1], index: 0, kind: input, shape index: {}]   ;;  %s6967_s1 = inlined_call_operand.vmem [shape: bf16[64,128], index: 1, kind: input, shape index: {}]   ;;  %s6968_s2 = inlined_call_operand.hbm [shape: bf16[128,512], index: 2, kind: input, shape index: {}]   ;;  %s6969_s3 = inlined_call_operand.hbm [shape: bf16[128,512], index: 3, kind: input, shape index: {}]   ;;  %s6970_s4 = inlined_call_operand.vmem [shape: f32[1,512], index: 4, kind: input, shape index: {}]   ;;  %s6971_s5 = inlined_call_operand.hbm [shape: bf16[256,512], index: 5, kind: input, shape index: {}]   ;;  %s6972_s6 = inlined_call_operand.vmem [shape: f32[1,512], index: 6, kind: input, shape index: {}]   ;;  %s6973_s7 = inlined_call_operand.vmem [shape: f32[1,128], index: 7, kind: input, shape index: {}]   ;;  %s6974_s8 = inlined_call_operand.<no memory space> [shape: f32[1,1], index: 8, kind: input, shape index: {}]   ;;  %s6975_s9 = inlined_call_operand.vmem [shape: f32[2,16,128], index: 9, kind: input, shape index: {}]   ;;  %s6976_s10 = inlined_call_operand.vmem [shape: f32[2,16,128], index: 10, kind: input, shape index: {}]   ;;  %s6977_s11 = inlined_call_operand.vmem [shape: f32[16,1], index: 11, kind: output, shape index: {0}]   ;;  %s6978_s12 = inlined_call_operand.hbm [shape: f32[2,16,128], index: 12, kind: output, shape index: {1}]   ;;  %s6979_s13 = inlined_call_operand.hbm [shape: f32[2,16,128], index: 13, kind: output, shape index: {2}]  }
   0x1   :  { %7289 = sst [smem:[#allocation109_spill]] %s6966_s0  ;;  %v19_v0 = vstv %s6974_s8 }
   0x2   :  { %7290 = sst [smem:[#allocation110_spill]] %s6967_s1  ;;  %20 = vst [vmem:[#allocation3] sm:$0x1] %v19_v0 }
   0x3   :  { %7291 = sst [smem:[#allocation111_spill]] %s6968_s2 }
   0x4   :  { %7292 = sst [smem:[#allocation112_spill]] %s6969_s3 }
   0x5   :  { %21 = vsyncpa [#allocation5], 0 }
   0x6   :  { %22 = vsyncpa [#allocation8], 0 }
   0x7   :  { %23 = vsyncpa [#allocation6], 0 }
   0x8   :  { %25 = vsyncpa [#allocation6 + $0x1], 0 }
   0x9   :  { %26 = vsyncpa [#allocation14], 0 }
   0xa   :  { %28 = vsyncpa [#allocation14 + $0x1], 0  ;;  %s5084_s27 = smov 0   ;;  %s5086_s28 = smov 0  }
   0xb   :  { %s5088_s29 = smov 0   ;;  %s5090_s30 = smov 0  }
   0xc LB: > { %7293 = sst [smem:[#allocation19_spill]] %s4985_s27  ;;  %s5105_s8 = sadd.s32 4294967295, %s4997_s30   ;;  %s4997_s30 = sphi %s5090_s30, %s7821_s30   ;;  %s4993_s29 = sphi %s5088_s29, %s7825_s29   ;;  %s4989_s28 = sphi %s5086_s28, %s7824_s28   ;;  %s4985_s27 = sphi %s5084_s27, %s7823_s27  }
   0xd   : > { %s3838_s14 = sadd.s32 4294967294, %s4997_s30   ;;  %s5109_s15 = sadd.s32 1, %s4997_s30  }
   0xe   : > { %7294 = sst [smem:[#allocation20_spill]] %s5109_s15  ;;  %s235_s16 = sadd.s32 1, %s4993_s29 }
   0xf   : > { %s232_s17 = ssub.s32 %s4997_s30, %s5109_s15  ;;  %p242_p0 = scmp.ne.s32.totalorder %s4993_s29, %s4989_s28 }
  0x10   : > { %p233_p1 = scmp.eq.s32.totalorder %s232_s17, 0  ;;  %p243_p2 = scmp.eq.s32.totalorder %s4997_s30, 0 }
  0x11   : > { %p324_p3 = scmp.eq.s32.totalorder %s5105_s8, 1  ;;  %p329_p4 = scmp.ne.s32.totalorder %s4989_s28, %s4985_s27 }
  0x12   : > { %s5121_s18 = scalar_select %p233_p1, %s4993_s29, %s235_s16  }
  0x13   : > { %p5123_p5 = por %p243_p2, %p242_p0  ;;  %p5127_p6 = por %p324_p3, %p242_p0 }
  0x14   : > { %7295 = sst [smem:[#allocation21_spill]] %s5121_s18  ;;  %p330_p7 = scmp.eq.s32.totalorder %s3838_s14, 1 }
  0x15   : > { %s7297_s20 = scalar_select %p5127_p6, 1, 0 }
  0x16   : > { %p3839_p8 = scmp.ge.s32.totalorder %s4997_s30, 1  ;;  %p363_p9 = scmp.lt.s32.totalorder %s4997_s30, 3 }
  0x17   : > { %p5133_p10 = por %p330_p7, %p329_p4  ;;  %p6983_p11 = scmp.eq.s32.totalorder %s5105_s8, 0 }
  0x18   : > { %p5138_p12 = pnand %p3839_p8, %p363_p9  ;;  %s4999_s23 = smov [#allocation7]  }
  0x19   : > { %s7298_s21 = scalar_select %p5133_p10, 1, 0 }
  0x1a   : > { %s7300_s22 = scalar_select %p5138_p12, 1, 0 }
  0x1b   : > { %7299 = sst [smem:[#allocation22_spill]] %s7298_s21  ;;  %p4105_p13 = pneg %p5138_p12 }
  0x1c   : > { %s391_s24 = sshll.u32 %s4999_s23, 4  ;;  %s5000_s26 = smov [#allocation4]   ;;  %s392_s24 = int_to_ptr.vmem [resolvable:$true] %s391_s24 }
  0x1d   : > { %p5146_p0 = pnand %p6983_p11, %p4105_p13  ;;  %s378_s14 = sshll.u32 %s5000_s26, 4  ;;  %s379_s14 = int_to_ptr.vmem [resolvable:$true] %s378_s14 }
  0x1e   : > { %s5001_s16 = smov [#allocation9]   ;;  %s4832_s18 = scalar_lea.vmem %s392_s24, 4096 }
  0x1f   : > { %s407_s17 = sshll.u32 %s5001_s16, 4  ;;  %p4823_p1 = pneg %p5146_p0  ;;  %s408_s17 = int_to_ptr.vmem [resolvable:$true] %s407_s17 }
  0x20   : > { %p4833_p2 = scmp.ne.s32.totalorder %s392_s24, %s4832_s18  ;;  %p4840_p7 = scmp.lt.s32.totalorder %s392_s24, %s392_s24 }
  0x21   : > { %p4841_p8 = scmp.lt.s32.totalorder %s4832_s18, %s4832_s18 }
  0x22   : > { %p4835_p3 = pnand %p4833_p2, %p4823_p1 }
  0x23   : > { %p4842_p9 = por %p4841_p8, %p4840_p7 }
  0x24   : > { %p4836_p4 = pneg %p4835_p3 }
  0x26   : > { %p4843_p13 = pnand %p4842_p9, %p4836_p4 }
  0x28   : > { %4846 = shalt.err (!%p4843_p13)
}
  0x29   : > { %s5002_s23 = smov 256   ;;  %s5003_s26 = smov 16  }
  0x2a   : > { %s7302_s3 = sld [smem:[#allocation112_spill]]  ;;  %s4858_s21 = scalar_lea.vmem %s379_s14, 4096 }
  0x2b   : > { %p4859_p11 = scmp.ne.s32.totalorder %s379_s14, %s4858_s21  ;;  %p4866_p10 = scmp.lt.s32.totalorder %s379_s14, %s379_s14 }
  0x2c   : > { %p4867_p6 = scmp.lt.s32.totalorder %s4858_s21, %s4858_s21 }
  0x2d   : > { %p4861_p2 = pnand %p4859_p11, %p4823_p1 }
  0x2e   : > { %p4868_p7 = por %p4867_p6, %p4866_p10 }
  0x2f   : > { %p4862_p3 = pneg %p4861_p2 }
  0x30   : > { %4111 = dma.hbm_to_vmem [thread:$0]  (!%p5146_p0), %s7302_s3, 4096, %s392_s24, [#allocation8], %s5002_s23, %s5002_s23, %s5003_s26  }
  0x31   : > { %p4869_p4 = pnand %p4868_p7, %p4862_p3 }
  0x33   : > { %4872 = shalt.err (!%p4869_p4)
}
  0x34   : > { %s7303_s2 = sld [smem:[#allocation111_spill]]  ;;  %s4884_s15 = scalar_lea.vmem %s408_s17, 8192 }
  0x35   : > { %p4885_p8 = scmp.ne.s32.totalorder %s408_s17, %s4884_s15  ;;  %p4892_p13 = scmp.lt.s32.totalorder %s408_s17, %s408_s17 }
  0x36   : > { %p4893_p2 = scmp.lt.s32.totalorder %s4884_s15, %s4884_s15 }
  0x37   : > { %p4887_p9 = pnand %p4885_p8, %p4823_p1 }
  0x38   : > { %p4894_p12 = por %p4893_p2, %p4892_p13 }
  0x39   : > { %p4888_p11 = pneg %p4887_p9 }
  0x3a   : > { %4108 = dma.hbm_to_vmem [thread:$0]  (!%p5146_p0), %s7303_s2, 4096, %s379_s14, [#allocation5], %s5002_s23, %s5002_s23, %s5003_s26  }
  0x3b   : > { %p4895_p6 = pnand %p4894_p12, %p4888_p11 }
  0x3d   : > { %4898 = shalt.err (!%p4895_p6)
}
  0x3e   : > { %4114 = dma.hbm_to_vmem [thread:$0]  (!%p5146_p0), %s6971_s5, 8192, %s408_s17, [#allocation8], %s5002_s23, %s5002_s23, %s5003_s26  }
  0x3f   : > { %p3843_p10 = scmp.ge.s32.totalorder %s4997_s30, 2 }
  0x41   : > { %426 = sbr.rel (%p3843_p10) target bundleno = 80 (0x50), region = 48 }
  0x46   : > { %437 = sbr.rel (!%p5123_p5) target bundleno = 75 (0x4b), region = 56  ;;  %s439_s27 = sand.u32 (%p5123_p5), 1, %s4993_s29  }
  0x47   : > { %s3845_s14 = sshll.u32 (%p5123_p5), %s4997_s30, 3  ;;  %s3844_s16 = sshll.u32 (%p5123_p5), %s439_s27, 4 }
  0x48   : > { %s443_s25 = scalar_lea.vmem (%p5123_p5), %s6975_s9, %s3845_s14  ;;  %s441_s17 = scalar_lea.vmem (%p5123_p5), [#allocation10], %s3844_s16 }
  0x49   : > { %v474_v1 = vld [vmem:[%s443_s25] sm:$0xff] (%p5123_p5)  ;;  %v476_v2 = vld [vmem:[%s443_s25 + $0x10] sm:$0xff] (%p5123_p5) }
  0x4a   : > { %475 = vst [vmem:[%s441_s17] sm:$0xff] (%p5123_p5), %v474_v1  ;;  %477 = vst [vmem:[%s441_s17 + $0x8] sm:$0xff] (%p5123_p5), %v476_v2 }
  0x4b PF: > { %483 = sbr.rel (!%p5123_p5) target bundleno = 80 (0x50), region = 94  ;;  %s485_s23 = sand.u32 (%p5123_p5), 1, %s4993_s29  }
  0x4c   : > { %s3847_s26 = sshll.u32 (%p5123_p5), %s4997_s30, 3  ;;  %s3846_s21 = sshll.u32 (%p5123_p5), %s485_s23, 4 }
  0x4d   : > { %s489_s2 = scalar_lea.vmem (%p5123_p5), %s6976_s10, %s3847_s26  ;;  %s487_s14 = scalar_lea.vmem (%p5123_p5), [#allocation11], %s3846_s21 }
  0x4e   : > { %v520_v3 = vld [vmem:[%s489_s2] sm:$0xff] (%p5123_p5)  ;;  %v522_v4 = vld [vmem:[%s489_s2 + $0x10] sm:$0xff] (%p5123_p5) }
  0x4f   : > { %521 = vst [vmem:[%s487_s14] sm:$0xff] (%p5123_p5), %v520_v3  ;;  %523 = vst [vmem:[%s487_s14 + $0x8] sm:$0xff] (%p5123_p5), %v522_v4 }
  0x50 PF: > { %p7304_p12 = scmp.ne.s32.totalorder %s7300_s22, 0 }
  0x52   : > { %532 = sbr.rel (%p7304_p12) target bundleno = 3124 (0xc34), region = 132 }
  0x57   : > { %p7305_p5 = scmp.eq.s32.totalorder %s5105_s8, 0 }
  0x59   : > { %4968 = dma.done.wait (%p7305_p5), [#allocation5], 4096   ;;  %p7306_p0 = pmov %p7305_p5 }
  0x5b   : > { %4970 = vsyncadd (%p7306_p0), [#allocation5], 4294963200  ;;  %p7307_p1 = pmov %p7306_p0 }
  0x5c   : > { %p7308_p3 = pmov %p7306_p0 }
  0x5d   : > { %4972 = dma.done.wait (%p7307_p1), [#allocation8], 12288  }
  0x5e   : > { %4974 = vsyncadd (%p7308_p3), [#allocation8], 4294955008  ;;  %p615_p7 = scmp.lt.s32.totalorder %s5105_s8, 1  ;;  %v6987_v5 = vmov 0   ;;  %s7309_s0 = sld [smem:[#allocation109_spill]]  ;;  %v6989_v31 = vlaneseq  ;;  %vm719_vm4 = vcmask 523264  }
  0x5f   : > { %4172 = vset.pattern.permute.xlu1 %v6987_v5  ;;  %4171 = vset.pattern.permute.xlu0 %v6987_v5  ;;  %s7310_s1 = sld [smem:[#allocation110_spill]]  ;;  %v4177_v18 = vld [vmem:[#allocation4 + $0xe4] ss:$16 sps:$4 sm:$0xff]   ;;  %v4179_v19 = vld [vmem:[#allocation4 + $0xe0] ss:$16 sps:$4 sm:$0xff]   ;;  %v5005_v37 = vmov 0.0  }
  0x60   : > { %s5207_s2 = scalar_select %p615_p7, %s5105_s8, 1  ;;  %1047 = vmatprep.mubr.bf16.mxu1 %v6987_v5  ;;  %v4183_v20 = vld [vmem:[#allocation4 + $0xc4] ss:$16 sps:$4 sm:$0xff]   ;;  %1015 = vmatprep.subr.bf16.mxu1 %v4177_v18  ;;  %v4182_v21 = vld [vmem:[#allocation4 + $0xec] ss:$16 sps:$4 sm:$0xff]   ;;  %v634_v32 = vand.u32 127, %v6989_v31 }
  0x61   : > { %1016 = vmatpush1.bf16.msra.mxu1 %v4179_v19  ;;  %v4185_v22 = vld [vmem:[#allocation4 + $0xc0] ss:$16 sps:$4 sm:$0xff]   ;;  %v4189_v23 = vld [vmem:[#allocation4 + $0xa4] ss:$16 sps:$4 sm:$0xff]   ;;  %v4180_v44 = vld [vmem:[#allocation4 + $0xe8] ss:$16 sps:$4 sm:$0xff]  }
  0x62   : > { %s4064_s19 = sshll.u32 %s5207_s2, 6  ;;  %1017 = vmatprep.subr.bf16.mxu1 %v4183_v20  ;;  %v4191_v24 = vld [vmem:[#allocation4 + $0xa0] ss:$16 sps:$4 sm:$0xff]   ;;  %v4195_v25 = vld [vmem:[#allocation4 + $0x84] ss:$16 sps:$4 sm:$0xff]   ;;  %s5301_s14 = sand.u32 1, %s4989_s28  }
  0x63   : > { %v4197_v26 = vld [vmem:[#allocation4 + $0x80] ss:$16 sps:$4 sm:$0xff]   ;;  %v4201_v27 = vld [vmem:[#allocation4 + $0x64] ss:$16 sps:$4 sm:$0xff]   ;;  %v4188_v47 = vld [vmem:[#allocation4 + $0xcc] ss:$16 sps:$4 sm:$0xff]  }
  0x64   : > { %s619_s18 = scalar_lea.vmem %s7309_s0, %s4064_s19  ;;  %v4203_v28 = vld [vmem:[#allocation4 + $0x60] ss:$16 sps:$4 sm:$0xff]   ;;  %v4207_v29 = vld [vmem:[#allocation4 + $0x44] ss:$16 sps:$4 sm:$0xff]   ;;  %v4186_v51 = vld [vmem:[#allocation4 + $0xc8] ss:$16 sps:$4 sm:$0xff]  }
  0x65   : > { %v627_v6 = vld [vmem:[%s619_s18 + $0x10] sm:$0xff]  ;;  %v625_v7 = vld [vmem:[%s619_s18] sm:$0xff]  ;;  %v628_v8 = vld [vmem:[%s619_s18 + $0x18] sm:$0xff]  ;;  %1018 = vmatpush1.bf16.msra.mxu1 %v4185_v22  ;;  %s5318_s19 = sshll.u32 %s5301_s14, 4  ;;  %p7814_p8 = scmp.ne.s32.totalorder %s7297_s20, 0 }
  0x66   : > { %642 = vperm.xlu1 %4172, %v627_v6   ;;  %636 = vperm.xlu0 %4171, %v625_v7   ;;  %v626_v9 = vld [vmem:[%s619_s18 + $0x8] sm:$0xff]  ;;  %v4173_v10 = vld [vmem:[%s7310_s1 + $0x18] sm:$0xff]   ;;  %v4174_v12 = vld [vmem:[%s7310_s1 + $0x10] sm:$0xff]   ;;  %s549_s22 = scalar_lea.vmem [#allocation10], %s5318_s19  ;;  %s556_s15 = scalar_lea.vmem [#allocation11], %s5318_s19 }
  0x67   : > { %v630_v11 = vld [vmem:[%s619_s18 + $0x28] sm:$0xff]  ;;  %v629_v13 = vld [vmem:[%s619_s18 + $0x20] sm:$0xff]  ;;  %4073 = vmatprep.subr.bf16.mxu0 %v4173_v10  ;;  %v632_v15 = vld [vmem:[%s619_s18 + $0x38] sm:$0xff]  ;;  %1019 = vmatprep.subr.bf16.mxu1 %v4189_v23  ;;  %s6854_s23 = scalar_lea.vmem [#allocation13], %s5318_s19  ;;  %s6858_s26 = scalar_lea.vmem [#allocation12], %s5318_s19 }
  0x68   : > { %v4175_v14 = vld [vmem:[%s7310_s1 + $0x8] sm:$0xff]   ;;  %4074 = vmatpush3.bf16.msra.mxu0 %v4173_v10  ;;  %v631_v16 = vld [vmem:[%s619_s18 + $0x30] sm:$0xff]  ;;  %v4176_v17 = vld [vmem:[%s7310_s1] sm:$0xff]   ;;  %s3638_s27 = sshll.u32 %s6858_s26, 4  ;;  %s7288_s19 = sshll.u32 %s5105_s8, 7  ;;  %s6872_s27 = int_to_ptr.vmem [resolvable:$true] %s3638_s27 }
  0x69   : > { %4075 = vmatprep.subr.bf16.mxu0 %v4174_v12  ;;  %1020 = vmatpush1.bf16.msra.mxu1 %v4191_v24  ;;  %v4209_v30 = vld [vmem:[#allocation4 + $0x40] ss:$16 sps:$4 sm:$0xff]   ;;  %v4194_v54 = vld [vmem:[#allocation4 + $0xac] ss:$16 sps:$4 sm:$0xff]   ;;  %v4192_v58 = vld [vmem:[#allocation4 + $0xa8] ss:$16 sps:$4 sm:$0xff]  }
  0x6a   : > { %645 = vperm.xlu1 %4172, %v628_v8   ;;  %639 = vperm.xlu0 %4171, %v626_v9   ;;  %v4200_v59 = vld [vmem:[#allocation4 + $0x8c] ss:$16 sps:$4 sm:$0xff]   ;;  %v4198_v60 = vld [vmem:[#allocation4 + $0x88] ss:$16 sps:$4 sm:$0xff]   ;;  %v4213_v1 = vld [vmem:[#allocation4 + $0x24] ss:$16 sps:$4 sm:$0xff]  }
  0x6b   : > { %1021 = vmatprep.subr.bf16.mxu1 %v4195_v25  ;;  %v4206_v61 = vld [vmem:[#allocation4 + $0x6c] ss:$16 sps:$4 sm:$0xff]   ;;  %v4204_v62 = vld [vmem:[#allocation4 + $0x68] ss:$16 sps:$4 sm:$0xff]   ;;  %v4215_v3 = vld [vmem:[#allocation4 + $0x20] ss:$16 sps:$4 sm:$0xff]  }
  0x6c   : > { %4076 = vmatpush3.bf16.msra.mxu0 %v4174_v12  ;;  %v4212_v63 = vld [vmem:[#allocation4 + $0x4c] ss:$16 sps:$4 sm:$0xff]   ;;  %v4210_v0 = vld [vmem:[#allocation4 + $0x48] ss:$16 sps:$4 sm:$0xff]   ;;  %v4219_v6 = vld [vmem:[#allocation4 + $0x4] ss:$16 sps:$4 sm:$0xff]  }
  0x6d   : > { %4077 = vmatprep.subr.bf16.mxu0 %v4175_v14  ;;  %1022 = vmatpush1.bf16.msra.mxu1 %v4197_v26  ;;  %v4218_v2 = vld [vmem:[#allocation4 + $0x2c] ss:$16 sps:$4 sm:$0xff]   ;;  %v4216_v4 = vld [vmem:[#allocation4 + $0x28] ss:$16 sps:$4 sm:$0xff]   ;;  %v4221_v8 = vld [vmem:[#allocation4] ss:$16 sps:$4 sm:$0xff]  }
  0x6e   : > { %651 = vperm.xlu1 %4172, %v630_v11   ;;  %648 = vperm.xlu0 %4171, %v629_v13   ;;  %v4224_v7 = vld [vmem:[#allocation4 + $0xc] ss:$16 sps:$4 sm:$0xff]   ;;  %v4222_v9 = vld [vmem:[#allocation4 + $0x8] ss:$16 sps:$4 sm:$0xff]   ;;  %v5232_v10 = vld [vmem:[#allocation7 + $0xe4] ss:$16 sps:$4 sm:$0xff]  }
  0x6f   : > { %1023 = vmatprep.subr.bf16.mxu1 %v4201_v27  ;;  %7311 = vst [vmem:[#allocation23_spill] sm:$0xff] %v5232_v10  ;;  %v5234_v11 = vld [vmem:[#allocation7 + $0xec] ss:$16 sps:$4 sm:$0xff]   ;;  %v5242_v19 = vld [vmem:[#allocation7 + $0xc4] ss:$16 sps:$4 sm:$0xff]   ;;  %s4899_s17 = scalar_lea.vmem %s6872_s27, 256 }
  0x70   : > { %4078 = vmatpush3.bf16.msra.mxu0 %v4175_v14  ;;  %7312 = vst [vmem:[#allocation24_spill] sm:$0xff] %v5234_v11  ;;  %v5244_v20 = vld [vmem:[#allocation7 + $0xcc] ss:$16 sps:$4 sm:$0xff]   ;;  %v5250_v22 = vld [vmem:[#allocation7 + $0xc0] ss:$16 sps:$4 sm:$0xff]   ;;  %p4900_p4 = scmp.ne.s32.totalorder %s6872_s27, %s4899_s17 }
  0x71   : > { %4079 = vmatprep.subr.bf16.mxu0 %v4176_v17  ;;  %1024 = vmatpush1.bf16.msra.mxu1 %v4203_v28  ;;  %v5252_v23 = vld [vmem:[#allocation7 + $0xc8] ss:$16 sps:$4 sm:$0xff]   ;;  %v5256_v24 = vld [vmem:[#allocation7 + $0xa4] ss:$16 sps:$4 sm:$0xff]   ;;  %v5258_v25 = vld [vmem:[#allocation7 + $0xac] ss:$16 sps:$4 sm:$0xff]  }
  0x72   : > { %657 = vperm.xlu1 %4172, %v632_v15   ;;  %654 = vperm.xlu0 %4171, %v631_v16   ;;  %v5238_v16 = vld [vmem:[#allocation7 + $0xe0] ss:$16 sps:$4 sm:$0xff]   ;;  %v5266_v28 = vld [vmem:[#allocation7 + $0xa8] ss:$16 sps:$4 sm:$0xff]   ;;  %p4901_p9 = pnand %p4900_p4, %p7814_p8 }
  0x73   : > { %1025 = vmatprep.subr.bf16.mxu1 %v4207_v29  ;;  %v5264_v27 = vld [vmem:[#allocation7 + $0xa0] ss:$16 sps:$4 sm:$0xff]   ;;  %v5438_v31 = vld [vmem:[#allocation9 + $0x8] ss:$16 sps:$4 sm:$0xff]  }
  0x74   : > { %4080 = vmatpush3.bf16.msra.mxu0 %v4176_v17  ;;  %v5240_v17 = vld [vmem:[#allocation7 + $0xe8] ss:$16 sps:$4 sm:$0xff]   ;;  %7335 = vst [vmem:[#allocation47_spill] sm:$0xff] %v5438_v31  ;;  %p4902_p11 = pneg %p4901_p9 }
  0x75   : > { %1088 = vmatprep.subr.bf16.mxu0 %v4182_v21  ;;  %1026 = vmatpush1.bf16.msra.mxu1 %v4209_v30  ;;  %v5270_v30 = vld [vmem:[#allocation7 + $0x84] ss:$16 sps:$4 sm:$0xff]  }
  0x76   : > { %1027 = vmatprep.subr.bf16.mxu1 %v4213_v1  ;;  %v5372_v1 = vld [vmem:[#allocation9 + $0xa4] ss:$16 sps:$4 sm:$0xff]  }
  0x79   : > { %1028 = vmatpush1.bf16.msra.mxu1 %v4215_v3  ;;  %v5376_v3 = vld [vmem:[#allocation9 + $0xa0] ss:$16 sps:$4 sm:$0xff]  }
  0x7a   : > { %1029 = vmatprep.subr.bf16.mxu1 %v4219_v6  ;;  %7314 = vst [vmem:[#allocation26_spill] sm:$0xff] %v5376_v3  ;;  %v5384_v6 = vld [vmem:[#allocation9 + $0x84] ss:$16 sps:$4 sm:$0xff]  }
  0x7b   : > { %7316 = vst [vmem:[#allocation28_spill] sm:$0xff] %v5384_v6 }
  0x7d   : > { %1030 = vmatpush1.bf16.msra.mxu1 %v4221_v8  ;;  %v5388_v8 = vld [vmem:[#allocation9 + $0x80] ss:$16 sps:$4 sm:$0xff]  }
  0x7e   : > { %1397 = vmatprep.subr.bf16.mxu1 %v5232_v10  ;;  %7318 = vst [vmem:[#allocation30_spill] sm:$0xff] %v5388_v8 }
  0xe1   : > { %v643_v33 = vpop.permute.xlu1 %642  ;;  %v637_v34 = vpop.permute.xlu0 %636 }
  0xe2   : > { %vm661_vm0 = vcmp.eq.s32.totalorder %v643_v33, %v634_v32  ;;  %vm659_vm1 = vcmp.eq.s32.totalorder %v637_v34, %v634_v32  ;;  %v5276_v34 = vld [vmem:[#allocation7 + $0x80] ss:$16 sps:$4 sm:$0xff]  }
  0xe3   : > { %v3861_v38 = vsel %vm661_vm0, 1.0, %v5005_v37  ;;  %v3859_v39 = vsel %vm659_vm1, 1.0, %v5005_v37 }
  0xe5   : > { %v646_v35 = vpop.permute.xlu1 %645  ;;  %v640_v36 = vpop.permute.xlu0 %639 }
  0xe6   : > { %vm662_vm2 = vcmp.eq.s32.totalorder %v646_v35, %v634_v32  ;;  %vm660_vm3 = vcmp.eq.s32.totalorder %v640_v36, %v634_v32  ;;  %v5278_v35 = vld [vmem:[#allocation7 + $0x88] ss:$16 sps:$4 sm:$0xff]   ;;  %v5282_v36 = vld [vmem:[#allocation7 + $0x64] ss:$16 sps:$4 sm:$0xff]  }
  0xe7   : > { %v3862_v40 = vsel %vm662_vm2, 1.0, %v5005_v37  ;;  %v3860_v41 = vsel %vm660_vm3, 1.0, %v5005_v37 }
  0xe8   : > { %v684_v42 = vpack.c.bf16 %v3862_v40, %v3861_v38  ;;  %v683_v43 = vpack.c.bf16 %v3860_v41, %v3859_v39  ;;  %v5290_v39 = vld [vmem:[#allocation7 + $0x60] ss:$16 sps:$4 sm:$0xff]   ;;  %v5292_v40 = vld [vmem:[#allocation7 + $0x68] ss:$16 sps:$4 sm:$0xff]  }
  0xe9   : > { %v652_v45 = vpop.permute.xlu1 %651  ;;  %v649_v46 = vpop.permute.xlu0 %648 }
  0xea   : > { %vm664_vm5 = vcmp.eq.s32.totalorder %v652_v45, %v634_v32  ;;  %vm663_vm6 = vcmp.eq.s32.totalorder %v649_v46, %v634_v32  ;;  %4081 = vmatprep.mubr.msk.bf16.mxu0 %vm719_vm4, %v683_v43  ;;  %v5298_v43 = vld [vmem:[#allocation7 + $0x4c] ss:$16 sps:$4 sm:$0xff]   ;;  %v5307_v45 = vld [vmem:[#allocation7 + $0x48] ss:$16 sps:$4 sm:$0xff]   ;;  %v5311_v46 = vld [vmem:[#allocation7 + $0x24] ss:$16 sps:$4 sm:$0xff]  }
  0xeb   : > { %v3864_v48 = vsel %vm664_vm5, 1.0, %v5005_v37  ;;  %v3863_v49 = vsel %vm663_vm6, 1.0, %v5005_v37  ;;  %4082 = vmatmul.mubr.msk.bf16.vlgmr.msra.gmra.mxu0 %vm719_vm4, %v684_v42  ;;  %v5296_v42 = vld [vmem:[#allocation7 + $0x44] ss:$16 sps:$4 sm:$0xff]  }
  0xec   : > { %v685_v50 = vpack.c.bf16 %v3864_v48, %v3863_v49  ;;  %1089 = vmatpush1.bf16.msra.mxu0 %v4180_v44  ;;  %v5305_v44 = vld [vmem:[#allocation7 + $0x40] ss:$16 sps:$4 sm:$0xff]   ;;  %v5324_v49 = vld [vmem:[#allocation7 + $0x28] ss:$16 sps:$4 sm:$0xff]  }
  0xed   : > { %v658_v52 = vpop.permute.xlu1 %657  ;;  %v655_v53 = vpop.permute.xlu0 %654  ;;  %1090 = vmatprep.subr.bf16.mxu0 %v4188_v47  ;;  %v5313_v47 = vld [vmem:[#allocation7 + $0x2c] ss:$16 sps:$4 sm:$0xff]   ;;  %v5322_v48 = vld [vmem:[#allocation7 + $0x20] ss:$16 sps:$4 sm:$0xff]  }
  0xee   : > { %vm666_vm7 = vcmp.eq.s32.totalorder %v658_v52, %v634_v32  ;;  %vm665_vm8 = vcmp.eq.s32.totalorder %v655_v53, %v634_v32  ;;  %4085 = vmatprep.mubr.msk.bf16.mxu0 %vm719_vm4, %v685_v50  ;;  %v5272_v32 = vld [vmem:[#allocation7 + $0x8c] ss:$16 sps:$4 sm:$0xff]   ;;  %v5335_v53 = vld [vmem:[#allocation7] ss:$16 sps:$4 sm:$0xff]  }
  0xef   : > { %v3866_v55 = vsel %vm666_vm7, 1.0, %v5005_v37  ;;  %v3865_v56 = vsel %vm665_vm8, 1.0, %v5005_v37  ;;  %v5284_v37 = vld [vmem:[#allocation7 + $0x6c] ss:$16 sps:$4 sm:$0xff]  }
  0xf0   : > { %v686_v57 = vpack.c.bf16 %v3866_v55, %v3865_v56  ;;  %1091 = vmatpush1.bf16.msra.mxu0 %v4186_v51  ;;  %v5329_v51 = vld [vmem:[#allocation7 + $0x4] ss:$16 sps:$4 sm:$0xff]   ;;  %v5331_v52 = vld [vmem:[#allocation7 + $0xc] ss:$16 sps:$4 sm:$0xff]  }
  0xf1   : > { %1092 = vmatprep.subr.bf16.mxu0 %v4194_v54  ;;  %v5337_v54 = vld [vmem:[#allocation7 + $0x8] ss:$16 sps:$4 sm:$0xff]   ;;  %v1194_v55 = vld [vmem:[%s549_s22] sm:$0xff] }
  0xf2   : > { %v1204_v56 = vpack.c.bf16 %v1194_v55, %v1194_v55  ;;  %v5432_v55 = vld [vmem:[#allocation9 + $0x4] ss:$16 sps:$4 sm:$0xff]  }
  0xf3   : > { %4086 = vmatmul.mubr.msk.bf16.gmra.mxu0 %vm719_vm4, %v686_v57  ;;  %v5348_v57 = vld [vmem:[#allocation9 + $0xe4] ss:$16 sps:$4 sm:$0xff]   ;;  %7332 = vst [vmem:[#allocation44_spill] sm:$0xff] %v5432_v55 }
  0xf4   : > { %1093 = vmatpush1.bf16.msra.mxu0 %v4192_v58  ;;  %1120 = vmatprep.mubr.bf16.mxu0 %v6987_v5  ;;  %v5350_v58 = vld [vmem:[#allocation9 + $0xec] ss:$16 sps:$4 sm:$0xff]  }
  0xf5   : > { %1094 = vmatprep.subr.bf16.mxu0 %v4200_v59  ;;  %v5352_v59 = vld [vmem:[#allocation9 + $0xe0] ss:$16 sps:$4 sm:$0xff]  }
  0xf8   : > { %1095 = vmatpush1.bf16.msra.mxu0 %v4198_v60  ;;  %v5354_v60 = vld [vmem:[#allocation9 + $0xe8] ss:$16 sps:$4 sm:$0xff]  }
  0xf9   : > { %1096 = vmatprep.subr.bf16.mxu0 %v4206_v61  ;;  %v5360_v61 = vld [vmem:[#allocation9 + $0xc4] ss:$16 sps:$4 sm:$0xff]  }
  0xfc   : > { %1097 = vmatpush1.bf16.msra.mxu0 %v4204_v62  ;;  %v5362_v62 = vld [vmem:[#allocation9 + $0xcc] ss:$16 sps:$4 sm:$0xff]  }
  0xfd   : > { %1098 = vmatprep.subr.bf16.mxu0 %v4212_v63  ;;  %v5364_v63 = vld [vmem:[#allocation9 + $0xc0] ss:$16 sps:$4 sm:$0xff]  }
 0x100   : > { %1099 = vmatpush1.bf16.msra.mxu0 %v4210_v0  ;;  %v5366_v0 = vld [vmem:[#allocation9 + $0xc8] ss:$16 sps:$4 sm:$0xff]  }
 0x101   : > { %1100 = vmatprep.subr.bf16.mxu0 %v4218_v2  ;;  %v5374_v2 = vld [vmem:[#allocation9 + $0xac] ss:$16 sps:$4 sm:$0xff]  }
 0x102   : > { %7313 = vst [vmem:[#allocation25_spill] sm:$0xff] %v5374_v2 }
 0x104   : > { %1101 = vmatpush1.bf16.msra.mxu0 %v4216_v4  ;;  %v5378_v4 = vld [vmem:[#allocation9 + $0xa8] ss:$16 sps:$4 sm:$0xff]  }
 0x105   : > { %1102 = vmatprep.subr.bf16.mxu0 %v4224_v7  ;;  %7315 = vst [vmem:[#allocation27_spill] sm:$0xff] %v5378_v4  ;;  %v5386_v7 = vld [vmem:[#allocation9 + $0x8c] ss:$16 sps:$4 sm:$0xff]  }
 0x106   : > { %7317 = vst [vmem:[#allocation29_spill] sm:$0xff] %v5386_v7 }
 0x108   : > { %1103 = vmatpush1.bf16.msra.mxu0 %v4222_v9  ;;  %v5390_v9 = vld [vmem:[#allocation9 + $0x88] ss:$16 sps:$4 sm:$0xff]  }
 0x109   : > { %1438 = vmatprep.subr.bf16.mxu0 %v5234_v11  ;;  %7319 = vst [vmem:[#allocation31_spill] sm:$0xff] %v5390_v9 }
 0x1ab   : > { %v4083_v12 = vpop.f32.mrf.mxu0 }
 0x1ad   : > { %v766_v13 = vpop.f32.mrf.mxu0 }
 0x1af   : > { %v4084_v14 = vpop.f32.mrf.mxu0 }
 0x1b0   : > { %v798_v29 = vpack.c.bf16 %v4084_v14, %v4083_v12  ;;  %v5396_v12 = vld [vmem:[#allocation9 + $0x64] ss:$16 sps:$4 sm:$0xff]   ;;  %v5400_v14 = vld [vmem:[#allocation9 + $0x60] ss:$16 sps:$4 sm:$0xff]  }
 0x1b1   : > { %v769_v15 = vpop.f32.mrf.mxu0  ;;  %7320 = vst [vmem:[#allocation32_spill] sm:$0xff] %v5396_v12  ;;  %7322 = vst [vmem:[#allocation34_spill] sm:$0xff] %v5400_v14 }
 0x1b2   : > { %v797_v18 = vpack.c.bf16 %v769_v15, %v766_v13  ;;  %v5398_v13 = vld [vmem:[#allocation9 + $0x6c] ss:$16 sps:$4 sm:$0xff]   ;;  %v5402_v15 = vld [vmem:[#allocation9 + $0x68] ss:$16 sps:$4 sm:$0xff]  }
 0x1b3   : > { %v5246_v21 = vpop.f32.mrf.mxu0  ;;  %7321 = vst [vmem:[#allocation33_spill] sm:$0xff] %v5398_v13  ;;  %7323 = vst [vmem:[#allocation35_spill] sm:$0xff] %v5402_v15 }
 0x1b4   : > { %1048 = vmatmul.mubr.bf16.vlgmr.msra.gmra.mxu1 %v797_v18  ;;  %1121 = vmatmul.mubr.bf16.vlgmr.msra.gmra.mxu0 %v797_v18  ;;  %v5408_v18 = vld [vmem:[#allocation9 + $0x44] ss:$16 sps:$4 sm:$0xff]  }
 0x1b5   : > { %1398 = vmatpush1.bf16.msra.mxu1 %v5238_v16  ;;  %1439 = vmatpush1.bf16.msra.mxu0 %v5240_v17  ;;  %v782_v26 = vpop.f32.mrf.mxu0  ;;  %7324 = vst [vmem:[#allocation36_spill] sm:$0xff] %v5408_v18 }
 0x1b6   : > { %1399 = vmatprep.subr.bf16.mxu1 %v5242_v19  ;;  %1440 = vmatprep.subr.bf16.mxu0 %v5244_v20 }
 0x1b7   : > { %1057 = vmatprep.mubr.bf16.mxu1 %v6987_v5  ;;  %1130 = vmatprep.mubr.bf16.mxu0 %v6987_v5  ;;  %v4088_v33 = vpop.f32.mrf.mxu0 }
 0x1b8   : > { %v800_v50 = vpack.c.bf16 %v4088_v33, %v5246_v21  ;;  %v5410_v21 = vld [vmem:[#allocation9 + $0x4c] ss:$16 sps:$4 sm:$0xff]   ;;  %v5420_v33 = vld [vmem:[#allocation9 + $0x24] ss:$16 sps:$4 sm:$0xff]  }
 0x1b9   : > { %1400 = vmatpush1.bf16.msra.mxu1 %v5250_v22  ;;  %1441 = vmatpush1.bf16.msra.mxu0 %v5252_v23  ;;  %v785_v38 = vpop.f32.mrf.mxu0  ;;  %7325 = vst [vmem:[#allocation37_spill] sm:$0xff] %v5410_v21  ;;  %7328 = vst [vmem:[#allocation40_spill] sm:$0xff] %v5420_v33 }
 0x1ba   : > { %1401 = vmatprep.subr.bf16.mxu1 %v5256_v24  ;;  %1442 = vmatprep.subr.bf16.mxu0 %v5258_v25  ;;  %v799_v41 = vpack.c.bf16 %v785_v38, %v782_v26  ;;  %v5412_v26 = vld [vmem:[#allocation9 + $0x40] ss:$16 sps:$4 sm:$0xff]   ;;  %v5422_v38 = vld [vmem:[#allocation9 + $0x2c] ss:$16 sps:$4 sm:$0xff]  }
 0x1bb   : > { %7326 = vst [vmem:[#allocation38_spill] sm:$0xff] %v5412_v26  ;;  %7329 = vst [vmem:[#allocation41_spill] sm:$0xff] %v5422_v38 }
 0x1bc   : > { %1058 = vmatmul.mubr.bf16.gmra.mxu1 %v798_v29  ;;  %1131 = vmatmul.mubr.bf16.gmra.mxu0 %v798_v29  ;;  %v5414_v29 = vld [vmem:[#allocation9 + $0x48] ss:$16 sps:$4 sm:$0xff]  }
 0x1bd   : > { %1402 = vmatpush1.bf16.msra.mxu1 %v5264_v27  ;;  %1443 = vmatpush1.bf16.msra.mxu0 %v5266_v28  ;;  %7327 = vst [vmem:[#allocation39_spill] sm:$0xff] %v5414_v29 }
 0x1be   : > { %1403 = vmatprep.subr.bf16.mxu1 %v5270_v30  ;;  %1444 = vmatprep.subr.bf16.mxu0 %v5272_v32 }
 0x1bf   : > { %1067 = vmatprep.mubr.bf16.mxu1 %v6987_v5  ;;  %1140 = vmatprep.mubr.bf16.mxu0 %v6987_v5 }
 0x1c1   : > { %1404 = vmatpush1.bf16.msra.mxu1 %v5276_v34  ;;  %1445 = vmatpush1.bf16.msra.mxu0 %v5278_v35 }
 0x1c2   : > { %1405 = vmatprep.subr.bf16.mxu1 %v5282_v36  ;;  %1446 = vmatprep.subr.bf16.mxu0 %v5284_v37 }
 0x1c4   : > { %1068 = vmatmul.mubr.bf16.gmra.mxu1 %v799_v41  ;;  %1141 = vmatmul.mubr.bf16.gmra.mxu0 %v799_v41  ;;  %v5424_v41 = vld [vmem:[#allocation9 + $0x20] ss:$16 sps:$4 sm:$0xff]  }
 0x1c5   : > { %1406 = vmatpush1.bf16.msra.mxu1 %v5290_v39  ;;  %1447 = vmatpush1.bf16.msra.mxu0 %v5292_v40  ;;  %7330 = vst [vmem:[#allocation42_spill] sm:$0xff] %v5424_v41 }
 0x1c6   : > { %1407 = vmatprep.subr.bf16.mxu1 %v5296_v42  ;;  %1448 = vmatprep.subr.bf16.mxu0 %v5298_v43 }
 0x1c7   : > { %1077 = vmatprep.mubr.bf16.mxu1 %v6987_v5  ;;  %1150 = vmatprep.mubr.bf16.mxu0 %v6987_v5 }
 0x1c9   : > { %1408 = vmatpush1.bf16.msra.mxu1 %v5305_v44  ;;  %1449 = vmatpush1.bf16.msra.mxu0 %v5307_v45 }
 0x1ca   : > { %1409 = vmatprep.subr.bf16.mxu1 %v5311_v46  ;;  %1450 = vmatprep.subr.bf16.mxu0 %v5313_v47 }
 0x1cc   : > { %1078 = vmatmul.mubr.bf16.gmra.mxu1 %v800_v50  ;;  %1151 = vmatmul.mubr.bf16.gmra.mxu0 %v800_v50  ;;  %v5426_v50 = vld [vmem:[#allocation9 + $0x28] ss:$16 sps:$4 sm:$0xff]  }
 0x1cd   : > { %1410 = vmatpush1.bf16.msra.mxu1 %v5322_v48  ;;  %1451 = vmatpush1.bf16.msra.mxu0 %v5324_v49  ;;  %7331 = vst [vmem:[#allocation43_spill] sm:$0xff] %v5426_v50 }
 0x1ce   : > { %1411 = vmatprep.subr.bf16.mxu1 %v5329_v51  ;;  %1452 = vmatprep.subr.bf16.mxu0 %v5331_v52 }
 0x1cf   : > { %1429 = vmatprep.mubr.bf16.mxu1 %v6987_v5  ;;  %1470 = vmatprep.mubr.bf16.mxu0 %v6987_v5  ;;  %v5436_v5 = vld [vmem:[#allocation9] ss:$16 sps:$4 sm:$0xff]  }
 0x1d0   : > { %7334 = vst [vmem:[#allocation46_spill] sm:$0xff] %v5436_v5 }
 0x1d1   : > { %1412 = vmatpush1.bf16.msra.mxu1 %v5335_v53  ;;  %1453 = vmatpush1.bf16.msra.mxu0 %v5337_v54 }
 0x1d2   : > { %1914 = vmatprep.subr.bf16.mxu1 %v5348_v57  ;;  %1955 = vmatprep.subr.bf16.mxu0 %v5350_v58 }
 0x1d4   : > { %1430 = vmatmul.mubr.bf16.vlgmr.msra.gmra.mxu1 %v1204_v56  ;;  %1471 = vmatmul.mubr.bf16.vlgmr.msra.gmra.mxu0 %v1204_v56  ;;  %v5434_v56 = vld [vmem:[#allocation9 + $0xc] ss:$16 sps:$4 sm:$0xff]  }
 0x1d5   : > { %1915 = vmatpush1.bf16.msra.mxu1 %v5352_v59  ;;  %1956 = vmatpush1.bf16.msra.mxu0 %v5354_v60  ;;  %7333 = vst [vmem:[#allocation45_spill] sm:$0xff] %v5434_v56 }
 0x1d6   : > { %1916 = vmatprep.subr.bf16.mxu1 %v5360_v61  ;;  %1957 = vmatprep.subr.bf16.mxu0 %v5362_v62 }
 0x1d9   : > { %1917 = vmatpush1.bf16.msra.mxu1 %v5364_v63  ;;  %1958 = vmatpush1.bf16.msra.mxu0 %v5366_v0 }
 0x1da   : > { %1918 = vmatprep.subr.bf16.mxu1 %v5372_v1  ;;  %1959 = vmatprep.subr.bf16.mxu0 %v5374_v2 }
 0x1dd   : > { %1919 = vmatpush1.bf16.msra.mxu1 %v5376_v3  ;;  %1960 = vmatpush1.bf16.msra.mxu0 %v5378_v4 }
 0x1de   : > { %1920 = vmatprep.subr.bf16.mxu1 %v5384_v6  ;;  %1961 = vmatprep.subr.bf16.mxu0 %v5386_v7 }
 0x1e1   : > { %1921 = vmatpush1.bf16.msra.mxu1 %v5388_v8  ;;  %1962 = vmatpush1.bf16.msra.mxu0 %v5390_v9 }
 0x1e2   : > { %1922 = vmatprep.subr.bf16.mxu1 %v5396_v12  ;;  %1963 = vmatprep.subr.bf16.mxu0 %v5398_v13 }
 0x1e5   : > { %1923 = vmatpush1.bf16.msra.mxu1 %v5400_v14  ;;  %1964 = vmatpush1.bf16.msra.mxu0 %v5402_v15 }
 0x1e6   : > { %1924 = vmatprep.subr.bf16.mxu1 %v5408_v18  ;;  %1965 = vmatprep.subr.bf16.mxu0 %v5410_v21 }
 0x1e9   : > { %1925 = vmatpush1.bf16.msra.mxu1 %v5412_v26  ;;  %1966 = vmatpush1.bf16.msra.mxu0 %v5414_v29  ;;  %v5504_v29 = vld [vmem:[#allocation9 + $0x14c] ss:$16 sps:$4 sm:$0xff]  }
 0x1ea   : > { %1926 = vmatprep.subr.bf16.mxu1 %v5420_v33  ;;  %1967 = vmatprep.subr.bf16.mxu0 %v5422_v38  ;;  %v5444_v38 = vld [vmem:[#allocation9 + $0x1e4] ss:$16 sps:$4 sm:$0xff]   ;;  %v5450_v33 = vld [vmem:[#allocation9 + $0x1e8] ss:$16 sps:$4 sm:$0xff]   ;;  %7357 = vst [vmem:[#allocation69_spill] sm:$0xff] %v5504_v29 }
 0x1eb   : > { %7336 = vst [vmem:[#allocation48_spill] sm:$0xff] %v5444_v38  ;;  %7339 = vst [vmem:[#allocation51_spill] sm:$0xff] %v5450_v33 }
 0x1ed   : > { %1927 = vmatpush1.bf16.msra.mxu1 %v5424_v41  ;;  %1968 = vmatpush1.bf16.msra.mxu0 %v5426_v50  ;;  %v5446_v41 = vld [vmem:[#allocation9 + $0x1ec] ss:$16 sps:$4 sm:$0xff]   ;;  %v5448_v50 = vld [vmem:[#allocation9 + $0x1e0] ss:$16 sps:$4 sm:$0xff]  }
 0x1ee   : > { %1928 = vmatprep.subr.bf16.mxu1 %v5432_v55  ;;  %1969 = vmatprep.subr.bf16.mxu0 %v5434_v56  ;;  %7337 = vst [vmem:[#allocation49_spill] sm:$0xff] %v5446_v41  ;;  %7338 = vst [vmem:[#allocation50_spill] sm:$0xff] %v5448_v50  ;;  %v5456_v56 = vld [vmem:[#allocation9 + $0x1c4] ss:$16 sps:$4 sm:$0xff]   ;;  %v5462_v55 = vld [vmem:[#allocation9 + $0x1c8] ss:$16 sps:$4 sm:$0xff]  }
 0x1ef   : > { %7340 = vst [vmem:[#allocation52_spill] sm:$0xff] %v5456_v56  ;;  %7343 = vst [vmem:[#allocation55_spill] sm:$0xff] %v5462_v55 }
 0x1f1   : > { %1929 = vmatpush1.bf16.msra.mxu1 %v5436_v5  ;;  %1970 = vmatpush1.bf16.msra.mxu0 %v5438_v31  ;;  %v5458_v5 = vld [vmem:[#allocation9 + $0x1cc] ss:$16 sps:$4 sm:$0xff]   ;;  %v5460_v31 = vld [vmem:[#allocation9 + $0x1c0] ss:$16 sps:$4 sm:$0xff]  }
 0x1f2   : > { %1930 = vmatprep.subr.bf16.mxu1 %v5444_v38  ;;  %1971 = vmatprep.subr.bf16.mxu0 %v5446_v41  ;;  %7341 = vst [vmem:[#allocation53_spill] sm:$0xff] %v5458_v5  ;;  %7342 = vst [vmem:[#allocation54_spill] sm:$0xff] %v5460_v31  ;;  %v5468_v41 = vld [vmem:[#allocation9 + $0x1a4] ss:$16 sps:$4 sm:$0xff]   ;;  %v5474_v38 = vld [vmem:[#allocation9 + $0x1a8] ss:$16 sps:$4 sm:$0xff]  }
 0x1f3   : > { %7344 = vst [vmem:[#allocation56_spill] sm:$0xff] %v5468_v41  ;;  %7347 = vst [vmem:[#allocation59_spill] sm:$0xff] %v5474_v38 }
 0x1f5   : > { %1931 = vmatpush2.bf16.msra.mxu1 %v5448_v50  ;;  %1972 = vmatpush2.bf16.msra.mxu0 %v5450_v33  ;;  %v5470_v50 = vld [vmem:[#allocation9 + $0x1ac] ss:$16 sps:$4 sm:$0xff]   ;;  %v5472_v33 = vld [vmem:[#allocation9 + $0x1a0] ss:$16 sps:$4 sm:$0xff]  }
 0x1f6   : > { %1932 = vmatprep.subr.bf16.mxu1 %v5456_v56  ;;  %1973 = vmatprep.subr.bf16.mxu0 %v5458_v5  ;;  %7345 = vst [vmem:[#allocation57_spill] sm:$0xff] %v5470_v50  ;;  %7346 = vst [vmem:[#allocation58_spill] sm:$0xff] %v5472_v33  ;;  %v5480_v5 = vld [vmem:[#allocation9 + $0x184] ss:$16 sps:$4 sm:$0xff]   ;;  %v5486_v56 = vld [vmem:[#allocation9 + $0x188] ss:$16 sps:$4 sm:$0xff]  }
 0x1f7   : > { %7348 = vst [vmem:[#allocation60_spill] sm:$0xff] %v5480_v5  ;;  %7351 = vst [vmem:[#allocation63_spill] sm:$0xff] %v5486_v56 }
 0x1f9   : > { %1933 = vmatpush2.bf16.msra.mxu1 %v5460_v31  ;;  %1974 = vmatpush2.bf16.msra.mxu0 %v5462_v55  ;;  %v5482_v31 = vld [vmem:[#allocation9 + $0x18c] ss:$16 sps:$4 sm:$0xff]   ;;  %v5484_v55 = vld [vmem:[#allocation9 + $0x180] ss:$16 sps:$4 sm:$0xff]  }
 0x1fa   : > { %1934 = vmatprep.subr.bf16.mxu1 %v5468_v41  ;;  %1975 = vmatprep.subr.bf16.mxu0 %v5470_v50  ;;  %7349 = vst [vmem:[#allocation61_spill] sm:$0xff] %v5482_v31  ;;  %7350 = vst [vmem:[#allocation62_spill] sm:$0xff] %v5484_v55  ;;  %v5490_v41 = vld [vmem:[#allocation9 + $0x164] ss:$16 sps:$4 sm:$0xff]   ;;  %v5492_v50 = vld [vmem:[#allocation9 + $0x16c] ss:$16 sps:$4 sm:$0xff]  }
 0x1fb   : > { %7352 = vst [vmem:[#allocation64_spill] sm:$0xff] %v5490_v41  ;;  %7353 = vst [vmem:[#allocation65_spill] sm:$0xff] %v5492_v50 }
 0x1fd   : > { %1935 = vmatpush2.bf16.msra.mxu1 %v5472_v33  ;;  %1976 = vmatpush2.bf16.msra.mxu0 %v5474_v38  ;;  %v5496_v38 = vld [vmem:[#allocation9 + $0x160] ss:$16 sps:$4 sm:$0xff]   ;;  %v5498_v33 = vld [vmem:[#allocation9 + $0x168] ss:$16 sps:$4 sm:$0xff]  }
 0x1fe   : > { %1936 = vmatprep.subr.bf16.mxu1 %v5480_v5  ;;  %1977 = vmatprep.subr.bf16.mxu0 %v5482_v31  ;;  %7354 = vst [vmem:[#allocation66_spill] sm:$0xff] %v5496_v38  ;;  %7355 = vst [vmem:[#allocation67_spill] sm:$0xff] %v5498_v33  ;;  %v5502_v5 = vld [vmem:[#allocation9 + $0x144] ss:$16 sps:$4 sm:$0xff]   ;;  %v5508_v31 = vld [vmem:[#allocation9 + $0x140] ss:$16 sps:$4 sm:$0xff]  }
 0x1ff   : > { %7356 = vst [vmem:[#allocation68_spill] sm:$0xff] %v5502_v5  ;;  %7358 = vst [vmem:[#allocation70_spill] sm:$0xff] %v5508_v31 }
 0x201   : > { %1937 = vmatpush2.bf16.msra.mxu1 %v5484_v55  ;;  %1978 = vmatpush2.bf16.msra.mxu0 %v5486_v56  ;;  %v5510_v55 = vld [vmem:[#allocation9 + $0x148] ss:$16 sps:$4 sm:$0xff]  }
 0x202   : > { %1938 = vmatprep.subr.bf16.mxu1 %v5490_v41  ;;  %1979 = vmatprep.subr.bf16.mxu0 %v5492_v50  ;;  %7359 = vst [vmem:[#allocation71_spill] sm:$0xff] %v5510_v55  ;;  %v3907_v56 = vld [vmem:[%s549_s22 + $0x8] sm:$0xff]  ;;  %v5516_v41 = vld [vmem:[#allocation9 + $0x124] ss:$16 sps:$4 sm:$0xff]  }
 0x203   : > { %7360 = vst [vmem:[#allocation72_spill] sm:$0xff] %v5516_v41  ;;  %v5518_v50 = vld [vmem:[#allocation9 + $0x12c] ss:$16 sps:$4 sm:$0xff]   ;;  %v1508_v26 = vpack.c.bf16 %v3907_v56, %v3907_v56  ;;  %v5536_v56 = vld [vmem:[#allocation9 + $0x108] ss:$16 sps:$4 sm:$0xff]  }
 0x204   : > { %7361 = vst [vmem:[#allocation73_spill] sm:$0xff] %v5518_v50  ;;  %7367 = vst [vmem:[#allocation79_spill] sm:$0xff] %v5536_v56 }
 0x205   : > { %1939 = vmatpush2.bf16.msra.mxu1 %v5496_v38  ;;  %1980 = vmatpush2.bf16.msra.mxu0 %v5498_v33  ;;  %v5522_v33 = vld [vmem:[#allocation9 + $0x120] ss:$16 sps:$4 sm:$0xff]   ;;  %v5524_v38 = vld [vmem:[#allocation9 + $0x128] ss:$16 sps:$4 sm:$0xff]  }
 0x206   : > { %1940 = vmatprep.subr.bf16.mxu1 %v5502_v5  ;;  %1981 = vmatprep.subr.bf16.mxu0 %v5504_v29  ;;  %7362 = vst [vmem:[#allocation74_spill] sm:$0xff] %v5522_v33  ;;  %7363 = vst [vmem:[#allocation75_spill] sm:$0xff] %v5524_v38  ;;  %v5528_v29 = vld [vmem:[#allocation9 + $0x104] ss:$16 sps:$4 sm:$0xff]   ;;  %v5530_v5 = vld [vmem:[#allocation9 + $0x10c] ss:$16 sps:$4 sm:$0xff]  }
 0x207   : > { %1946 = vmatprep.mubr.bf16.mxu1 %v1508_v26  ;;  %1987 = vmatprep.mubr.bf16.mxu0 %v1508_v26  ;;  %7364 = vst [vmem:[#allocation76_spill] sm:$0xff] %v5528_v29  ;;  %7365 = vst [vmem:[#allocation77_spill] sm:$0xff] %v5530_v5  ;;  %v5534_v26 = vld [vmem:[#allocation9 + $0x100] ss:$16 sps:$4 sm:$0xff]  }
 0x208   : > { %7366 = vst [vmem:[#allocation78_spill] sm:$0xff] %v5534_v26 }
 0x209   : > { %1941 = vmatpush2.bf16.msra.mxu1 %v5508_v31  ;;  %1982 = vmatpush2.bf16.msra.mxu0 %v5510_v55 }
 0x20a   : > { %1942 = vmatprep.subr.bf16.mxu1 %v5516_v41  ;;  %1983 = vmatprep.subr.bf16.mxu0 %v5518_v50  ;;  %v7368_v50 = vlaneseq }
 0x20d   : > { %1943 = vmatpush2.bf16.msra.mxu1 %v5522_v33  ;;  %1984 = vmatpush2.bf16.msra.mxu0 %v5524_v38  ;;  %v5545_v33 = vshrl.u32 %v7368_v50, 7 }
 0x20e   : > { %1944 = vmatprep.subr.bf16.mxu1 %v5528_v29  ;;  %1985 = vmatprep.subr.bf16.mxu0 %v5530_v5  ;;  %v833_v29 = vld [vmem:[%s6970_s4] sm:$0xf] }
 0x20f   : > { %7369 = vst [vmem:[#allocation80_spill] sm:$0xff] %v5545_v33  ;;  %v7090_v38 = vsub.s32 0, %v5545_v33  ;;  %v7093_v41 = vsub.s32 2, %v5545_v33 }
 0x211   : > { %1945 = vmatpush2.bf16.msra.mxu1 %v5534_v26  ;;  %1986 = vmatpush2.bf16.msra.mxu0 %v5536_v56  ;;  %v7100_v56 = vsub.s32 1, %v5545_v33  ;;  %v838_v55 = vrot.slane %v833_v29, %v7090_v38  ;;  %v5566_v31 = vrot.slane %v833_v29, %v7093_v41 }
 0x212   : > { %2025 = vmatprep.subr.bf16.mxu1 %v5232_v10  ;;  %2066 = vmatprep.subr.bf16.mxu0 %v5234_v11  ;;  %v7101_v10 = vsub.s32 3, %v5545_v33 }
 0x213   : > { %v842_v15 = vrot.slane %v833_v29, %v7100_v56 }
 0x214   : > { %v5572_v14 = vrot.slane %v833_v29, %v7101_v10 }
 0x274   : > { %v5552_v5 = vpop.f32.mrf.mxu1  ;;  %v5554_v26 = vpop.f32.mrf.mxu0 }
 0x276   : > { %v5558_v11 = vpop.f32.mrf.mxu1  ;;  %v5560_v50 = vpop.f32.mrf.mxu0 }
 0x278   : > { %v1053_v21 = vpop.f32.mrf.mxu1  ;;  %v1126_v18 = vpop.f32.mrf.mxu0 }
 0x279   : > { %v5574_v13 = vadd.f32 %v1053_v21, %v838_v55  ;;  %v5577_v12 = vadd.f32 %v1126_v18, %v5566_v31 }
 0x27a   : > { %v1055_v9 = vpop.f32.mrf.mxu1  ;;  %v1128_v38 = vpop.f32.mrf.mxu0 }
 0x27b   : > { %7370 = vst [vmem:[#allocation81_spill] sm:$0xff] %v5574_v13  ;;  %7371 = vst [vmem:[#allocation82_spill] sm:$0xff] %v5577_v12  ;;  %v5579_v8 = vadd.f32 %v1055_v9, %v842_v15  ;;  %v5582_v41 = vadd.f32 %v1128_v38, %v5572_v14 }
 0x27c   : > { %v1059_v7 = vpop.f32.mrf.mxu1  ;;  %v1132_v6 = vpop.f32.mrf.mxu0 }
 0x27d   : > { %7372 = vst [vmem:[#allocation83_spill] sm:$0xff] %v5579_v8  ;;  %7373 = vst [vmem:[#allocation84_spill] sm:$0xff] %v5582_v41  ;;  %v5584_v4 = vadd.f32 %v1059_v7, %v838_v55  ;;  %v5587_v56 = vadd.f32 %v1132_v6, %v5566_v31 }
 0x27e   : > { %v1061_v29 = vpop.f32.mrf.mxu1  ;;  %v1134_v21 = vpop.f32.mrf.mxu0 }
 0x27f   : > { %7374 = vst [vmem:[#allocation85_spill] sm:$0xff] %v5584_v4  ;;  %7375 = vst [vmem:[#allocation86_spill] sm:$0xff] %v5587_v56  ;;  %v5589_v10 = vadd.f32 %v1061_v29, %v842_v15  ;;  %v5592_v18 = vadd.f32 %v1134_v21, %v5572_v14 }
 0x280   : > { %v1063_v12 = vpop.f32.mrf.mxu1  ;;  %v1136_v9 = vpop.f32.mrf.mxu0 }
 0x281   : > { %7376 = vst [vmem:[#allocation87_spill] sm:$0xff] %v5589_v10  ;;  %7377 = vst [vmem:[#allocation88_spill] sm:$0xff] %v5592_v18  ;;  %v5594_v8 = vadd.f32 %v1063_v12, %v838_v55  ;;  %v5597_v38 = vadd.f32 %v1136_v9, %v5566_v31 }
 0x282   : > { %v1065_v41 = vpop.f32.mrf.mxu1  ;;  %v1138_v7 = vpop.f32.mrf.mxu0 }
 0x283   : > { %7378 = vst [vmem:[#allocation89_spill] sm:$0xff] %v5594_v8  ;;  %7379 = vst [vmem:[#allocation90_spill] sm:$0xff] %v5597_v38  ;;  %v5599_v4 = vadd.f32 %v1065_v41, %v842_v15  ;;  %v5602_v6 = vadd.f32 %v1138_v7, %v5572_v14 }
 0x284   : > { %v1069_v56 = vpop.f32.mrf.mxu1  ;;  %v1142_v29 = vpop.f32.mrf.mxu0 }
 0x285   : > { %7380 = vst [vmem:[#allocation91_spill] sm:$0xff] %v5599_v4  ;;  %7381 = vst [vmem:[#allocation92_spill] sm:$0xff] %v5602_v6  ;;  %v5604_v10 = vadd.f32 %v1069_v56, %v838_v55  ;;  %v5607_v21 = vadd.f32 %v1142_v29, %v5566_v31 }
 0x286   : > { %v1071_v18 = vpop.f32.mrf.mxu1  ;;  %v1144_v12 = vpop.f32.mrf.mxu0 }
 0x287   : > { %7382 = vst [vmem:[#allocation93_spill] sm:$0xff] %v5604_v10  ;;  %7383 = vst [vmem:[#allocation94_spill] sm:$0xff] %v5607_v21  ;;  %v5609_v8 = vadd.f32 %v1071_v18, %v842_v15  ;;  %v5612_v9 = vadd.f32 %v1144_v12, %v5572_v14 }
 0x288   : > { %v1073_v38 = vpop.f32.mrf.mxu1  ;;  %v1146_v41 = vpop.f32.mrf.mxu0 }
 0x289   : > { %7384 = vst [vmem:[#allocation95_spill] sm:$0xff] %v5609_v8  ;;  %7385 = vst [vmem:[#allocation96_spill] sm:$0xff] %v5612_v9  ;;  %v5614_v4 = vadd.f32 %v1073_v38, %v838_v55  ;;  %v5617_v7 = vadd.f32 %v1146_v41, %v5566_v31 }
 0x28a   : > { %v1075_v6 = vpop.f32.mrf.mxu1  ;;  %v1148_v56 = vpop.f32.mrf.mxu0 }
 0x28b   : > { %7386 = vst [vmem:[#allocation97_spill] sm:$0xff] %v5614_v4  ;;  %7387 = vst [vmem:[#allocation98_spill] sm:$0xff] %v5617_v7  ;;  %v5619_v10 = vadd.f32 %v1075_v6, %v842_v15  ;;  %v5622_v29 = vadd.f32 %v1148_v56, %v5572_v14 }
 0x28c   : > { %v1079_v21 = vpop.f32.mrf.mxu1  ;;  %v1152_v18 = vpop.f32.mrf.mxu0 }
 0x28d   : > { %7388 = vst [vmem:[#allocation99_spill] sm:$0xff] %v5619_v10  ;;  %7389 = vst [vmem:[#allocation100_spill] sm:$0xff] %v5622_v29  ;;  %v5624_v8 = vadd.f32 %v1079_v21, %v838_v55  ;;  %v5627_v12 = vadd.f32 %v1152_v18, %v5566_v31 }
 0x28e   : > { %v1081_v9 = vpop.f32.mrf.mxu1  ;;  %v1154_v38 = vpop.f32.mrf.mxu0 }
 0x28f   : > { %7390 = vst [vmem:[#allocation101_spill] sm:$0xff] %v5624_v8  ;;  %7391 = vst [vmem:[#allocation102_spill] sm:$0xff] %v5627_v12  ;;  %v5629_v4 = vadd.f32 %v1081_v9, %v842_v15  ;;  %v5632_v41 = vadd.f32 %v1154_v38, %v5572_v14  ;;  %v1050_v8 = vadd.f32 %v5552_v5, %v838_v55 }
 0x290   : > { %v1083_v7 = vpop.f32.mrf.mxu1  ;;  %v1156_v6 = vpop.f32.mrf.mxu0  ;;  %v1052_v38 = vadd.f32 %v5558_v11, %v842_v15  ;;  %v1123_v11 = vadd.f32 %v5554_v26, %v5566_v31 }
 0x291   : > { %7392 = vst [vmem:[#allocation103_spill] sm:$0xff] %v5629_v4  ;;  %7393 = vst [vmem:[#allocation104_spill] sm:$0xff] %v5632_v41  ;;  %v5634_v10 = vadd.f32 %v1083_v7, %v838_v55  ;;  %v5637_v56 = vadd.f32 %v1156_v6, %v5566_v31  ;;  %v1125_v55 = vadd.f32 %v5560_v50, %v5572_v14 }
 0x292   : > { %v1085_v29 = vpop.f32.mrf.mxu1  ;;  %v1158_v21 = vpop.f32.mrf.mxu0 }
 0x293   : > { %7394 = vst [vmem:[#allocation105_spill] sm:$0xff] %v5634_v10  ;;  %7395 = vst [vmem:[#allocation106_spill] sm:$0xff] %v5637_v56  ;;  %v5640_v18 = vadd.f32 %v1085_v29, %v842_v15  ;;  %v5643_v12 = vadd.f32 %v1158_v21, %v5572_v14  ;;  %v1195_v14 = vld [vmem:[%s556_s15] sm:$0xff] }
 0x294   : > { %v1431_v9 = vpop.f32.mrf.mxu1  ;;  %v1472_v4 = vpop.f32.mrf.mxu0 }
 0x295   : > { %7396 = vst [vmem:[#allocation107_spill] sm:$0xff] %v5640_v18  ;;  %7397 = vst [vmem:[#allocation108_spill] sm:$0xff] %v5643_v12  ;;  %v1479_v41 = vadd.f32 %v1431_v9, %v1050_v8  ;;  %v7432_v12 = vld [vmem:[#allocation58_spill] sm:$0xff]  ;;  %v7433_v18 = vld [vmem:[#allocation59_spill] sm:$0xff] }
 0x296   : > { %v1433_v13 = vpop.f32.mrf.mxu1  ;;  %v1474_v7 = vpop.f32.mrf.mxu0 }
 0x297   : > { %v3941_v10 = vmul.f32 -1.442695, %v1479_v41  ;;  %v1480_v33 = vadd.f32 %v1433_v13, %v1052_v38  ;;  %v1482_v29 = vadd.f32 %v1474_v7, %v1125_v55  ;;  %v1481_v41 = vadd.f32 %v1472_v4, %v1123_v11  ;;  %v7411_v55 = vld [vmem:[#allocation37_spill] sm:$0xff]  ;;  %v7413_v11 = vld [vmem:[#allocation39_spill] sm:$0xff] }
 0x298   : > { %v1435_v6 = vpop.f32.mrf.mxu1  ;;  %v1476_v56 = vpop.f32.mrf.mxu0 }
 0x299   : > { %4369 = vpow2.f32 %v3941_v10  ;;  %v3942_v3 = vmul.f32 -1.442695, %v1480_v33  ;;  %v3943_v8 = vmul.f32 -1.442695, %v1482_v29  ;;  %v7412_v29 = vld [vmem:[#allocation38_spill] sm:$0xff] }
 0x29a   : > { %v1436_v2 = vpop.f32.mrf.mxu1  ;;  %v1477_v5 = vpop.f32.mrf.mxu0 }
 0x29b   : > { %4371 = vpow2.f32 %v3942_v3  ;;  %v7398_v5 = vmov 0  }
 0x29c   : > { %4373 = vpow2.f32 %v3943_v8  ;;  %v7414_v8 = vld [vmem:[#allocation40_spill] sm:$0xff] }
 0x2a6   : > { %v4370_v15 = vpop.eup %4369 }
 0x2a7   : > { %v1486_v13 = vadd.f32 1.0, %v4370_v15  ;;  %v7415_v15 = vld [vmem:[#allocation41_spill] sm:$0xff] }
 0x2a8   : > { %v4372_v21 = vpop.eup %4371 }
 0x2a9   : > { %4375 = vrcp.f32 %v1486_v13  ;;  %v1492_v10 = vadd.f32 1.0, %v4372_v21  ;;  %v4374_v2 = vpop.eup %4373  ;;  %v7417_v13 = vld [vmem:[#allocation43_spill] sm:$0xff]  ;;  %v7418_v21 = vld [vmem:[#allocation44_spill] sm:$0xff] }
 0x2aa   : > { %4377 = vtanh.f32 %v1481_v41  ;;  %v1499_v56 = vadd.f32 1.0, %v4374_v2  ;;  %v7416_v41 = vld [vmem:[#allocation42_spill] sm:$0xff] }
 0x2ab   : > { %4379 = vrcp.f32 %v1492_v10  ;;  %v7419_v10 = vld [vmem:[#allocation45_spill] sm:$0xff]  ;;  %v7420_v2 = vld [vmem:[#allocation46_spill] sm:$0xff] }
 0x2ac   : > { %4381 = vrcp.f32 %v1499_v56  ;;  %v7425_v56 = vld [vmem:[#allocation51_spill] sm:$0xff] }
 0x2b6   : > { %v4376_v3 = vpop.eup %4375 }
 0x2b7   : > { %v4378_v33 = vpop.eup %4377 }
 0x2b8   : > { %v4380_v50 = vpop.eup %4379  ;;  %v1503_v9 = vmul.f32 %v4378_v33, %v4376_v3  ;;  %v7421_v3 = vld [vmem:[#allocation47_spill] sm:$0xff]  ;;  %v7423_v33 = vld [vmem:[#allocation49_spill] sm:$0xff] }
 0x2b9   : > { %v1502_v31 = vmul.f32 %v4380_v50, %v1195_v14  ;;  %v4382_v4 = vpop.eup %4381  ;;  %v7422_v14 = vld [vmem:[#allocation48_spill] sm:$0xff]  ;;  %v7424_v50 = vld [vmem:[#allocation50_spill] sm:$0xff] }
 0x2bb   : > { %v5653_v26 = vadd.f32 %v1503_v9, %v1502_v31  ;;  %v7426_v9 = vld [vmem:[#allocation52_spill] sm:$0xff]  ;;  %v7427_v31 = vld [vmem:[#allocation53_spill] sm:$0xff] }
 0x2bd   : > { %4383 = vtanh.f32 %v5653_v26 }
 0x2ca   : > { %v4384_v38 = vpop.eup %4383 }
 0x2cb   : > { %v1506_v7 = vmul.f32 %v4384_v38, %v4382_v4  ;;  %v7428_v4 = vld [vmem:[#allocation54_spill] sm:$0xff]  ;;  %v7429_v38 = vld [vmem:[#allocation55_spill] sm:$0xff] }
 0x2cd   : > { %v1507_v6 = vpack.c.bf16 %v1506_v7, %v1506_v7  ;;  %v7430_v7 = vld [vmem:[#allocation56_spill] sm:$0xff] }
 0x2cf   : > { %1947 = vmatmul.mubr.bf16.vlgmr.msra.gmra.mxu1 %v1507_v6  ;;  %1988 = vmatmul.mubr.bf16.vlgmr.msra.gmra.mxu0 %v1507_v6 }
 0x2d0   : > { %2026 = vmatpush1.bf16.msra.mxu1 %v5238_v16  ;;  %2067 = vmatpush1.bf16.msra.mxu0 %v5240_v17  ;;  %v7399_v16 = vld [vmem:[#allocation25_spill] sm:$0xff]  ;;  %v7400_v17 = vld [vmem:[#allocation26_spill] sm:$0xff] }
 0x2d1   : > { %2027 = vmatprep.subr.bf16.mxu1 %v5242_v19  ;;  %2068 = vmatprep.subr.bf16.mxu0 %v5244_v20  ;;  %v7401_v19 = vld [vmem:[#allocation27_spill] sm:$0xff]  ;;  %v7402_v20 = vld [vmem:[#allocation28_spill] sm:$0xff] }
 0x2d2   : > { %2057 = vmatprep.mubr.bf16.mxu1 %v7398_v5  ;;  %2098 = vmatprep.mubr.bf16.mxu0 %v7398_v5 }
 0x2d4   : > { %2028 = vmatpush1.bf16.msra.mxu1 %v5250_v22  ;;  %2069 = vmatpush1.bf16.msra.mxu0 %v5252_v23  ;;  %v7403_v22 = vld [vmem:[#allocation29_spill] sm:$0xff]  ;;  %v7404_v23 = vld [vmem:[#allocation30_spill] sm:$0xff] }
 0x2d5   : > { %2029 = vmatprep.subr.bf16.mxu1 %v5256_v24  ;;  %2070 = vmatprep.subr.bf16.mxu0 %v5258_v25  ;;  %v7405_v24 = vld [vmem:[#allocation31_spill] sm:$0xff]  ;;  %v7406_v25 = vld [vmem:[#allocation32_spill] sm:$0xff] }
 0x2d8   : > { %2030 = vmatpush1.bf16.msra.mxu1 %v5264_v27  ;;  %2071 = vmatpush1.bf16.msra.mxu0 %v5266_v28  ;;  %v7407_v27 = vld [vmem:[#allocation33_spill] sm:$0xff]  ;;  %v7408_v28 = vld [vmem:[#allocation34_spill] sm:$0xff] }
 0x2d9   : > { %2031 = vmatprep.subr.bf16.mxu1 %v5270_v30  ;;  %2072 = vmatprep.subr.bf16.mxu0 %v5272_v32  ;;  %v7409_v30 = vld [vmem:[#allocation35_spill] sm:$0xff]  ;;  %v7410_v32 = vld [vmem:[#allocation36_spill] sm:$0xff] }
 0x2dc   : > { %2032 = vmatpush1.bf16.msra.mxu1 %v5276_v34  ;;  %2073 = vmatpush1.bf16.msra.mxu0 %v5278_v35 }
 0x2dd   : > { %2033 = vmatprep.subr.bf16.mxu1 %v5282_v36  ;;  %2074 = vmatprep.subr.bf16.mxu0 %v5284_v37 }
 0x2e0   : > { %2034 = vmatpush1.bf16.msra.mxu1 %v5290_v39  ;;  %2075 = vmatpush1.bf16.msra.mxu0 %v5292_v40 }
 0x2e1   : > { %2035 = vmatprep.subr.bf16.mxu1 %v5296_v42  ;;  %2076 = vmatprep.subr.bf16.mxu0 %v5298_v43 }
 0x2e4   : > { %2036 = vmatpush1.bf16.msra.mxu1 %v5305_v44  ;;  %2077 = vmatpush1.bf16.msra.mxu0 %v5307_v45 }
 0x2e5   : > { %2037 = vmatprep.subr.bf16.mxu1 %v5311_v46  ;;  %2078 = vmatprep.subr.bf16.mxu0 %v5313_v47 }
 0x2e8   : > { %2038 = vmatpush1.bf16.msra.mxu1 %v5322_v48  ;;  %2079 = vmatpush1.bf16.msra.mxu0 %v5324_v49 }
 0x2e9   : > { %2039 = vmatprep.subr.bf16.mxu1 %v5329_v51  ;;  %2080 = vmatprep.subr.bf16.mxu0 %v5331_v52 }
 0x2ec   : > { %2040 = vmatpush1.bf16.msra.mxu1 %v5335_v53  ;;  %2081 = vmatpush1.bf16.msra.mxu0 %v5337_v54 }
 0x2ed   : > { %2137 = vmatprep.subr.bf16.mxu1 %v5348_v57  ;;  %2178 = vmatprep.subr.bf16.mxu0 %v5350_v58 }
 0x2ef   : > { %2058 = vmatmul.mubr.bf16.vlgmr.msra.gmra.mxu1 %v1507_v6  ;;  %2099 = vmatmul.mubr.bf16.vlgmr.msra.gmra.mxu0 %v1507_v6  ;;  %v7431_v6 = vld [vmem:[#allocation57_spill] sm:$0xff] }
 0x2f0   : > { %2138 = vmatpush1.bf16.msra.mxu1 %v5352_v59  ;;  %2179 = vmatpush1.bf16.msra.mxu0 %v5354_v60 }
 0x2f1   : > { %2139 = vmatprep.subr.bf16.mxu1 %v5360_v61  ;;  %2180 = vmatprep.subr.bf16.mxu0 %v5362_v62 }
 0x2f4   : > { %2140 = vmatpush1.bf16.msra.mxu1 %v5364_v63  ;;  %2181 = vmatpush1.bf16.msra.mxu0 %v5366_v0 }
 0x2f5   : > { %2141 = vmatprep.subr.bf16.mxu1 %v5372_v1  ;;  %2182 = vmatprep.subr.bf16.mxu0 %v7399_v16 }
 0x2f8   : > { %2142 = vmatpush1.bf16.msra.mxu1 %v7400_v17  ;;  %2183 = vmatpush1.bf16.msra.mxu0 %v7401_v19 }
 0x2f9   : > { %2143 = vmatprep.subr.bf16.mxu1 %v7402_v20  ;;  %2184 = vmatprep.subr.bf16.mxu0 %v7403_v22 }
 0x2fc   : > { %2144 = vmatpush1.bf16.msra.mxu1 %v7404_v23  ;;  %2185 = vmatpush1.bf16.msra.mxu0 %v7405_v24 }
 0x2fd   : > { %2145 = vmatprep.subr.bf16.mxu1 %v7406_v25  ;;  %2186 = vmatprep.subr.bf16.mxu0 %v7407_v27 }
 0x300   : > { %2146 = vmatpush1.bf16.msra.mxu1 %v7408_v28  ;;  %2187 = vmatpush1.bf16.msra.mxu0 %v7409_v30 }
 0x301   : > { %2147 = vmatprep.subr.bf16.mxu1 %v7410_v32  ;;  %2188 = vmatprep.subr.bf16.mxu0 %v7411_v55  ;;  %v7468_v55 = vld [vmem:[#allocation82_spill] sm:$0xff] }
 0x304   : > { %2148 = vmatpush1.bf16.msra.mxu1 %v7412_v29  ;;  %2189 = vmatpush1.bf16.msra.mxu0 %v7413_v11 }
 0x305   : > { %2149 = vmatprep.subr.bf16.mxu1 %v7414_v8  ;;  %2190 = vmatprep.subr.bf16.mxu0 %v7415_v15 }
 0x308   : > { %2150 = vmatpush1.bf16.msra.mxu1 %v7416_v41  ;;  %2191 = vmatpush1.bf16.msra.mxu0 %v7417_v13 }
 0x309   : > { %2151 = vmatprep.subr.bf16.mxu1 %v7418_v21  ;;  %2192 = vmatprep.subr.bf16.mxu0 %v7419_v10 }
 0x30c   : > { %2152 = vmatpush1.bf16.msra.mxu1 %v7420_v2  ;;  %2193 = vmatpush1.bf16.msra.mxu0 %v7421_v3 }
 0x30d   : > { %2153 = vmatprep.subr.bf16.mxu1 %v7422_v14  ;;  %2194 = vmatprep.subr.bf16.mxu0 %v7423_v33  ;;  %v7434_v33 = vld [vmem:[#allocation60_spill] sm:$0xff] }
 0x310   : > { %2154 = vmatpush2.bf16.msra.mxu1 %v7424_v50  ;;  %2195 = vmatpush2.bf16.msra.mxu0 %v7425_v56  ;;  %v7435_v50 = vld [vmem:[#allocation61_spill] sm:$0xff]  ;;  %v7436_v56 = vld [vmem:[#allocation62_spill] sm:$0xff] }
 0x311   : > { %2155 = vmatprep.subr.bf16.mxu1 %v7426_v9  ;;  %2196 = vmatprep.subr.bf16.mxu0 %v7427_v31  ;;  %v7437_v9 = vld [vmem:[#allocation63_spill] sm:$0xff]  ;;  %v7438_v31 = vld [vmem:[#allocation64_spill] sm:$0xff] }
 0x314   : > { %2156 = vmatpush2.bf16.msra.mxu1 %v7428_v4  ;;  %2197 = vmatpush2.bf16.msra.mxu0 %v7429_v38  ;;  %v7439_v4 = vld [vmem:[#allocation65_spill] sm:$0xff]  ;;  %v7440_v38 = vld [vmem:[#allocation66_spill] sm:$0xff] }
 0x315   : > { %2157 = vmatprep.subr.bf16.mxu1 %v7430_v7  ;;  %2198 = vmatprep.subr.bf16.mxu0 %v7431_v6  ;;  %v7441_v7 = vld [vmem:[#allocation67_spill] sm:$0xff]  ;;  %v7442_v6 = vld [vmem:[#allocation68_spill] sm:$0xff] }
 0x318   : > { %2158 = vmatpush2.bf16.msra.mxu1 %v7432_v12  ;;  %2199 = vmatpush2.bf16.msra.mxu0 %v7433_v18  ;;  %v7443_v12 = vld [vmem:[#allocation69_spill] sm:$0xff]  ;;  %v7444_v18 = vld [vmem:[#allocation70_spill] sm:$0xff] }
 0x319   : > { %2159 = vmatprep.subr.bf16.mxu1 %v7434_v33  ;;  %2200 = vmatprep.subr.bf16.mxu0 %v7435_v50  ;;  %v7445_v33 = vld [vmem:[#allocation71_spill] sm:$0xff]  ;;  %v7446_v50 = vld [vmem:[#allocation72_spill] sm:$0xff] }
 0x31c   : > { %2160 = vmatpush2.bf16.msra.mxu1 %v7436_v56  ;;  %2201 = vmatpush2.bf16.msra.mxu0 %v7437_v9  ;;  %v7447_v56 = vld [vmem:[#allocation73_spill] sm:$0xff]  ;;  %v7448_v9 = vld [vmem:[#allocation74_spill] sm:$0xff] }
 0x31d   : > { %2161 = vmatprep.subr.bf16.mxu1 %v7438_v31  ;;  %2202 = vmatprep.subr.bf16.mxu0 %v7439_v4  ;;  %v7449_v31 = vld [vmem:[#allocation75_spill] sm:$0xff]  ;;  %v7450_v4 = vld [vmem:[#allocation76_spill] sm:$0xff] }
 0x320   : > { %2162 = vmatpush2.bf16.msra.mxu1 %v7440_v38  ;;  %2203 = vmatpush2.bf16.msra.mxu0 %v7441_v7  ;;  %v7451_v38 = vld [vmem:[#allocation77_spill] sm:$0xff]  ;;  %v7452_v7 = vld [vmem:[#allocation78_spill] sm:$0xff] }
 0x321   : > { %2163 = vmatprep.subr.bf16.mxu1 %v7442_v6  ;;  %2204 = vmatprep.subr.bf16.mxu0 %v7443_v12  ;;  %v7453_v6 = vld [vmem:[#allocation79_spill] sm:$0xff] }
 0x322   : > { %v7454_v12 = vld [vmem:[#allocation23_spill] sm:$0xff] }
 0x324   : > { %2164 = vmatpush2.bf16.msra.mxu1 %v7444_v18  ;;  %2205 = vmatpush2.bf16.msra.mxu0 %v7445_v33  ;;  %v7455_v18 = vld [vmem:[#allocation24_spill] sm:$0xff] }
 0x325   : > { %2165 = vmatprep.subr.bf16.mxu1 %v7446_v50  ;;  %2206 = vmatprep.subr.bf16.mxu0 %v7447_v56  ;;  %v1193_v56 = vld [vmem:[%s6972_s6] sm:$0xf]  ;;  %v7456_v50 = vld [vmem:[#allocation80_spill] sm:$0xff] }
 0x326   : > { %v7461_v41 = vsub.s32 3, %v7456_v50 }
 0x328   : > { %2166 = vmatpush2.bf16.msra.mxu1 %v7448_v9  ;;  %2207 = vmatpush2.bf16.msra.mxu0 %v7449_v31  ;;  %v7457_v9 = vsub.s32 0, %v7456_v50 }
 0x329   : > { %2167 = vmatprep.subr.bf16.mxu1 %v7450_v4  ;;  %2208 = vmatprep.subr.bf16.mxu0 %v7451_v38  ;;  %v7459_v4 = vsub.s32 1, %v7456_v50 }
 0x32a   : > { %v5759_v33 = vrot.slane %v1193_v56, %v7457_v9 }
 0x32b   : > { %v5763_v31 = vrot.slane %v1193_v56, %v7459_v4  ;;  %v5769_v4 = vrot.slane %v1193_v56, %v7461_v41 }
 0x32c   : > { %2168 = vmatpush2.bf16.msra.mxu1 %v7452_v7  ;;  %2209 = vmatpush2.bf16.msra.mxu0 %v7453_v6  ;;  %7458 = vst [vmem:[#allocation25_spill] sm:$0xff] %v5759_v33 }
 0x32d   : > { %2248 = vmatprep.subr.bf16.mxu1 %v7454_v12  ;;  %2289 = vmatprep.subr.bf16.mxu0 %v7455_v18  ;;  %7460 = vst [vmem:[#allocation26_spill] sm:$0xff] %v5763_v31  ;;  %7462 = vst [vmem:[#allocation27_spill] sm:$0xff] %v5769_v4 }
 0x38f   : > { %v1948_v38 = vpop.f32.mrf.mxu1  ;;  %v1989_v7 = vpop.f32.mrf.mxu0 }
 0x390   : > { %v1949_v6 = vadd.f32 %v1948_v38, %v5759_v33  ;;  %v7463_v38 = vsub.s32 2, %v7456_v50 }
 0x391   : > { %v1950_v14 = vpop.f32.mrf.mxu1  ;;  %v1991_v12 = vpop.f32.mrf.mxu0 }
 0x392   : > { %v4008_v3 = vmul.f32 -1.442695, %v1949_v6  ;;  %v1951_v18 = vadd.f32 %v1950_v14, %v5763_v31  ;;  %v1992_v15 = vadd.f32 %v1991_v12, %v5769_v4  ;;  %v5774_v33 = vrot.slane %v1193_v56, %v7463_v38  ;;  %v7465_v12 = vld [vmem:[#allocation81_spill] sm:$0xff]  ;;  %v3908_v56 = vld [vmem:[%s556_s15 + $0x8] sm:$0xff]  ;;  %s6881_s15 = scalar_lea.hbm %s6978_s12, %s7288_s19 }
 0x393   : > { %v1952_v2 = vpop.f32.mrf.mxu1  ;;  %v1993_v10 = vpop.f32.mrf.mxu0 }
 0x394   : > { %4385 = vpow2.f32 %v4008_v3  ;;  %v4009_v21 = vmul.f32 -1.442695, %v1951_v18  ;;  %7464 = vst [vmem:[#allocation28_spill] sm:$0xff] %v5774_v33  ;;  %v4010_v6 = vmul.f32 -1.442695, %v1992_v15  ;;  %v1990_v10 = vadd.f32 %v1989_v7, %v5774_v33  ;;  %v7466_v7 = vld [vmem:[#allocation83_spill] sm:$0xff] }
 0x395   : > { %v1953_v13 = vpop.f32.mrf.mxu1  ;;  %v1994_v9 = vpop.f32.mrf.mxu0 }
 0x396   : > { %4387 = vpow2.f32 %v4009_v21 }
 0x397   : > { %4389 = vpow2.f32 %v4010_v6 }
 0x3a1   : > { %v4386_v14 = vpop.eup %4385 }
 0x3a2   : > { %v1999_v2 = vadd.f32 1.0, %v4386_v14 }
 0x3a3   : > { %v4388_v3 = vpop.eup %4387 }
 0x3a4   : > { %4391 = vrcp.f32 %v1999_v2  ;;  %v2005_v13 = vadd.f32 1.0, %v4388_v3  ;;  %v4390_v18 = vpop.eup %4389 }
 0x3a5   : > { %4393 = vtanh.f32 %v1990_v10  ;;  %v2012_v6 = vadd.f32 1.0, %v4390_v18 }
 0x3a6   : > { %4395 = vrcp.f32 %v2005_v13 }
 0x3af   : > { %v2059_v41 = vpop.f32.mrf.mxu1  ;;  %v2100_v21 = vpop.f32.mrf.mxu0 }
 0x3b0   : > { %v2107_v9 = vadd.f32 %v2059_v41, %v7465_v12  ;;  %v7467_v12 = vld [vmem:[#allocation84_spill] sm:$0xff] }
 0x3b1   : > { %v4392_v50 = vpop.eup %4391  ;;  %v2061_v38 = vpop.f32.mrf.mxu1 }
 0x3b2   : > { %v2102_v15 = vpop.f32.mrf.mxu0  ;;  %v4394_v4 = vpop.eup %4393  ;;  %v4011_v31 = vmul.f32 -1.442695, %v2107_v9  ;;  %v2108_v14 = vadd.f32 %v2061_v38, %v7466_v7  ;;  %v2109_v38 = vadd.f32 %v2100_v21, %v7468_v55 }
 0x3b3   : > { %v4396_v33 = vpop.eup %4395  ;;  %v2063_v2 = vpop.f32.mrf.mxu1  ;;  %v2016_v10 = vmul.f32 %v4394_v4, %v4392_v50  ;;  %v2110_v9 = vadd.f32 %v2102_v15, %v7467_v12 }
 0x3b4   : > { %v2104_v3 = vpop.f32.mrf.mxu0  ;;  %v2015_v13 = vmul.f32 %v4396_v33, %v3908_v56  ;;  %4397 = vpow2.f32 %v4011_v31  ;;  %v4012_v8 = vmul.f32 -1.442695, %v2108_v14 }
 0x3b5   : > { %v2064_v11 = vpop.f32.mrf.mxu1  ;;  %v4013_v7 = vmul.f32 -1.442695, %v2110_v9 }
 0x3b6   : > { %v2105_v29 = vpop.f32.mrf.mxu0  ;;  %4399 = vpow2.f32 %v4012_v8  ;;  %v5781_v41 = vadd.f32 %v2016_v10, %v2015_v13 }
 0x3b7   : > { %4401 = vrcp.f32 %v2012_v6 }
 0x3b8   : > { %4403 = vtanh.f32 %v5781_v41 }
 0x3b9   : > { %4405 = vtanh.f32 %v2109_v38  ;;  %v5790_v38 = vld [vmem:[#allocation7 + $0xe0] ss:$16 sps:$4 sm:$0xff]  }
 0x3ba   : > { %4407 = vpow2.f32 %v4013_v7  ;;  %v5793_v7 = vld [vmem:[#allocation7 + $0xe8] ss:$16 sps:$4 sm:$0xff]  }
 0x3c1   : > { %v4398_v18 = vpop.eup %4397 }
 0x3c2   : > { %v2114_v2 = vadd.f32 1.0, %v4398_v18  ;;  %v5799_v18 = vld [vmem:[#allocation7 + $0xcc] ss:$16 sps:$4 sm:$0xff]  }
 0x3c3   : > { %v4400_v4 = vpop.eup %4399 }
 0x3c4   : > { %v4402_v33 = vpop.eup %4401  ;;  %4409 = vrcp.f32 %v2114_v2  ;;  %v2120_v11 = vadd.f32 1.0, %v4400_v4  ;;  %v5804_v2 = vld [vmem:[#allocation7 + $0xc0] ss:$16 sps:$4 sm:$0xff]   ;;  %v5807_v4 = vld [vmem:[#allocation7 + $0xc8] ss:$16 sps:$4 sm:$0xff]  }
 0x3c5   : > { %v4404_v29 = vpop.eup %4403 }
 0x3c6   : > { %4411 = vrcp.f32 %v2120_v11  ;;  %v2019_v8 = vmul.f32 %v4404_v29, %v4402_v33  ;;  %v4406_v50 = vpop.eup %4405  ;;  %v5810_v33 = vld [vmem:[#allocation7 + $0xa4] ss:$16 sps:$4 sm:$0xff]   ;;  %v5813_v11 = vld [vmem:[#allocation7 + $0xac] ss:$16 sps:$4 sm:$0xff]   ;;  %v5816_v29 = vld [vmem:[#allocation7 + $0xa0] ss:$16 sps:$4 sm:$0xff]  }
 0x3c7   : > { %v4408_v56 = vpop.eup %4407 }
 0x3c8   : > { %v2136_v31 = vpack.c.bf16 %v2019_v8, %v2019_v8  ;;  %v2127_v21 = vadd.f32 1.0, %v4408_v56  ;;  %v5819_v8 = vld [vmem:[#allocation7 + $0xa8] ss:$16 sps:$4 sm:$0xff]  }
 0x3c9   : > { %v7508_v56 = vld [vmem:[#allocation76_spill] sm:$0xff] }
 0x3ca   : > { %2169 = vmatprep.mubr.bf16.mxu1 %v2136_v31  ;;  %2210 = vmatprep.mubr.bf16.mxu0 %v2136_v31  ;;  %4413 = vrcp.f32 %v2127_v21  ;;  %v5822_v31 = vld [vmem:[#allocation7 + $0x84] ss:$16 sps:$4 sm:$0xff]  }
 0x3cb   : > { %v5910_v21 = vld [vmem:[#allocation7 + $0xe4] ss:$16 sps:$4 sm:$0xff]  }
 0x3cc   : > { %7512 = vst [vmem:[#allocation29_spill] sm:$0xff] %v5910_v21 }
 0x3d1   : > { %v4410_v15 = vpop.eup %4409 }
 0x3d2   : > { %v2131_v14 = vmul.f32 %v4410_v15, %v4406_v50  ;;  %v5825_v50 = vld [vmem:[#allocation7 + $0x8c] ss:$16 sps:$4 sm:$0xff]   ;;  %v7509_v15 = vld [vmem:[#allocation77_spill] sm:$0xff] }
 0x3d3   : > { %v4412_v55 = vpop.eup %4411 }
 0x3d4   : > { %v2130_v6 = vmul.f32 %v4412_v55, %v5653_v26  ;;  %v5796_v26 = vld [vmem:[#allocation7 + $0xc4] ss:$16 sps:$4 sm:$0xff]  }
 0x3d5   : > { %v7511_v55 = vld [vmem:[#allocation79_spill] sm:$0xff] }
 0x3d6   : > { %v5787_v3 = vadd.f32 %v2131_v14, %v2130_v6  ;;  %v7510_v14 = vld [vmem:[#allocation78_spill] sm:$0xff] }
 0x3d7   : > { %v4414_v10 = vpop.eup %4413  ;;  %v5913_v6 = vld [vmem:[#allocation7 + $0xec] ss:$16 sps:$4 sm:$0xff]  }
 0x3d8   : > { %4415 = vtanh.f32 %v5787_v3  ;;  %7513 = vst [vmem:[#allocation30_spill] sm:$0xff] %v5913_v6 }
 0x3e5   : > { %v4416_v13 = vpop.eup %4415 }
 0x3e6   : > { %v2134_v12 = vmul.f32 %v4416_v13, %v4414_v10 }
 0x3e8   : > { %v2135_v9 = vpack.c.bf16 %v2134_v12, %v2134_v12  ;;  %v7514_v12 = vld [vmem:[#allocation25_spill] sm:$0xff] }
 0x3ea   : > { %2170 = vmatmul.mubr.bf16.vlgmr.msra.gmra.mxu1 %v2135_v9  ;;  %2211 = vmatmul.mubr.bf16.vlgmr.msra.gmra.mxu0 %v2135_v9 }
 0x3eb   : > { %2249 = vmatpush1.bf16.msra.mxu1 %v5790_v38  ;;  %2290 = vmatpush1.bf16.msra.mxu0 %v5793_v7 }
 0x3ec   : > { %2250 = vmatprep.subr.bf16.mxu1 %v5796_v26  ;;  %2291 = vmatprep.subr.bf16.mxu0 %v5799_v18 }
 0x3ed   : > { %2280 = vmatprep.mubr.bf16.mxu1 %v7398_v5  ;;  %2321 = vmatprep.mubr.bf16.mxu0 %v7398_v5 }
 0x3ef   : > { %2251 = vmatpush1.bf16.msra.mxu1 %v5804_v2  ;;  %2292 = vmatpush1.bf16.msra.mxu0 %v5807_v4 }
 0x3f0   : > { %2252 = vmatprep.subr.bf16.mxu1 %v5810_v33  ;;  %2293 = vmatprep.subr.bf16.mxu0 %v5813_v11 }
 0x3f3   : > { %2253 = vmatpush1.bf16.msra.mxu1 %v5816_v29  ;;  %2294 = vmatpush1.bf16.msra.mxu0 %v5819_v8 }
 0x3f4   : > { %2254 = vmatprep.subr.bf16.mxu1 %v5822_v31  ;;  %2295 = vmatprep.subr.bf16.mxu0 %v5825_v50 }
 0x3f7   : > { %2255 = vmatpush1.bf16.msra.mxu1 %v5276_v34  ;;  %2296 = vmatpush1.bf16.msra.mxu0 %v5278_v35  ;;  %v7469_v34 = vld [vmem:[#allocation37_spill] sm:$0xff]  ;;  %v7470_v35 = vld [vmem:[#allocation38_spill] sm:$0xff] }
 0x3f8   : > { %2256 = vmatprep.subr.bf16.mxu1 %v5282_v36  ;;  %2297 = vmatprep.subr.bf16.mxu0 %v5284_v37  ;;  %v7471_v36 = vld [vmem:[#allocation39_spill] sm:$0xff]  ;;  %v7472_v37 = vld [vmem:[#allocation40_spill] sm:$0xff] }
 0x3fb   : > { %2257 = vmatpush1.bf16.msra.mxu1 %v5290_v39  ;;  %2298 = vmatpush1.bf16.msra.mxu0 %v5292_v40  ;;  %v7473_v39 = vld [vmem:[#allocation41_spill] sm:$0xff]  ;;  %v7474_v40 = vld [vmem:[#allocation42_spill] sm:$0xff] }
 0x3fc   : > { %2258 = vmatprep.subr.bf16.mxu1 %v5296_v42  ;;  %2299 = vmatprep.subr.bf16.mxu0 %v5298_v43  ;;  %v7475_v42 = vld [vmem:[#allocation43_spill] sm:$0xff]  ;;  %v7476_v43 = vld [vmem:[#allocation44_spill] sm:$0xff] }
 0x3ff   : > { %2259 = vmatpush1.bf16.msra.mxu1 %v5305_v44  ;;  %2300 = vmatpush1.bf16.msra.mxu0 %v5307_v45  ;;  %v7477_v44 = vld [vmem:[#allocation45_spill] sm:$0xff]  ;;  %v7478_v45 = vld [vmem:[#allocation46_spill] sm:$0xff] }
 0x400   : > { %2260 = vmatprep.subr.bf16.mxu1 %v5311_v46  ;;  %2301 = vmatprep.subr.bf16.mxu0 %v5313_v47  ;;  %v7479_v46 = vld [vmem:[#allocation47_spill] sm:$0xff]  ;;  %v7480_v47 = vld [vmem:[#allocation48_spill] sm:$0xff] }
 0x403   : > { %2261 = vmatpush1.bf16.msra.mxu1 %v5322_v48  ;;  %2302 = vmatpush1.bf16.msra.mxu0 %v5324_v49  ;;  %v7481_v48 = vld [vmem:[#allocation49_spill] sm:$0xff]  ;;  %v7482_v49 = vld [vmem:[#allocation50_spill] sm:$0xff] }
 0x404   : > { %2262 = vmatprep.subr.bf16.mxu1 %v5329_v51  ;;  %2303 = vmatprep.subr.bf16.mxu0 %v5331_v52  ;;  %v7483_v51 = vld [vmem:[#allocation51_spill] sm:$0xff]  ;;  %v7484_v52 = vld [vmem:[#allocation52_spill] sm:$0xff] }
 0x407   : > { %2263 = vmatpush1.bf16.msra.mxu1 %v5335_v53  ;;  %2304 = vmatpush1.bf16.msra.mxu0 %v5337_v54  ;;  %v7485_v53 = vld [vmem:[#allocation53_spill] sm:$0xff]  ;;  %v7486_v54 = vld [vmem:[#allocation54_spill] sm:$0xff] }
 0x408   : > { %2360 = vmatprep.subr.bf16.mxu1 %v5348_v57  ;;  %2401 = vmatprep.subr.bf16.mxu0 %v5350_v58  ;;  %v7487_v57 = vld [vmem:[#allocation55_spill] sm:$0xff]  ;;  %v7488_v58 = vld [vmem:[#allocation56_spill] sm:$0xff] }
 0x40a   : > { %2281 = vmatmul.mubr.bf16.vlgmr.msra.gmra.mxu1 %v2135_v9  ;;  %2322 = vmatmul.mubr.bf16.vlgmr.msra.gmra.mxu0 %v2135_v9 }
 0x40b   : > { %2361 = vmatpush1.bf16.msra.mxu1 %v5352_v59  ;;  %2402 = vmatpush1.bf16.msra.mxu0 %v5354_v60  ;;  %v7489_v59 = vld [vmem:[#allocation57_spill] sm:$0xff]  ;;  %v7490_v60 = vld [vmem:[#allocation58_spill] sm:$0xff] }
 0x40c   : > { %2362 = vmatprep.subr.bf16.mxu1 %v5360_v61  ;;  %2403 = vmatprep.subr.bf16.mxu0 %v5362_v62  ;;  %v7491_v61 = vld [vmem:[#allocation59_spill] sm:$0xff]  ;;  %v7492_v62 = vld [vmem:[#allocation60_spill] sm:$0xff] }
 0x40f   : > { %2363 = vmatpush1.bf16.msra.mxu1 %v5364_v63  ;;  %2404 = vmatpush1.bf16.msra.mxu0 %v5366_v0  ;;  %v7493_v63 = vld [vmem:[#allocation61_spill] sm:$0xff]  ;;  %v7494_v0 = vld [vmem:[#allocation62_spill] sm:$0xff] }
 0x410   : > { %2364 = vmatprep.subr.bf16.mxu1 %v5372_v1  ;;  %2405 = vmatprep.subr.bf16.mxu0 %v7399_v16  ;;  %v7495_v1 = vld [vmem:[#allocation63_spill] sm:$0xff]  ;;  %v7496_v16 = vld [vmem:[#allocation64_spill] sm:$0xff] }
 0x413   : > { %2365 = vmatpush1.bf16.msra.mxu1 %v7400_v17  ;;  %2406 = vmatpush1.bf16.msra.mxu0 %v7401_v19  ;;  %v7497_v17 = vld [vmem:[#allocation65_spill] sm:$0xff]  ;;  %v7498_v19 = vld [vmem:[#allocation66_spill] sm:$0xff] }
 0x414   : > { %2366 = vmatprep.subr.bf16.mxu1 %v7402_v20  ;;  %2407 = vmatprep.subr.bf16.mxu0 %v7403_v22  ;;  %v7499_v20 = vld [vmem:[#allocation67_spill] sm:$0xff]  ;;  %v7500_v22 = vld [vmem:[#allocation68_spill] sm:$0xff] }
 0x417   : > { %2367 = vmatpush1.bf16.msra.mxu1 %v7404_v23  ;;  %2408 = vmatpush1.bf16.msra.mxu0 %v7405_v24  ;;  %v7501_v23 = vld [vmem:[#allocation69_spill] sm:$0xff]  ;;  %v7502_v24 = vld [vmem:[#allocation70_spill] sm:$0xff] }
 0x418   : > { %2368 = vmatprep.subr.bf16.mxu1 %v7406_v25  ;;  %2409 = vmatprep.subr.bf16.mxu0 %v7407_v27  ;;  %v7503_v25 = vld [vmem:[#allocation71_spill] sm:$0xff]  ;;  %v7504_v27 = vld [vmem:[#allocation72_spill] sm:$0xff] }
 0x41b   : > { %2369 = vmatpush1.bf16.msra.mxu1 %v7408_v28  ;;  %2410 = vmatpush1.bf16.msra.mxu0 %v7409_v30  ;;  %v7505_v28 = vld [vmem:[#allocation73_spill] sm:$0xff]  ;;  %v7506_v30 = vld [vmem:[#allocation74_spill] sm:$0xff] }
 0x41c   : > { %2370 = vmatprep.subr.bf16.mxu1 %v7410_v32  ;;  %2411 = vmatprep.subr.bf16.mxu0 %v7469_v34  ;;  %v7507_v32 = vld [vmem:[#allocation75_spill] sm:$0xff] }
 0x41f   : > { %2371 = vmatpush1.bf16.msra.mxu1 %v7470_v35  ;;  %2412 = vmatpush1.bf16.msra.mxu0 %v7471_v36 }
 0x420   : > { %2372 = vmatprep.subr.bf16.mxu1 %v7472_v37  ;;  %2413 = vmatprep.subr.bf16.mxu0 %v7473_v39  ;;  %v7515_v37 = vld [vmem:[#allocation26_spill] sm:$0xff] }
 0x423   : > { %2373 = vmatpush1.bf16.msra.mxu1 %v7474_v40  ;;  %2414 = vmatpush1.bf16.msra.mxu0 %v7475_v42 }
 0x424   : > { %2374 = vmatprep.subr.bf16.mxu1 %v7476_v43  ;;  %2415 = vmatprep.subr.bf16.mxu0 %v7477_v44 }
 0x427   : > { %2375 = vmatpush1.bf16.msra.mxu1 %v7478_v45  ;;  %2416 = vmatpush1.bf16.msra.mxu0 %v7479_v46  ;;  %v7516_v46 = vld [vmem:[#allocation27_spill] sm:$0xff] }
 0x428   : > { %2376 = vmatprep.subr.bf16.mxu1 %v7480_v47  ;;  %2417 = vmatprep.subr.bf16.mxu0 %v7481_v48 }
 0x42b   : > { %2377 = vmatpush2.bf16.msra.mxu1 %v7482_v49  ;;  %2418 = vmatpush2.bf16.msra.mxu0 %v7483_v51  ;;  %v7517_v51 = vld [vmem:[#allocation28_spill] sm:$0xff] }
 0x42c   : > { %2378 = vmatprep.subr.bf16.mxu1 %v7484_v52  ;;  %2419 = vmatprep.subr.bf16.mxu0 %v7485_v53 }
 0x42f   : > { %2379 = vmatpush2.bf16.msra.mxu1 %v7486_v54  ;;  %2420 = vmatpush2.bf16.msra.mxu0 %v7487_v57 }
 0x430   : > { %2380 = vmatprep.subr.bf16.mxu1 %v7488_v58  ;;  %2421 = vmatprep.subr.bf16.mxu0 %v7489_v59 }
 0x433   : > { %2381 = vmatpush2.bf16.msra.mxu1 %v7490_v60  ;;  %2422 = vmatpush2.bf16.msra.mxu0 %v7491_v61  ;;  %v7518_v61 = vld [vmem:[#allocation85_spill] sm:$0xff] }
 0x434   : > { %2382 = vmatprep.subr.bf16.mxu1 %v7492_v62  ;;  %2423 = vmatprep.subr.bf16.mxu0 %v7493_v63 }
 0x437   : > { %2383 = vmatpush2.bf16.msra.mxu1 %v7494_v0  ;;  %2424 = vmatpush2.bf16.msra.mxu0 %v7495_v1 }
 0x438   : > { %2384 = vmatprep.subr.bf16.mxu1 %v7496_v16  ;;  %2425 = vmatprep.subr.bf16.mxu0 %v7497_v17 }
 0x43b   : > { %2385 = vmatpush2.bf16.msra.mxu1 %v7498_v19  ;;  %2426 = vmatpush2.bf16.msra.mxu0 %v7499_v20  ;;  %v7519_v19 = vld [vmem:[#allocation87_spill] sm:$0xff] }
 0x43c   : > { %2386 = vmatprep.subr.bf16.mxu1 %v7500_v22  ;;  %2427 = vmatprep.subr.bf16.mxu0 %v7501_v23 }
 0x43f   : > { %2387 = vmatpush2.bf16.msra.mxu1 %v7502_v24  ;;  %2428 = vmatpush2.bf16.msra.mxu0 %v7503_v25 }
 0x440   : > { %2388 = vmatprep.subr.bf16.mxu1 %v7504_v27  ;;  %2429 = vmatprep.subr.bf16.mxu0 %v7505_v28 }
 0x443   : > { %2389 = vmatpush2.bf16.msra.mxu1 %v7506_v30  ;;  %2430 = vmatpush2.bf16.msra.mxu0 %v7507_v32 }
 0x444   : > { %2390 = vmatprep.subr.bf16.mxu1 %v7508_v56  ;;  %2431 = vmatprep.subr.bf16.mxu0 %v7509_v15 }
 0x447   : > { %2391 = vmatpush2.bf16.msra.mxu1 %v7510_v14  ;;  %2432 = vmatpush2.bf16.msra.mxu0 %v7511_v55  ;;  %v7520_v14 = vld [vmem:[#allocation88_spill] sm:$0xff] }
 0x448   : > { %2471 = vmatprep.subr.bf16.mxu1 %v5910_v21  ;;  %2512 = vmatprep.subr.bf16.mxu0 %v5913_v6 }
 0x4aa   : > { %v2171_v10 = vpop.f32.mrf.mxu1  ;;  %v2212_v13 = vpop.f32.mrf.mxu0 }
 0x4ab   : > { %v2172_v9 = vadd.f32 %v2171_v10, %v7514_v12  ;;  %v2213_v52 = vadd.f32 %v2212_v13, %v7517_v51  ;;  %v7521_v10 = vld [vmem:[#allocation86_spill] sm:$0xff] }
 0x4ac   : > { %v2173_v34 = vpop.f32.mrf.mxu1  ;;  %v2214_v35 = vpop.f32.mrf.mxu0 }
 0x4ad   : > { %v4014_v36 = vmul.f32 -1.442695, %v2172_v9  ;;  %v2174_v39 = vadd.f32 %v2173_v34, %v7515_v37  ;;  %v2215_v47 = vadd.f32 %v2214_v35, %v7516_v46 }
 0x4ae   : > { %v2175_v40 = vpop.f32.mrf.mxu1  ;;  %v2216_v42 = vpop.f32.mrf.mxu0 }
 0x4af   : > { %4417 = vpow2.f32 %v4014_v36  ;;  %v4015_v43 = vmul.f32 -1.442695, %v2174_v39  ;;  %v4016_v48 = vmul.f32 -1.442695, %v2215_v47 }
 0x4b0   : > { %v2176_v44 = vpop.f32.mrf.mxu1  ;;  %v2217_v45 = vpop.f32.mrf.mxu0 }
 0x4b1   : > { %4419 = vpow2.f32 %v4015_v43 }
 0x4b2   : > { %4421 = vpow2.f32 %v4016_v48 }
 0x4bc   : > { %v4418_v49 = vpop.eup %4417 }
 0x4bd   : > { %v2222_v53 = vadd.f32 1.0, %v4418_v49 }
 0x4be   : > { %v4420_v54 = vpop.eup %4419 }
 0x4bf   : > { %4423 = vrcp.f32 %v2222_v53  ;;  %v2228_v57 = vadd.f32 1.0, %v4420_v54  ;;  %v4422_v60 = vpop.eup %4421 }
 0x4c0   : > { %4425 = vtanh.f32 %v2213_v52  ;;  %v2235_v23 = vadd.f32 1.0, %v4422_v60 }
 0x4c1   : > { %4427 = vrcp.f32 %v2228_v57 }
 0x4ca   : > { %v2282_v58 = vpop.f32.mrf.mxu1  ;;  %v2323_v59 = vpop.f32.mrf.mxu0 }
 0x4cb   : > { %v2330_v62 = vadd.f32 %v2282_v58, %v7518_v61  ;;  %v2332_v13 = vadd.f32 %v2323_v59, %v7521_v10  ;;  %v5949_v61 = vld [vmem:[#allocation7 + $0x88] ss:$16 sps:$4 sm:$0xff]  }
 0x4cc   : > { %v4424_v63 = vpop.eup %4423  ;;  %v2284_v0 = vpop.f32.mrf.mxu1  ;;  %v6009_v10 = vld [vmem:[#allocation9 + $0xe8] ss:$16 sps:$4 sm:$0xff]  }
 0x4cd   : > { %v2325_v1 = vpop.f32.mrf.mxu0  ;;  %v4426_v16 = vpop.eup %4425  ;;  %v4017_v17 = vmul.f32 -1.442695, %v2330_v62  ;;  %v2331_v20 = vadd.f32 %v2284_v0, %v7519_v19  ;;  %v5952_v62 = vld [vmem:[#allocation7 + $0x64] ss:$16 sps:$4 sm:$0xff]   ;;  %v5958_v0 = vld [vmem:[#allocation7 + $0x60] ss:$16 sps:$4 sm:$0xff]  }
 0x4ce   : > { %v4428_v22 = vpop.eup %4427  ;;  %v2286_v24 = vpop.f32.mrf.mxu1  ;;  %v2239_v27 = vmul.f32 %v4426_v16, %v4424_v63  ;;  %v2333_v55 = vadd.f32 %v2325_v1, %v7520_v14  ;;  %v5955_v63 = vld [vmem:[#allocation7 + $0x6c] ss:$16 sps:$4 sm:$0xff]   ;;  %v5961_v1 = vld [vmem:[#allocation7 + $0x68] ss:$16 sps:$4 sm:$0xff]   ;;  %v5964_v16 = vld [vmem:[#allocation7 + $0x44] ss:$16 sps:$4 sm:$0xff]  }
 0x4cf   : > { %v2327_v25 = vpop.f32.mrf.mxu0  ;;  %v2238_v28 = vmul.f32 %v4428_v22, %v5781_v41  ;;  %4429 = vpow2.f32 %v4017_v17  ;;  %v4018_v30 = vmul.f32 -1.442695, %v2331_v20  ;;  %v5967_v17 = vld [vmem:[#allocation7 + $0x4c] ss:$16 sps:$4 sm:$0xff]   ;;  %v5970_v19 = vld [vmem:[#allocation7 + $0x40] ss:$16 sps:$4 sm:$0xff]  }
 0x4d0   : > { %v2287_v32 = vpop.f32.mrf.mxu1  ;;  %v4019_v9 = vmul.f32 -1.442695, %v2333_v55  ;;  %v5973_v20 = vld [vmem:[#allocation7 + $0x48] ss:$16 sps:$4 sm:$0xff]   ;;  %v5976_v22 = vld [vmem:[#allocation7 + $0x24] ss:$16 sps:$4 sm:$0xff]  }
 0x4d1   : > { %v2328_v56 = vpop.f32.mrf.mxu0  ;;  %4431 = vpow2.f32 %v4018_v30  ;;  %v5923_v15 = vadd.f32 %v2239_v27, %v2238_v28  ;;  %v5982_v24 = vld [vmem:[#allocation7 + $0x20] ss:$16 sps:$4 sm:$0xff]   ;;  %v5985_v25 = vld [vmem:[#allocation7 + $0x28] ss:$16 sps:$4 sm:$0xff]   ;;  %v5988_v27 = vld [vmem:[#allocation7 + $0x4] ss:$16 sps:$4 sm:$0xff]  }
 0x4d2   : > { %4433 = vrcp.f32 %v2235_v23  ;;  %v5979_v23 = vld [vmem:[#allocation7 + $0x2c] ss:$16 sps:$4 sm:$0xff]   ;;  %v5994_v30 = vld [vmem:[#allocation7] ss:$16 sps:$4 sm:$0xff]   ;;  %v5997_v32 = vld [vmem:[#allocation7 + $0x8] ss:$16 sps:$4 sm:$0xff]  }
 0x4d3   : > { %4435 = vtanh.f32 %v5923_v15  ;;  %v5991_v28 = vld [vmem:[#allocation7 + $0xc] ss:$16 sps:$4 sm:$0xff]   ;;  %v6000_v56 = vld [vmem:[#allocation9 + $0xe4] ss:$16 sps:$4 sm:$0xff]   ;;  %v6006_v55 = vld [vmem:[#allocation9 + $0xe0] ss:$16 sps:$4 sm:$0xff]  }
 0x4d4   : > { %4437 = vtanh.f32 %v2332_v13  ;;  %v6003_v14 = vld [vmem:[#allocation9 + $0xec] ss:$16 sps:$4 sm:$0xff]   ;;  %v6012_v13 = vld [vmem:[#allocation9 + $0xc4] ss:$16 sps:$4 sm:$0xff]  }
 0x4d5   : > { %4439 = vpow2.f32 %v4019_v9  ;;  %v6015_v9 = vld [vmem:[#allocation9 + $0xcc] ss:$16 sps:$4 sm:$0xff]  }
 0x4dc   : > { %v4430_v34 = vpop.eup %4429 }
 0x4dd   : > { %v2337_v35 = vadd.f32 1.0, %v4430_v34  ;;  %v6018_v34 = vld [vmem:[#allocation9 + $0xc0] ss:$16 sps:$4 sm:$0xff]  }
 0x4de   : > { %v4432_v36 = vpop.eup %4431 }
 0x4df   : > { %v4434_v41 = vpop.eup %4433  ;;  %4441 = vrcp.f32 %v2337_v35  ;;  %v2343_v39 = vadd.f32 1.0, %v4432_v36  ;;  %v6021_v35 = vld [vmem:[#allocation9 + $0xc8] ss:$16 sps:$4 sm:$0xff]   ;;  %v6024_v36 = vld [vmem:[#allocation9 + $0xa4] ss:$16 sps:$4 sm:$0xff]  }
 0x4e0   : > { %v4436_v40 = vpop.eup %4435 }
 0x4e1   : > { %4443 = vrcp.f32 %v2343_v39  ;;  %v2242_v42 = vmul.f32 %v4436_v40, %v4434_v41  ;;  %v4438_v44 = vpop.eup %4437  ;;  %v6027_v41 = vld [vmem:[#allocation9 + $0xac] ss:$16 sps:$4 sm:$0xff]   ;;  %v6030_v39 = vld [vmem:[#allocation9 + $0xa0] ss:$16 sps:$4 sm:$0xff]   ;;  %v6033_v40 = vld [vmem:[#allocation9 + $0xa8] ss:$16 sps:$4 sm:$0xff]  }
 0x4e2   : > { %v4440_v45 = vpop.eup %4439  ;;  %7522 = vst [vmem:[#allocation31_spill] sm:$0xff] %v6030_v39  ;;  %7523 = vst [vmem:[#allocation32_spill] sm:$0xff] %v6033_v40 }
 0x4e3   : > { %v2359_v43 = vpack.c.bf16 %v2242_v42, %v2242_v42  ;;  %v2350_v52 = vadd.f32 1.0, %v4440_v45  ;;  %v6036_v42 = vld [vmem:[#allocation9 + $0x84] ss:$16 sps:$4 sm:$0xff]   ;;  %v6045_v45 = vld [vmem:[#allocation9 + $0x88] ss:$16 sps:$4 sm:$0xff]  }
 0x4e4   : > { %7524 = vst [vmem:[#allocation33_spill] sm:$0xff] %v6036_v42  ;;  %7527 = vst [vmem:[#allocation36_spill] sm:$0xff] %v6045_v45 }
 0x4e5   : > { %2392 = vmatprep.mubr.bf16.mxu1 %v2359_v43  ;;  %2433 = vmatprep.mubr.bf16.mxu0 %v2359_v43  ;;  %4445 = vrcp.f32 %v2350_v52  ;;  %v6039_v43 = vld [vmem:[#allocation9 + $0x8c] ss:$16 sps:$4 sm:$0xff]   ;;  %v6057_v52 = vld [vmem:[#allocation9 + $0x68] ss:$16 sps:$4 sm:$0xff]  }
 0x4e6   : > { %7525 = vst [vmem:[#allocation34_spill] sm:$0xff] %v6039_v43  ;;  %7531 = vst [vmem:[#allocation81_spill] sm:$0xff] %v6057_v52 }
 0x4ec   : > { %v4442_v47 = vpop.eup %4441 }
 0x4ed   : > { %v2354_v48 = vmul.f32 %v4442_v47, %v4438_v44  ;;  %v6042_v44 = vld [vmem:[#allocation9 + $0x80] ss:$16 sps:$4 sm:$0xff]   ;;  %v6048_v47 = vld [vmem:[#allocation9 + $0x64] ss:$16 sps:$4 sm:$0xff]  }
 0x4ee   : > { %v4444_v49 = vpop.eup %4443  ;;  %7526 = vst [vmem:[#allocation35_spill] sm:$0xff] %v6042_v44  ;;  %7528 = vst [vmem:[#allocation23_spill] sm:$0xff] %v6048_v47 }
 0x4ef   : > { %v2353_v53 = vmul.f32 %v4444_v49, %v5787_v3  ;;  %v5946_v3 = vld [vmem:[#allocation7 + $0x80] ss:$16 sps:$4 sm:$0xff]  }
 0x4f0   : > { %v6054_v49 = vld [vmem:[#allocation9 + $0x60] ss:$16 sps:$4 sm:$0xff]  }
 0x4f1   : > { %v5929_v54 = vadd.f32 %v2354_v48, %v2353_v53  ;;  %v6051_v48 = vld [vmem:[#allocation9 + $0x6c] ss:$16 sps:$4 sm:$0xff]   ;;  %7530 = vst [vmem:[#allocation80_spill] sm:$0xff] %v6054_v49  ;;  %v6060_v53 = vld [vmem:[#allocation9 + $0x44] ss:$16 sps:$4 sm:$0xff]  }
 0x4f2   : > { %v4446_v57 = vpop.eup %4445  ;;  %7529 = vst [vmem:[#allocation24_spill] sm:$0xff] %v6051_v48  ;;  %7532 = vst [vmem:[#allocation83_spill] sm:$0xff] %v6060_v53 }
 0x4f3   : > { %4447 = vtanh.f32 %v5929_v54 }
 0x500   : > { %v4448_v58 = vpop.eup %4447 }
 0x501   : > { %v2357_v59 = vmul.f32 %v4448_v58, %v4446_v57  ;;  %v6063_v57 = vld [vmem:[#allocation9 + $0x4c] ss:$16 sps:$4 sm:$0xff]   ;;  %v6066_v58 = vld [vmem:[#allocation9 + $0x40] ss:$16 sps:$4 sm:$0xff]  }
 0x502   : > { %7533 = vst [vmem:[#allocation84_spill] sm:$0xff] %v6063_v57  ;;  %7534 = vst [vmem:[#allocation82_spill] sm:$0xff] %v6066_v58 }
 0x503   : > { %v2358_v60 = vpack.c.bf16 %v2357_v59, %v2357_v59  ;;  %v6069_v59 = vld [vmem:[#allocation9 + $0x48] ss:$16 sps:$4 sm:$0xff]  }
 0x504   : > { %7535 = vst [vmem:[#allocation37_spill] sm:$0xff] %v6069_v59 }
 0x505   : > { %2393 = vmatmul.mubr.bf16.vlgmr.msra.gmra.mxu1 %v2358_v60  ;;  %2434 = vmatmul.mubr.bf16.vlgmr.msra.gmra.mxu0 %v2358_v60 }
 0x506   : > { %2472 = vmatpush1.bf16.msra.mxu1 %v5790_v38  ;;  %2513 = vmatpush1.bf16.msra.mxu0 %v5793_v7 }
 0x507   : > { %2473 = vmatprep.subr.bf16.mxu1 %v5796_v26  ;;  %2514 = vmatprep.subr.bf16.mxu0 %v5799_v18 }
 0x508   : > { %2503 = vmatprep.mubr.bf16.mxu1 %v7398_v5  ;;  %2544 = vmatprep.mubr.bf16.mxu0 %v7398_v5 }
 0x50a   : > { %2474 = vmatpush1.bf16.msra.mxu1 %v5804_v2  ;;  %2515 = vmatpush1.bf16.msra.mxu0 %v5807_v4 }
 0x50b   : > { %2475 = vmatprep.subr.bf16.mxu1 %v5810_v33  ;;  %2516 = vmatprep.subr.bf16.mxu0 %v5813_v11 }
 0x50e   : > { %2476 = vmatpush1.bf16.msra.mxu1 %v5816_v29  ;;  %2517 = vmatpush1.bf16.msra.mxu0 %v5819_v8 }
 0x50f   : > { %2477 = vmatprep.subr.bf16.mxu1 %v5822_v31  ;;  %2518 = vmatprep.subr.bf16.mxu0 %v5825_v50 }
 0x512   : > { %2478 = vmatpush1.bf16.msra.mxu1 %v5946_v3  ;;  %2519 = vmatpush1.bf16.msra.mxu0 %v5949_v61 }
 0x513   : > { %2479 = vmatprep.subr.bf16.mxu1 %v5952_v62  ;;  %2520 = vmatprep.subr.bf16.mxu0 %v5955_v63 }
 0x516   : > { %2480 = vmatpush1.bf16.msra.mxu1 %v5958_v0  ;;  %2521 = vmatpush1.bf16.msra.mxu0 %v5961_v1 }
 0x517   : > { %2481 = vmatprep.subr.bf16.mxu1 %v5964_v16  ;;  %2522 = vmatprep.subr.bf16.mxu0 %v5967_v17 }
 0x51a   : > { %2482 = vmatpush1.bf16.msra.mxu1 %v5970_v19  ;;  %2523 = vmatpush1.bf16.msra.mxu0 %v5973_v20 }
 0x51b   : > { %2483 = vmatprep.subr.bf16.mxu1 %v5976_v22  ;;  %2524 = vmatprep.subr.bf16.mxu0 %v5979_v23 }
 0x51e   : > { %2484 = vmatpush1.bf16.msra.mxu1 %v5982_v24  ;;  %2525 = vmatpush1.bf16.msra.mxu0 %v5985_v25 }
 0x51f   : > { %2485 = vmatprep.subr.bf16.mxu1 %v5988_v27  ;;  %2526 = vmatprep.subr.bf16.mxu0 %v5991_v28 }
 0x522   : > { %2486 = vmatpush1.bf16.msra.mxu1 %v5994_v30  ;;  %2527 = vmatpush1.bf16.msra.mxu0 %v5997_v32 }
 0x523   : > { %2583 = vmatprep.subr.bf16.mxu1 %v6000_v56  ;;  %2624 = vmatprep.subr.bf16.mxu0 %v6003_v14 }
 0x525   : > { %2504 = vmatmul.mubr.bf16.vlgmr.msra.gmra.mxu1 %v2358_v60  ;;  %2545 = vmatmul.mubr.bf16.vlgmr.msra.gmra.mxu0 %v2358_v60  ;;  %v6072_v60 = vld [vmem:[#allocation9 + $0x24] ss:$16 sps:$4 sm:$0xff]  }
 0x526   : > { %2584 = vmatpush1.bf16.msra.mxu1 %v6006_v55  ;;  %2625 = vmatpush1.bf16.msra.mxu0 %v6009_v10  ;;  %7536 = vst [vmem:[#allocation38_spill] sm:$0xff] %v6072_v60 }
 0x527   : > { %2585 = vmatprep.subr.bf16.mxu1 %v6012_v13  ;;  %2626 = vmatprep.subr.bf16.mxu0 %v6015_v9 }
 0x52a   : > { %2586 = vmatpush1.bf16.msra.mxu1 %v6018_v34  ;;  %2627 = vmatpush1.bf16.msra.mxu0 %v6021_v35 }
 0x52b   : > { %2587 = vmatprep.subr.bf16.mxu1 %v6024_v36  ;;  %2628 = vmatprep.subr.bf16.mxu0 %v6027_v41 }
 0x52e   : > { %2588 = vmatpush1.bf16.msra.mxu1 %v6030_v39  ;;  %2629 = vmatpush1.bf16.msra.mxu0 %v6033_v40 }
 0x52f   : > { %2589 = vmatprep.subr.bf16.mxu1 %v6036_v42  ;;  %2630 = vmatprep.subr.bf16.mxu0 %v6039_v43 }
 0x532   : > { %2590 = vmatpush1.bf16.msra.mxu1 %v6042_v44  ;;  %2631 = vmatpush1.bf16.msra.mxu0 %v6045_v45 }
 0x533   : > { %2591 = vmatprep.subr.bf16.mxu1 %v6048_v47  ;;  %2632 = vmatprep.subr.bf16.mxu0 %v6051_v48 }
 0x536   : > { %2592 = vmatpush1.bf16.msra.mxu1 %v6054_v49  ;;  %2633 = vmatpush1.bf16.msra.mxu0 %v6057_v52  ;;  %v6075_v52 = vld [vmem:[#allocation9 + $0x2c] ss:$16 sps:$4 sm:$0xff]  }
 0x537   : > { %2593 = vmatprep.subr.bf16.mxu1 %v6060_v53  ;;  %2634 = vmatprep.subr.bf16.mxu0 %v6063_v57  ;;  %7537 = vst [vmem:[#allocation39_spill] sm:$0xff] %v6075_v52  ;;  %v6078_v53 = vld [vmem:[#allocation9 + $0x20] ss:$16 sps:$4 sm:$0xff]   ;;  %v6081_v57 = vld [vmem:[#allocation9 + $0x28] ss:$16 sps:$4 sm:$0xff]  }
 0x538   : > { %7538 = vst [vmem:[#allocation40_spill] sm:$0xff] %v6078_v53  ;;  %7539 = vst [vmem:[#allocation41_spill] sm:$0xff] %v6081_v57 }
 0x53a   : > { %2594 = vmatpush1.bf16.msra.mxu1 %v6066_v58  ;;  %2635 = vmatpush1.bf16.msra.mxu0 %v6069_v59  ;;  %v6084_v58 = vld [vmem:[#allocation9 + $0x4] ss:$16 sps:$4 sm:$0xff]   ;;  %v6087_v59 = vld [vmem:[#allocation9 + $0xc] ss:$16 sps:$4 sm:$0xff]  }
 0x53b   : > { %2595 = vmatprep.subr.bf16.mxu1 %v6072_v60  ;;  %2636 = vmatprep.subr.bf16.mxu0 %v6075_v52  ;;  %7540 = vst [vmem:[#allocation42_spill] sm:$0xff] %v6084_v58  ;;  %7541 = vst [vmem:[#allocation43_spill] sm:$0xff] %v6087_v59  ;;  %v6090_v60 = vld [vmem:[#allocation9] ss:$16 sps:$4 sm:$0xff]   ;;  %v6093_v52 = vld [vmem:[#allocation9 + $0x8] ss:$16 sps:$4 sm:$0xff]  }
 0x53c   : > { %7542 = vst [vmem:[#allocation44_spill] sm:$0xff] %v6090_v60  ;;  %7543 = vst [vmem:[#allocation45_spill] sm:$0xff] %v6093_v52 }
 0x53e   : > { %2596 = vmatpush1.bf16.msra.mxu1 %v6078_v53  ;;  %2637 = vmatpush1.bf16.msra.mxu0 %v6081_v57  ;;  %v6096_v53 = vld [vmem:[#allocation9 + $0x1e4] ss:$16 sps:$4 sm:$0xff]   ;;  %v6099_v57 = vld [vmem:[#allocation9 + $0x1ec] ss:$16 sps:$4 sm:$0xff]  }
 0x53f   : > { %2597 = vmatprep.subr.bf16.mxu1 %v6084_v58  ;;  %2638 = vmatprep.subr.bf16.mxu0 %v6087_v59  ;;  %7544 = vst [vmem:[#allocation46_spill] sm:$0xff] %v6096_v53  ;;  %7545 = vst [vmem:[#allocation47_spill] sm:$0xff] %v6099_v57  ;;  %v6102_v58 = vld [vmem:[#allocation9 + $0x1e0] ss:$16 sps:$4 sm:$0xff]   ;;  %v6105_v59 = vld [vmem:[#allocation9 + $0x1e8] ss:$16 sps:$4 sm:$0xff]  }
 0x540   : > { %7546 = vst [vmem:[#allocation48_spill] sm:$0xff] %v6102_v58  ;;  %7547 = vst [vmem:[#allocation49_spill] sm:$0xff] %v6105_v59 }
 0x542   : > { %2598 = vmatpush1.bf16.msra.mxu1 %v6090_v60  ;;  %2639 = vmatpush1.bf16.msra.mxu0 %v6093_v52  ;;  %v6108_v60 = vld [vmem:[#allocation9 + $0x1c4] ss:$16 sps:$4 sm:$0xff]   ;;  %v6111_v52 = vld [vmem:[#allocation9 + $0x1cc] ss:$16 sps:$4 sm:$0xff]  }
 0x543   : > { %2599 = vmatprep.subr.bf16.mxu1 %v6096_v53  ;;  %2640 = vmatprep.subr.bf16.mxu0 %v6099_v57  ;;  %7548 = vst [vmem:[#allocation50_spill] sm:$0xff] %v6108_v60  ;;  %7549 = vst [vmem:[#allocation51_spill] sm:$0xff] %v6111_v52  ;;  %v6114_v53 = vld [vmem:[#allocation9 + $0x1c0] ss:$16 sps:$4 sm:$0xff]   ;;  %v6117_v57 = vld [vmem:[#allocation9 + $0x1c8] ss:$16 sps:$4 sm:$0xff]  }
 0x544   : > { %7550 = vst [vmem:[#allocation52_spill] sm:$0xff] %v6114_v53  ;;  %7551 = vst [vmem:[#allocation53_spill] sm:$0xff] %v6117_v57 }
 0x546   : > { %2600 = vmatpush2.bf16.msra.mxu1 %v6102_v58  ;;  %2641 = vmatpush2.bf16.msra.mxu0 %v6105_v59  ;;  %v6120_v58 = vld [vmem:[#allocation9 + $0x1a4] ss:$16 sps:$4 sm:$0xff]   ;;  %v6123_v59 = vld [vmem:[#allocation9 + $0x1ac] ss:$16 sps:$4 sm:$0xff]  }
 0x547   : > { %2601 = vmatprep.subr.bf16.mxu1 %v6108_v60  ;;  %2642 = vmatprep.subr.bf16.mxu0 %v6111_v52  ;;  %7552 = vst [vmem:[#allocation54_spill] sm:$0xff] %v6120_v58  ;;  %7553 = vst [vmem:[#allocation55_spill] sm:$0xff] %v6123_v59  ;;  %v6126_v60 = vld [vmem:[#allocation9 + $0x1a0] ss:$16 sps:$4 sm:$0xff]   ;;  %v6129_v52 = vld [vmem:[#allocation9 + $0x1a8] ss:$16 sps:$4 sm:$0xff]  }
 0x548   : > { %7554 = vst [vmem:[#allocation56_spill] sm:$0xff] %v6126_v60  ;;  %7555 = vst [vmem:[#allocation57_spill] sm:$0xff] %v6129_v52 }
 0x54a   : > { %2602 = vmatpush2.bf16.msra.mxu1 %v6114_v53  ;;  %2643 = vmatpush2.bf16.msra.mxu0 %v6117_v57  ;;  %v6132_v53 = vld [vmem:[#allocation9 + $0x184] ss:$16 sps:$4 sm:$0xff]   ;;  %v6135_v57 = vld [vmem:[#allocation9 + $0x18c] ss:$16 sps:$4 sm:$0xff]  }
 0x54b   : > { %2603 = vmatprep.subr.bf16.mxu1 %v6120_v58  ;;  %2644 = vmatprep.subr.bf16.mxu0 %v6123_v59  ;;  %7556 = vst [vmem:[#allocation58_spill] sm:$0xff] %v6132_v53  ;;  %7557 = vst [vmem:[#allocation59_spill] sm:$0xff] %v6135_v57  ;;  %v6138_v58 = vld [vmem:[#allocation9 + $0x180] ss:$16 sps:$4 sm:$0xff]   ;;  %v6141_v59 = vld [vmem:[#allocation9 + $0x188] ss:$16 sps:$4 sm:$0xff]  }
 0x54c   : > { %7558 = vst [vmem:[#allocation60_spill] sm:$0xff] %v6138_v58  ;;  %7559 = vst [vmem:[#allocation61_spill] sm:$0xff] %v6141_v59 }
 0x54e   : > { %2604 = vmatpush2.bf16.msra.mxu1 %v6126_v60  ;;  %2645 = vmatpush2.bf16.msra.mxu0 %v6129_v52  ;;  %v6144_v60 = vld [vmem:[#allocation9 + $0x164] ss:$16 sps:$4 sm:$0xff]   ;;  %v6147_v52 = vld [vmem:[#allocation9 + $0x16c] ss:$16 sps:$4 sm:$0xff]  }
 0x54f   : > { %2605 = vmatprep.subr.bf16.mxu1 %v6132_v53  ;;  %2646 = vmatprep.subr.bf16.mxu0 %v6135_v57  ;;  %7560 = vst [vmem:[#allocation62_spill] sm:$0xff] %v6144_v60  ;;  %7561 = vst [vmem:[#allocation63_spill] sm:$0xff] %v6147_v52  ;;  %v6150_v53 = vld [vmem:[#allocation9 + $0x160] ss:$16 sps:$4 sm:$0xff]   ;;  %v6153_v57 = vld [vmem:[#allocation9 + $0x168] ss:$16 sps:$4 sm:$0xff]  }
 0x550   : > { %7562 = vst [vmem:[#allocation64_spill] sm:$0xff] %v6150_v53  ;;  %7563 = vst [vmem:[#allocation65_spill] sm:$0xff] %v6153_v57 }
 0x552   : > { %2606 = vmatpush2.bf16.msra.mxu1 %v6138_v58  ;;  %2647 = vmatpush2.bf16.msra.mxu0 %v6141_v59  ;;  %v6156_v58 = vld [vmem:[#allocation9 + $0x144] ss:$16 sps:$4 sm:$0xff]   ;;  %v6159_v59 = vld [vmem:[#allocation9 + $0x14c] ss:$16 sps:$4 sm:$0xff]  }
 0x553   : > { %2607 = vmatprep.subr.bf16.mxu1 %v6144_v60  ;;  %2648 = vmatprep.subr.bf16.mxu0 %v6147_v52  ;;  %7564 = vst [vmem:[#allocation66_spill] sm:$0xff] %v6156_v58  ;;  %7565 = vst [vmem:[#allocation67_spill] sm:$0xff] %v6159_v59  ;;  %v6162_v60 = vld [vmem:[#allocation9 + $0x140] ss:$16 sps:$4 sm:$0xff]   ;;  %v6165_v52 = vld [vmem:[#allocation9 + $0x148] ss:$16 sps:$4 sm:$0xff]  }
 0x554   : > { %7566 = vst [vmem:[#allocation68_spill] sm:$0xff] %v6162_v60  ;;  %7567 = vst [vmem:[#allocation69_spill] sm:$0xff] %v6165_v52 }
 0x556   : > { %2608 = vmatpush2.bf16.msra.mxu1 %v6150_v53  ;;  %2649 = vmatpush2.bf16.msra.mxu0 %v6153_v57  ;;  %v6168_v53 = vld [vmem:[#allocation9 + $0x124] ss:$16 sps:$4 sm:$0xff]   ;;  %v6171_v57 = vld [vmem:[#allocation9 + $0x12c] ss:$16 sps:$4 sm:$0xff]  }
 0x557   : > { %2609 = vmatprep.subr.bf16.mxu1 %v6156_v58  ;;  %2650 = vmatprep.subr.bf16.mxu0 %v6159_v59  ;;  %7568 = vst [vmem:[#allocation70_spill] sm:$0xff] %v6168_v53  ;;  %7569 = vst [vmem:[#allocation71_spill] sm:$0xff] %v6171_v57  ;;  %v6174_v58 = vld [vmem:[#allocation9 + $0x120] ss:$16 sps:$4 sm:$0xff]   ;;  %v6177_v59 = vld [vmem:[#allocation9 + $0x128] ss:$16 sps:$4 sm:$0xff]  }
 0x558   : > { %7570 = vst [vmem:[#allocation72_spill] sm:$0xff] %v6174_v58  ;;  %7571 = vst [vmem:[#allocation73_spill] sm:$0xff] %v6177_v59 }
 0x55a   : > { %2610 = vmatpush2.bf16.msra.mxu1 %v6162_v60  ;;  %2651 = vmatpush2.bf16.msra.mxu0 %v6165_v52  ;;  %v6180_v60 = vld [vmem:[#allocation9 + $0x104] ss:$16 sps:$4 sm:$0xff]   ;;  %v6183_v52 = vld [vmem:[#allocation9 + $0x10c] ss:$16 sps:$4 sm:$0xff]  }
 0x55b   : > { %2611 = vmatprep.subr.bf16.mxu1 %v6168_v53  ;;  %2652 = vmatprep.subr.bf16.mxu0 %v6171_v57  ;;  %7572 = vst [vmem:[#allocation74_spill] sm:$0xff] %v6180_v60  ;;  %7573 = vst [vmem:[#allocation75_spill] sm:$0xff] %v6183_v52  ;;  %v6186_v53 = vld [vmem:[#allocation9 + $0x100] ss:$16 sps:$4 sm:$0xff]   ;;  %v6189_v57 = vld [vmem:[#allocation9 + $0x108] ss:$16 sps:$4 sm:$0xff]  }
 0x55c   : > { %7574 = vst [vmem:[#allocation76_spill] sm:$0xff] %v6186_v53  ;;  %7575 = vst [vmem:[#allocation77_spill] sm:$0xff] %v6189_v57 }
 0x55e   : > { %2612 = vmatpush2.bf16.msra.mxu1 %v6174_v58  ;;  %2653 = vmatpush2.bf16.msra.mxu0 %v6177_v59 }
 0x55f   : > { %2613 = vmatprep.subr.bf16.mxu1 %v6180_v60  ;;  %2654 = vmatprep.subr.bf16.mxu0 %v6183_v52 }
 0x562   : > { %2614 = vmatpush2.bf16.msra.mxu1 %v6186_v53  ;;  %2655 = vmatpush2.bf16.msra.mxu0 %v6189_v57 }
 0x563   : > { %2694 = vmatprep.subr.bf16.mxu1 %v5910_v21  ;;  %2735 = vmatprep.subr.bf16.mxu0 %v5913_v6 }
 0x5c5   : > { %v2394_v59 = vpop.f32.mrf.mxu1  ;;  %v2435_v58 = vpop.f32.mrf.mxu0 }
 0x5c6   : > { %v2395_v60 = vadd.f32 %v2394_v59, %v7514_v12  ;;  %v2436_v40 = vadd.f32 %v2435_v58, %v7517_v51 }
 0x5c7   : > { %v2396_v49 = vpop.f32.mrf.mxu1  ;;  %v2437_v48 = vpop.f32.mrf.mxu0 }
 0x5c8   : > { %v4020_v47 = vmul.f32 -1.442695, %v2395_v60  ;;  %v2397_v52 = vadd.f32 %v2396_v49, %v7515_v37  ;;  %v2438_v21 = vadd.f32 %v2437_v48, %v7516_v46  ;;  %v7576_v49 = vld [vmem:[#allocation89_spill] sm:$0xff]  ;;  %v7577_v46 = vld [vmem:[#allocation91_spill] sm:$0xff] }
 0x5c9   : > { %v2398_v45 = vpop.f32.mrf.mxu1  ;;  %v2439_v44 = vpop.f32.mrf.mxu0 }
 0x5ca   : > { %4449 = vpow2.f32 %v4020_v47  ;;  %v4021_v53 = vmul.f32 -1.442695, %v2397_v52  ;;  %v4022_v57 = vmul.f32 -1.442695, %v2438_v21 }
 0x5cb   : > { %v2399_v43 = vpop.f32.mrf.mxu1  ;;  %v2440_v42 = vpop.f32.mrf.mxu0 }
 0x5cc   : > { %4451 = vpow2.f32 %v4021_v53 }
 0x5cd   : > { %4453 = vpow2.f32 %v4022_v57 }
 0x5d7   : > { %v4450_v6 = vpop.eup %4449 }
 0x5d8   : > { %v2445_v39 = vadd.f32 1.0, %v4450_v6 }
 0x5d9   : > { %v4452_v59 = vpop.eup %4451 }
 0x5da   : > { %4455 = vrcp.f32 %v2445_v39  ;;  %v2451_v60 = vadd.f32 1.0, %v4452_v59  ;;  %v4454_v47 = vpop.eup %4453 }
 0x5db   : > { %4457 = vtanh.f32 %v2436_v40  ;;  %v2458_v6 = vadd.f32 1.0, %v4454_v47 }
 0x5dc   : > { %4459 = vrcp.f32 %v2451_v60 }
 0x5e5   : > { %v2505_v45 = vpop.f32.mrf.mxu1  ;;  %v2546_v44 = vpop.f32.mrf.mxu0 }
 0x5e6   : > { %v2553_v43 = vadd.f32 %v2505_v45, %v7576_v49  ;;  %v7578_v49 = vld [vmem:[#allocation92_spill] sm:$0xff] }
 0x5e7   : > { %v4456_v42 = vpop.eup %4455  ;;  %v2507_v52 = vpop.f32.mrf.mxu1 }
 0x5e8   : > { %v2548_v53 = vpop.f32.mrf.mxu0  ;;  %v4458_v48 = vpop.eup %4457  ;;  %v4023_v21 = vmul.f32 -1.442695, %v2553_v43  ;;  %v2554_v37 = vadd.f32 %v2507_v52, %v7577_v46  ;;  %v7579_v46 = vld [vmem:[#allocation90_spill] sm:$0xff] }
 0x5e9   : > { %v4460_v58 = vpop.eup %4459  ;;  %v2509_v51 = vpop.f32.mrf.mxu1  ;;  %v2462_v39 = vmul.f32 %v4458_v48, %v4456_v42  ;;  %v2556_v43 = vadd.f32 %v2548_v53, %v7578_v49  ;;  %v2555_v52 = vadd.f32 %v2546_v44, %v7579_v46 }
 0x5ea   : > { %v2550_v57 = vpop.f32.mrf.mxu0  ;;  %v2461_v40 = vmul.f32 %v4460_v58, %v5923_v15  ;;  %4461 = vpow2.f32 %v4023_v21  ;;  %v4024_v59 = vmul.f32 -1.442695, %v2554_v37 }
 0x5eb   : > { %v2510_v60 = vpop.f32.mrf.mxu1  ;;  %v4025_v47 = vmul.f32 -1.442695, %v2556_v43 }
 0x5ec   : > { %v2551_v12 = vpop.f32.mrf.mxu0  ;;  %4463 = vpow2.f32 %v4024_v59  ;;  %v6201_v45 = vadd.f32 %v2462_v39, %v2461_v40 }
 0x5ed   : > { %4465 = vrcp.f32 %v2458_v6 }
 0x5ee   : > { %4467 = vtanh.f32 %v6201_v45 }
 0x5ef   : > { %4469 = vtanh.f32 %v2555_v52 }
 0x5f0   : > { %4471 = vpow2.f32 %v4025_v47  ;;  %v7593_v47 = vld [vmem:[#allocation37_spill] sm:$0xff] }
 0x5f7   : > { %v4462_v51 = vpop.eup %4461 }
 0x5f8   : > { %v2560_v57 = vadd.f32 1.0, %v4462_v51  ;;  %v7594_v51 = vld [vmem:[#allocation38_spill] sm:$0xff] }
 0x5f9   : > { %v4464_v42 = vpop.eup %4463 }
 0x5fa   : > { %v4466_v15 = vpop.eup %4465  ;;  %4473 = vrcp.f32 %v2560_v57  ;;  %v2566_v37 = vadd.f32 1.0, %v4464_v42  ;;  %v7595_v57 = vld [vmem:[#allocation39_spill] sm:$0xff]  ;;  %v7596_v42 = vld [vmem:[#allocation40_spill] sm:$0xff] }
 0x5fb   : > { %v4468_v12 = vpop.eup %4467 }
 0x5fc   : > { %4475 = vrcp.f32 %v2566_v37  ;;  %v2465_v48 = vmul.f32 %v4468_v12, %v4466_v15  ;;  %v4470_v58 = vpop.eup %4469  ;;  %v7597_v15 = vld [vmem:[#allocation41_spill] sm:$0xff]  ;;  %v7598_v37 = vld [vmem:[#allocation42_spill] sm:$0xff]  ;;  %v7599_v12 = vld [vmem:[#allocation43_spill] sm:$0xff] }
 0x5fd   : > { %v4472_v6 = vpop.eup %4471 }
 0x5fe   : > { %v2582_v21 = vpack.c.bf16 %v2465_v48, %v2465_v48  ;;  %v2573_v40 = vadd.f32 1.0, %v4472_v6  ;;  %v7600_v48 = vld [vmem:[#allocation44_spill] sm:$0xff]  ;;  %v7603_v6 = vld [vmem:[#allocation47_spill] sm:$0xff] }
 0x600   : > { %2615 = vmatprep.mubr.bf16.mxu1 %v2582_v21  ;;  %2656 = vmatprep.mubr.bf16.mxu0 %v2582_v21  ;;  %4477 = vrcp.f32 %v2573_v40  ;;  %v7601_v21 = vld [vmem:[#allocation45_spill] sm:$0xff]  ;;  %v7607_v40 = vld [vmem:[#allocation51_spill] sm:$0xff] }
 0x607   : > { %v4474_v53 = vpop.eup %4473 }
 0x608   : > { %v2577_v39 = vmul.f32 %v4474_v53, %v4470_v58  ;;  %v7602_v58 = vld [vmem:[#allocation46_spill] sm:$0xff]  ;;  %v7604_v53 = vld [vmem:[#allocation48_spill] sm:$0xff] }
 0x609   : > { %v4476_v44 = vpop.eup %4475 }
 0x60a   : > { %v2576_v59 = vmul.f32 %v4476_v44, %v5929_v54  ;;  %v7592_v54 = vld [vmem:[#allocation82_spill] sm:$0xff] }
 0x60b   : > { %v7606_v44 = vld [vmem:[#allocation50_spill] sm:$0xff] }
 0x60c   : > { %v6207_v60 = vadd.f32 %v2577_v39, %v2576_v59  ;;  %v7605_v39 = vld [vmem:[#allocation49_spill] sm:$0xff]  ;;  %v7608_v59 = vld [vmem:[#allocation52_spill] sm:$0xff] }
 0x60d   : > { %v4478_v49 = vpop.eup %4477 }
 0x60e   : > { %4479 = vtanh.f32 %v6207_v60 }
 0x61b   : > { %v4480_v43 = vpop.eup %4479 }
 0x61c   : > { %v2580_v46 = vmul.f32 %v4480_v43, %v4478_v49  ;;  %v7609_v49 = vld [vmem:[#allocation53_spill] sm:$0xff]  ;;  %v7610_v43 = vld [vmem:[#allocation54_spill] sm:$0xff] }
 0x61e   : > { %v2581_v52 = vpack.c.bf16 %v2580_v46, %v2580_v46  ;;  %v7611_v46 = vld [vmem:[#allocation55_spill] sm:$0xff] }
 0x620   : > { %2616 = vmatmul.mubr.bf16.vlgmr.msra.gmra.mxu1 %v2581_v52  ;;  %2657 = vmatmul.mubr.bf16.vlgmr.msra.gmra.mxu0 %v2581_v52 }
 0x621   : > { %2695 = vmatpush1.bf16.msra.mxu1 %v5790_v38  ;;  %2736 = vmatpush1.bf16.msra.mxu0 %v5793_v7  ;;  %v7580_v38 = vld [vmem:[#allocation31_spill] sm:$0xff]  ;;  %v7581_v7 = vld [vmem:[#allocation32_spill] sm:$0xff] }
 0x622   : > { %2696 = vmatprep.subr.bf16.mxu1 %v5796_v26  ;;  %2737 = vmatprep.subr.bf16.mxu0 %v5799_v18  ;;  %v7582_v26 = vld [vmem:[#allocation33_spill] sm:$0xff]  ;;  %v7583_v18 = vld [vmem:[#allocation34_spill] sm:$0xff] }
 0x623   : > { %2726 = vmatprep.mubr.bf16.mxu1 %v7398_v5  ;;  %2767 = vmatprep.mubr.bf16.mxu0 %v7398_v5 }
 0x625   : > { %2697 = vmatpush1.bf16.msra.mxu1 %v5804_v2  ;;  %2738 = vmatpush1.bf16.msra.mxu0 %v5807_v4  ;;  %v7584_v2 = vld [vmem:[#allocation35_spill] sm:$0xff]  ;;  %v7585_v4 = vld [vmem:[#allocation36_spill] sm:$0xff] }
 0x626   : > { %2698 = vmatprep.subr.bf16.mxu1 %v5810_v33  ;;  %2739 = vmatprep.subr.bf16.mxu0 %v5813_v11  ;;  %v7586_v33 = vld [vmem:[#allocation23_spill] sm:$0xff]  ;;  %v7587_v11 = vld [vmem:[#allocation24_spill] sm:$0xff] }
 0x629   : > { %2699 = vmatpush1.bf16.msra.mxu1 %v5816_v29  ;;  %2740 = vmatpush1.bf16.msra.mxu0 %v5819_v8  ;;  %v7588_v29 = vld [vmem:[#allocation80_spill] sm:$0xff]  ;;  %v7589_v8 = vld [vmem:[#allocation81_spill] sm:$0xff] }
 0x62a   : > { %2700 = vmatprep.subr.bf16.mxu1 %v5822_v31  ;;  %2741 = vmatprep.subr.bf16.mxu0 %v5825_v50  ;;  %v7590_v31 = vld [vmem:[#allocation83_spill] sm:$0xff]  ;;  %v7591_v50 = vld [vmem:[#allocation84_spill] sm:$0xff] }
 0x62d   : > { %2701 = vmatpush1.bf16.msra.mxu1 %v5946_v3  ;;  %2742 = vmatpush1.bf16.msra.mxu0 %v5949_v61 }
 0x62e   : > { %2702 = vmatprep.subr.bf16.mxu1 %v5952_v62  ;;  %2743 = vmatprep.subr.bf16.mxu0 %v5955_v63 }
 0x631   : > { %2703 = vmatpush1.bf16.msra.mxu1 %v5958_v0  ;;  %2744 = vmatpush1.bf16.msra.mxu0 %v5961_v1 }
 0x632   : > { %2704 = vmatprep.subr.bf16.mxu1 %v5964_v16  ;;  %2745 = vmatprep.subr.bf16.mxu0 %v5967_v17 }
 0x635   : > { %2705 = vmatpush1.bf16.msra.mxu1 %v5970_v19  ;;  %2746 = vmatpush1.bf16.msra.mxu0 %v5973_v20 }
 0x636   : > { %2706 = vmatprep.subr.bf16.mxu1 %v5976_v22  ;;  %2747 = vmatprep.subr.bf16.mxu0 %v5979_v23 }
 0x639   : > { %2707 = vmatpush1.bf16.msra.mxu1 %v5982_v24  ;;  %2748 = vmatpush1.bf16.msra.mxu0 %v5985_v25 }
 0x63a   : > { %2708 = vmatprep.subr.bf16.mxu1 %v5988_v27  ;;  %2749 = vmatprep.subr.bf16.mxu0 %v5991_v28 }
 0x63d   : > { %2709 = vmatpush1.bf16.msra.mxu1 %v5994_v30  ;;  %2750 = vmatpush1.bf16.msra.mxu0 %v5997_v32 }
 0x63e   : > { %2806 = vmatprep.subr.bf16.mxu1 %v6000_v56  ;;  %2847 = vmatprep.subr.bf16.mxu0 %v6003_v14 }
 0x640   : > { %2727 = vmatmul.mubr.bf16.vlgmr.msra.gmra.mxu1 %v2581_v52  ;;  %2768 = vmatmul.mubr.bf16.vlgmr.msra.gmra.mxu0 %v2581_v52  ;;  %v7612_v52 = vld [vmem:[#allocation56_spill] sm:$0xff] }
 0x641   : > { %2807 = vmatpush1.bf16.msra.mxu1 %v6006_v55  ;;  %2848 = vmatpush1.bf16.msra.mxu0 %v6009_v10 }
 0x642   : > { %2808 = vmatprep.subr.bf16.mxu1 %v6012_v13  ;;  %2849 = vmatprep.subr.bf16.mxu0 %v6015_v9 }
 0x645   : > { %2809 = vmatpush1.bf16.msra.mxu1 %v6018_v34  ;;  %2850 = vmatpush1.bf16.msra.mxu0 %v6021_v35 }
 0x646   : > { %2810 = vmatprep.subr.bf16.mxu1 %v6024_v36  ;;  %2851 = vmatprep.subr.bf16.mxu0 %v6027_v41 }
 0x649   : > { %2811 = vmatpush1.bf16.msra.mxu1 %v7580_v38  ;;  %2852 = vmatpush1.bf16.msra.mxu0 %v7581_v7 }
 0x64a   : > { %2812 = vmatprep.subr.bf16.mxu1 %v7582_v26  ;;  %2853 = vmatprep.subr.bf16.mxu0 %v7583_v18 }
 0x64d   : > { %2813 = vmatpush1.bf16.msra.mxu1 %v7584_v2  ;;  %2854 = vmatpush1.bf16.msra.mxu0 %v7585_v4 }
 0x64e   : > { %2814 = vmatprep.subr.bf16.mxu1 %v7586_v33  ;;  %2855 = vmatprep.subr.bf16.mxu0 %v7587_v11 }
 0x651   : > { %2815 = vmatpush1.bf16.msra.mxu1 %v7588_v29  ;;  %2856 = vmatpush1.bf16.msra.mxu0 %v7589_v8 }
 0x652   : > { %2816 = vmatprep.subr.bf16.mxu1 %v7590_v31  ;;  %2857 = vmatprep.subr.bf16.mxu0 %v7591_v50 }
 0x655   : > { %2817 = vmatpush1.bf16.msra.mxu1 %v7592_v54  ;;  %2858 = vmatpush1.bf16.msra.mxu0 %v7593_v47 }
 0x656   : > { %2818 = vmatprep.subr.bf16.mxu1 %v7594_v51  ;;  %2859 = vmatprep.subr.bf16.mxu0 %v7595_v57  ;;  %v7639_v51 = vld [vmem:[#allocation28_spill] sm:$0xff] }
 0x659   : > { %2819 = vmatpush1.bf16.msra.mxu1 %v7596_v42  ;;  %2860 = vmatpush1.bf16.msra.mxu0 %v7597_v15 }
 0x65a   : > { %2820 = vmatprep.subr.bf16.mxu1 %v7598_v37  ;;  %2861 = vmatprep.subr.bf16.mxu0 %v7599_v12 }
 0x65d   : > { %2821 = vmatpush1.bf16.msra.mxu1 %v7600_v48  ;;  %2862 = vmatpush1.bf16.msra.mxu0 %v7601_v21  ;;  %v7636_v21 = vld [vmem:[#allocation25_spill] sm:$0xff] }
 0x65e   : > { %2822 = vmatprep.subr.bf16.mxu1 %v7602_v58  ;;  %2863 = vmatprep.subr.bf16.mxu0 %v7603_v6  ;;  %v7613_v58 = vld [vmem:[#allocation57_spill] sm:$0xff]  ;;  %v7614_v6 = vld [vmem:[#allocation58_spill] sm:$0xff] }
 0x661   : > { %2823 = vmatpush2.bf16.msra.mxu1 %v7604_v53  ;;  %2864 = vmatpush2.bf16.msra.mxu0 %v7605_v39  ;;  %v7615_v53 = vld [vmem:[#allocation59_spill] sm:$0xff]  ;;  %v7616_v39 = vld [vmem:[#allocation60_spill] sm:$0xff] }
 0x662   : > { %2824 = vmatprep.subr.bf16.mxu1 %v7606_v44  ;;  %2865 = vmatprep.subr.bf16.mxu0 %v7607_v40  ;;  %v7617_v44 = vld [vmem:[#allocation61_spill] sm:$0xff]  ;;  %v7618_v40 = vld [vmem:[#allocation62_spill] sm:$0xff] }
 0x665   : > { %2825 = vmatpush2.bf16.msra.mxu1 %v7608_v59  ;;  %2866 = vmatpush2.bf16.msra.mxu0 %v7609_v49  ;;  %v7619_v59 = vld [vmem:[#allocation63_spill] sm:$0xff]  ;;  %v7620_v49 = vld [vmem:[#allocation64_spill] sm:$0xff] }
 0x666   : > { %2826 = vmatprep.subr.bf16.mxu1 %v7610_v43  ;;  %2867 = vmatprep.subr.bf16.mxu0 %v7611_v46  ;;  %v7621_v43 = vld [vmem:[#allocation65_spill] sm:$0xff]  ;;  %v7622_v46 = vld [vmem:[#allocation66_spill] sm:$0xff] }
 0x669   : > { %2827 = vmatpush2.bf16.msra.mxu1 %v7612_v52  ;;  %2868 = vmatpush2.bf16.msra.mxu0 %v7613_v58  ;;  %v7623_v52 = vld [vmem:[#allocation67_spill] sm:$0xff]  ;;  %v7624_v58 = vld [vmem:[#allocation68_spill] sm:$0xff] }
 0x66a   : > { %2828 = vmatprep.subr.bf16.mxu1 %v7614_v6  ;;  %2869 = vmatprep.subr.bf16.mxu0 %v7615_v53  ;;  %v7625_v6 = vld [vmem:[#allocation69_spill] sm:$0xff]  ;;  %v7626_v53 = vld [vmem:[#allocation70_spill] sm:$0xff] }
 0x66d   : > { %2829 = vmatpush2.bf16.msra.mxu1 %v7616_v39  ;;  %2870 = vmatpush2.bf16.msra.mxu0 %v7617_v44  ;;  %v7627_v39 = vld [vmem:[#allocation71_spill] sm:$0xff]  ;;  %v7628_v44 = vld [vmem:[#allocation72_spill] sm:$0xff] }
 0x66e   : > { %2830 = vmatprep.subr.bf16.mxu1 %v7618_v40  ;;  %2871 = vmatprep.subr.bf16.mxu0 %v7619_v59  ;;  %v7629_v40 = vld [vmem:[#allocation73_spill] sm:$0xff]  ;;  %v7630_v59 = vld [vmem:[#allocation74_spill] sm:$0xff] }
 0x671   : > { %2831 = vmatpush2.bf16.msra.mxu1 %v7620_v49  ;;  %2872 = vmatpush2.bf16.msra.mxu0 %v7621_v43  ;;  %v7631_v49 = vld [vmem:[#allocation75_spill] sm:$0xff]  ;;  %v7632_v43 = vld [vmem:[#allocation76_spill] sm:$0xff] }
 0x672   : > { %2832 = vmatprep.subr.bf16.mxu1 %v7622_v46  ;;  %2873 = vmatprep.subr.bf16.mxu0 %v7623_v52  ;;  %v7633_v46 = vld [vmem:[#allocation77_spill] sm:$0xff] }
 0x673   : > { %v7634_v52 = vld [vmem:[#allocation29_spill] sm:$0xff] }
 0x675   : > { %2833 = vmatpush2.bf16.msra.mxu1 %v7624_v58  ;;  %2874 = vmatpush2.bf16.msra.mxu0 %v7625_v6  ;;  %v7635_v58 = vld [vmem:[#allocation30_spill] sm:$0xff] }
 0x676   : > { %2834 = vmatprep.subr.bf16.mxu1 %v7626_v53  ;;  %2875 = vmatprep.subr.bf16.mxu0 %v7627_v39 }
 0x679   : > { %2835 = vmatpush2.bf16.msra.mxu1 %v7628_v44  ;;  %2876 = vmatpush2.bf16.msra.mxu0 %v7629_v40  ;;  %v7637_v40 = vld [vmem:[#allocation26_spill] sm:$0xff] }
 0x67a   : > { %2836 = vmatprep.subr.bf16.mxu1 %v7630_v59  ;;  %2877 = vmatprep.subr.bf16.mxu0 %v7631_v49 }
 0x67d   : > { %2837 = vmatpush2.bf16.msra.mxu1 %v7632_v43  ;;  %2878 = vmatpush2.bf16.msra.mxu0 %v7633_v46  ;;  %v7638_v46 = vld [vmem:[#allocation27_spill] sm:$0xff] }
 0x67e   : > { %2917 = vmatprep.subr.bf16.mxu1 %v7634_v52  ;;  %2958 = vmatprep.subr.bf16.mxu0 %v7635_v58 }
 0x6e0   : > { %v2617_v6 = vpop.f32.mrf.mxu1  ;;  %v2658_v53 = vpop.f32.mrf.mxu0 }
 0x6e1   : > { %v2618_v39 = vadd.f32 %v2617_v6, %v7636_v21  ;;  %v2659_v47 = vadd.f32 %v2658_v53, %v7639_v51 }
 0x6e2   : > { %v2619_v48 = vpop.f32.mrf.mxu1  ;;  %v2660_v44 = vpop.f32.mrf.mxu0 }
 0x6e3   : > { %v4026_v12 = vmul.f32 -1.442695, %v2618_v39  ;;  %v2620_v37 = vadd.f32 %v2619_v48, %v7637_v40  ;;  %v2661_v52 = vadd.f32 %v2660_v44, %v7638_v46  ;;  %v7641_v46 = vld [vmem:[#allocation95_spill] sm:$0xff] }
 0x6e4   : > { %v2621_v59 = vpop.f32.mrf.mxu1  ;;  %v2662_v15 = vpop.f32.mrf.mxu0 }
 0x6e5   : > { %4481 = vpow2.f32 %v4026_v12  ;;  %v4027_v49 = vmul.f32 -1.442695, %v2620_v37  ;;  %v4028_v57 = vmul.f32 -1.442695, %v2661_v52  ;;  %v7640_v37 = vld [vmem:[#allocation93_spill] sm:$0xff] }
 0x6e6   : > { %v2622_v43 = vpop.f32.mrf.mxu1  ;;  %v2663_v42 = vpop.f32.mrf.mxu0 }
 0x6e7   : > { %4483 = vpow2.f32 %v4027_v49 }
 0x6e8   : > { %4485 = vpow2.f32 %v4028_v57 }
 0x6f2   : > { %v4482_v58 = vpop.eup %4481 }
 0x6f3   : > { %v2668_v54 = vadd.f32 1.0, %v4482_v58 }
 0x6f4   : > { %v4484_v6 = vpop.eup %4483 }
 0x6f5   : > { %4487 = vrcp.f32 %v2668_v54  ;;  %v2674_v39 = vadd.f32 1.0, %v4484_v6  ;;  %v4486_v12 = vpop.eup %4485 }
 0x6f6   : > { %4489 = vtanh.f32 %v2659_v47  ;;  %v2681_v58 = vadd.f32 1.0, %v4486_v12 }
 0x6f7   : > { %4491 = vrcp.f32 %v2674_v39 }
 0x700   : > { %v2728_v48 = vpop.f32.mrf.mxu1  ;;  %v2769_v15 = vpop.f32.mrf.mxu0 }
 0x701   : > { %v2776_v59 = vadd.f32 %v2728_v48, %v7640_v37  ;;  %v7642_v37 = vld [vmem:[#allocation96_spill] sm:$0xff] }
 0x702   : > { %v4488_v42 = vpop.eup %4487  ;;  %v2730_v49 = vpop.f32.mrf.mxu1 }
 0x703   : > { %v2771_v43 = vpop.f32.mrf.mxu0  ;;  %v4490_v44 = vpop.eup %4489  ;;  %v4029_v52 = vmul.f32 -1.442695, %v2776_v59  ;;  %v2777_v40 = vadd.f32 %v2730_v49, %v7641_v46  ;;  %v7643_v46 = vld [vmem:[#allocation94_spill] sm:$0xff] }
 0x704   : > { %v4492_v53 = vpop.eup %4491  ;;  %v2732_v51 = vpop.f32.mrf.mxu1  ;;  %v2685_v54 = vmul.f32 %v4490_v44, %v4488_v42  ;;  %v2779_v59 = vadd.f32 %v2771_v43, %v7642_v37  ;;  %v2778_v49 = vadd.f32 %v2769_v15, %v7643_v46 }
 0x705   : > { %v2773_v57 = vpop.f32.mrf.mxu0  ;;  %v2684_v47 = vmul.f32 %v4492_v53, %v6201_v45  ;;  %4493 = vpow2.f32 %v4029_v52  ;;  %v4030_v6 = vmul.f32 -1.442695, %v2777_v40 }
 0x706   : > { %v2733_v39 = vpop.f32.mrf.mxu1  ;;  %v4031_v12 = vmul.f32 -1.442695, %v2779_v59 }
 0x707   : > { %v2774_v21 = vpop.f32.mrf.mxu0  ;;  %4495 = vpow2.f32 %v4030_v6  ;;  %v6315_v48 = vadd.f32 %v2685_v54, %v2684_v47 }
 0x708   : > { %4497 = vrcp.f32 %v2681_v58 }
 0x709   : > { %4499 = vtanh.f32 %v6315_v48 }
 0x70a   : > { %4501 = vtanh.f32 %v2778_v49 }
 0x70b   : > { %4503 = vpow2.f32 %v4031_v12  ;;  %v6324_v12 = vld [vmem:[#allocation7 + $0xe0] ss:$16 sps:$4 sm:$0xff]  }
 0x712   : > { %v4494_v51 = vpop.eup %4493 }
 0x713   : > { %v2783_v57 = vadd.f32 1.0, %v4494_v51  ;;  %v6327_v51 = vld [vmem:[#allocation7 + $0xe8] ss:$16 sps:$4 sm:$0xff]  }
 0x714   : > { %v4496_v42 = vpop.eup %4495 }
 0x715   : > { %v4498_v45 = vpop.eup %4497  ;;  %4505 = vrcp.f32 %v2783_v57  ;;  %v2789_v40 = vadd.f32 1.0, %v4496_v42  ;;  %v6333_v57 = vld [vmem:[#allocation7 + $0xcc] ss:$16 sps:$4 sm:$0xff]   ;;  %v6338_v42 = vld [vmem:[#allocation7 + $0xc0] ss:$16 sps:$4 sm:$0xff]  }
 0x716   : > { %v4500_v21 = vpop.eup %4499 }
 0x717   : > { %4507 = vrcp.f32 %v2789_v40  ;;  %v2688_v44 = vmul.f32 %v4500_v21, %v4498_v45  ;;  %v4502_v53 = vpop.eup %4501  ;;  %v6341_v45 = vld [vmem:[#allocation7 + $0xc8] ss:$16 sps:$4 sm:$0xff]   ;;  %v6344_v40 = vld [vmem:[#allocation7 + $0xa4] ss:$16 sps:$4 sm:$0xff]   ;;  %v6347_v21 = vld [vmem:[#allocation7 + $0xac] ss:$16 sps:$4 sm:$0xff]  }
 0x718   : > { %v4504_v58 = vpop.eup %4503 }
 0x719   : > { %v2805_v52 = vpack.c.bf16 %v2688_v44, %v2688_v44  ;;  %v2796_v47 = vadd.f32 1.0, %v4504_v58  ;;  %v6350_v44 = vld [vmem:[#allocation7 + $0xa0] ss:$16 sps:$4 sm:$0xff]   ;;  %v6359_v58 = vld [vmem:[#allocation7 + $0x8c] ss:$16 sps:$4 sm:$0xff]  }
 0x71b   : > { %2838 = vmatprep.mubr.bf16.mxu1 %v2805_v52  ;;  %2879 = vmatprep.mubr.bf16.mxu0 %v2805_v52  ;;  %4509 = vrcp.f32 %v2796_v47  ;;  %v6353_v52 = vld [vmem:[#allocation7 + $0xa8] ss:$16 sps:$4 sm:$0xff]   ;;  %v6447_v47 = vld [vmem:[#allocation7 + $0xec] ss:$16 sps:$4 sm:$0xff]  }
 0x722   : > { %v4506_v43 = vpop.eup %4505 }
 0x723   : > { %v2800_v54 = vmul.f32 %v4506_v43, %v4502_v53  ;;  %v6356_v53 = vld [vmem:[#allocation7 + $0x84] ss:$16 sps:$4 sm:$0xff]   ;;  %v7684_v43 = vld [vmem:[#allocation76_spill] sm:$0xff] }
 0x724   : > { %v4508_v15 = vpop.eup %4507 }
 0x725   : > { %v2799_v6 = vmul.f32 %v4508_v15, %v6207_v60  ;;  %v6330_v60 = vld [vmem:[#allocation7 + $0xc4] ss:$16 sps:$4 sm:$0xff]  }
 0x726   : > { %v6444_v15 = vld [vmem:[#allocation7 + $0xe4] ss:$16 sps:$4 sm:$0xff]  }
 0x727   : > { %v6321_v39 = vadd.f32 %v2800_v54, %v2799_v6  ;;  %v7685_v54 = vld [vmem:[#allocation77_spill] sm:$0xff] }
 0x728   : > { %v4510_v37 = vpop.eup %4509 }
 0x729   : > { %4511 = vtanh.f32 %v6321_v39 }
 0x736   : > { %v4512_v59 = vpop.eup %4511 }
 0x737   : > { %v2803_v46 = vmul.f32 %v4512_v59, %v4510_v37  ;;  %v7686_v59 = vld [vmem:[#allocation25_spill] sm:$0xff] }
 0x739   : > { %v2804_v49 = vpack.c.bf16 %v2803_v46, %v2803_v46 }
 0x73b   : > { %2839 = vmatmul.mubr.bf16.vlgmr.msra.gmra.mxu1 %v2804_v49  ;;  %2880 = vmatmul.mubr.bf16.vlgmr.msra.gmra.mxu0 %v2804_v49 }
 0x73c   : > { %2918 = vmatpush1.bf16.msra.mxu1 %v6324_v12  ;;  %2959 = vmatpush1.bf16.msra.mxu0 %v6327_v51 }
 0x73d   : > { %2919 = vmatprep.subr.bf16.mxu1 %v6330_v60  ;;  %2960 = vmatprep.subr.bf16.mxu0 %v6333_v57 }
 0x73e   : > { %2949 = vmatprep.mubr.bf16.mxu1 %v7398_v5  ;;  %2990 = vmatprep.mubr.bf16.mxu0 %v7398_v5 }
 0x740   : > { %2920 = vmatpush1.bf16.msra.mxu1 %v6338_v42  ;;  %2961 = vmatpush1.bf16.msra.mxu0 %v6341_v45 }
 0x741   : > { %2921 = vmatprep.subr.bf16.mxu1 %v6344_v40  ;;  %2962 = vmatprep.subr.bf16.mxu0 %v6347_v21 }
 0x744   : > { %2922 = vmatpush1.bf16.msra.mxu1 %v6350_v44  ;;  %2963 = vmatpush1.bf16.msra.mxu0 %v6353_v52 }
 0x745   : > { %2923 = vmatprep.subr.bf16.mxu1 %v6356_v53  ;;  %2964 = vmatprep.subr.bf16.mxu0 %v6359_v58 }
 0x748   : > { %2924 = vmatpush1.bf16.msra.mxu1 %v5946_v3  ;;  %2965 = vmatpush1.bf16.msra.mxu0 %v5949_v61  ;;  %v7644_v3 = vld [vmem:[#allocation82_spill] sm:$0xff]  ;;  %v7645_v61 = vld [vmem:[#allocation37_spill] sm:$0xff] }
 0x749   : > { %2925 = vmatprep.subr.bf16.mxu1 %v5952_v62  ;;  %2966 = vmatprep.subr.bf16.mxu0 %v5955_v63  ;;  %v7646_v62 = vld [vmem:[#allocation38_spill] sm:$0xff]  ;;  %v7647_v63 = vld [vmem:[#allocation39_spill] sm:$0xff] }
 0x74c   : > { %2926 = vmatpush1.bf16.msra.mxu1 %v5958_v0  ;;  %2967 = vmatpush1.bf16.msra.mxu0 %v5961_v1  ;;  %v7648_v0 = vld [vmem:[#allocation40_spill] sm:$0xff]  ;;  %v7649_v1 = vld [vmem:[#allocation41_spill] sm:$0xff] }
 0x74d   : > { %2927 = vmatprep.subr.bf16.mxu1 %v5964_v16  ;;  %2968 = vmatprep.subr.bf16.mxu0 %v5967_v17  ;;  %v7650_v16 = vld [vmem:[#allocation42_spill] sm:$0xff]  ;;  %v7651_v17 = vld [vmem:[#allocation43_spill] sm:$0xff] }
 0x750   : > { %2928 = vmatpush1.bf16.msra.mxu1 %v5970_v19  ;;  %2969 = vmatpush1.bf16.msra.mxu0 %v5973_v20  ;;  %v7652_v19 = vld [vmem:[#allocation44_spill] sm:$0xff]  ;;  %v7653_v20 = vld [vmem:[#allocation45_spill] sm:$0xff] }
 0x751   : > { %2929 = vmatprep.subr.bf16.mxu1 %v5976_v22  ;;  %2970 = vmatprep.subr.bf16.mxu0 %v5979_v23  ;;  %v7654_v22 = vld [vmem:[#allocation46_spill] sm:$0xff]  ;;  %v7655_v23 = vld [vmem:[#allocation47_spill] sm:$0xff] }
 0x754   : > { %2930 = vmatpush1.bf16.msra.mxu1 %v5982_v24  ;;  %2971 = vmatpush1.bf16.msra.mxu0 %v5985_v25  ;;  %v7656_v24 = vld [vmem:[#allocation48_spill] sm:$0xff]  ;;  %v7657_v25 = vld [vmem:[#allocation49_spill] sm:$0xff] }
 0x755   : > { %2931 = vmatprep.subr.bf16.mxu1 %v5988_v27  ;;  %2972 = vmatprep.subr.bf16.mxu0 %v5991_v28  ;;  %v7658_v27 = vld [vmem:[#allocation50_spill] sm:$0xff]  ;;  %v7659_v28 = vld [vmem:[#allocation51_spill] sm:$0xff] }
 0x758   : > { %2932 = vmatpush1.bf16.msra.mxu1 %v5994_v30  ;;  %2973 = vmatpush1.bf16.msra.mxu0 %v5997_v32  ;;  %v7660_v30 = vld [vmem:[#allocation52_spill] sm:$0xff]  ;;  %v7661_v32 = vld [vmem:[#allocation53_spill] sm:$0xff] }
 0x759   : > { %3029 = vmatprep.subr.bf16.mxu1 %v6000_v56  ;;  %3070 = vmatprep.subr.bf16.mxu0 %v6003_v14  ;;  %v7662_v56 = vld [vmem:[#allocation54_spill] sm:$0xff]  ;;  %v7663_v14 = vld [vmem:[#allocation55_spill] sm:$0xff] }
 0x75b   : > { %2950 = vmatmul.mubr.bf16.vlgmr.msra.gmra.mxu1 %v2804_v49  ;;  %2991 = vmatmul.mubr.bf16.vlgmr.msra.gmra.mxu0 %v2804_v49 }
 0x75c   : > { %3030 = vmatpush1.bf16.msra.mxu1 %v6006_v55  ;;  %3071 = vmatpush1.bf16.msra.mxu0 %v6009_v10  ;;  %v7664_v55 = vld [vmem:[#allocation56_spill] sm:$0xff]  ;;  %v7665_v10 = vld [vmem:[#allocation57_spill] sm:$0xff] }
 0x75d   : > { %3031 = vmatprep.subr.bf16.mxu1 %v6012_v13  ;;  %3072 = vmatprep.subr.bf16.mxu0 %v6015_v9  ;;  %v7666_v13 = vld [vmem:[#allocation58_spill] sm:$0xff]  ;;  %v7667_v9 = vld [vmem:[#allocation59_spill] sm:$0xff] }
 0x760   : > { %3032 = vmatpush1.bf16.msra.mxu1 %v6018_v34  ;;  %3073 = vmatpush1.bf16.msra.mxu0 %v6021_v35  ;;  %v7668_v34 = vld [vmem:[#allocation60_spill] sm:$0xff]  ;;  %v7669_v35 = vld [vmem:[#allocation61_spill] sm:$0xff] }
 0x761   : > { %3033 = vmatprep.subr.bf16.mxu1 %v6024_v36  ;;  %3074 = vmatprep.subr.bf16.mxu0 %v6027_v41  ;;  %v7670_v36 = vld [vmem:[#allocation62_spill] sm:$0xff]  ;;  %v7671_v41 = vld [vmem:[#allocation63_spill] sm:$0xff] }
 0x764   : > { %3034 = vmatpush1.bf16.msra.mxu1 %v7580_v38  ;;  %3075 = vmatpush1.bf16.msra.mxu0 %v7581_v7  ;;  %v7672_v38 = vld [vmem:[#allocation64_spill] sm:$0xff]  ;;  %v7673_v7 = vld [vmem:[#allocation65_spill] sm:$0xff] }
 0x765   : > { %3035 = vmatprep.subr.bf16.mxu1 %v7582_v26  ;;  %3076 = vmatprep.subr.bf16.mxu0 %v7583_v18  ;;  %v7674_v26 = vld [vmem:[#allocation66_spill] sm:$0xff]  ;;  %v7675_v18 = vld [vmem:[#allocation67_spill] sm:$0xff] }
 0x768   : > { %3036 = vmatpush1.bf16.msra.mxu1 %v7584_v2  ;;  %3077 = vmatpush1.bf16.msra.mxu0 %v7585_v4  ;;  %v7676_v2 = vld [vmem:[#allocation68_spill] sm:$0xff]  ;;  %v7677_v4 = vld [vmem:[#allocation69_spill] sm:$0xff] }
 0x769   : > { %3037 = vmatprep.subr.bf16.mxu1 %v7586_v33  ;;  %3078 = vmatprep.subr.bf16.mxu0 %v7587_v11  ;;  %v7678_v33 = vld [vmem:[#allocation70_spill] sm:$0xff]  ;;  %v7679_v11 = vld [vmem:[#allocation71_spill] sm:$0xff] }
 0x76c   : > { %3038 = vmatpush1.bf16.msra.mxu1 %v7588_v29  ;;  %3079 = vmatpush1.bf16.msra.mxu0 %v7589_v8  ;;  %v7680_v29 = vld [vmem:[#allocation72_spill] sm:$0xff]  ;;  %v7681_v8 = vld [vmem:[#allocation73_spill] sm:$0xff] }
 0x76d   : > { %3039 = vmatprep.subr.bf16.mxu1 %v7590_v31  ;;  %3080 = vmatprep.subr.bf16.mxu0 %v7591_v50  ;;  %v7682_v31 = vld [vmem:[#allocation74_spill] sm:$0xff]  ;;  %v7683_v50 = vld [vmem:[#allocation75_spill] sm:$0xff] }
 0x770   : > { %3040 = vmatpush1.bf16.msra.mxu1 %v7644_v3  ;;  %3081 = vmatpush1.bf16.msra.mxu0 %v7645_v61 }
 0x771   : > { %3041 = vmatprep.subr.bf16.mxu1 %v7646_v62  ;;  %3082 = vmatprep.subr.bf16.mxu0 %v7647_v63  ;;  %v7687_v62 = vld [vmem:[#allocation26_spill] sm:$0xff] }
 0x774   : > { %3042 = vmatpush1.bf16.msra.mxu1 %v7648_v0  ;;  %3083 = vmatpush1.bf16.msra.mxu0 %v7649_v1 }
 0x775   : > { %3043 = vmatprep.subr.bf16.mxu1 %v7650_v16  ;;  %3084 = vmatprep.subr.bf16.mxu0 %v7651_v17 }
 0x778   : > { %3044 = vmatpush1.bf16.msra.mxu1 %v7652_v19  ;;  %3085 = vmatpush1.bf16.msra.mxu0 %v7653_v20  ;;  %v7688_v20 = vld [vmem:[#allocation27_spill] sm:$0xff] }
 0x779   : > { %3045 = vmatprep.subr.bf16.mxu1 %v7654_v22  ;;  %3086 = vmatprep.subr.bf16.mxu0 %v7655_v23 }
 0x77c   : > { %3046 = vmatpush2.bf16.msra.mxu1 %v7656_v24  ;;  %3087 = vmatpush2.bf16.msra.mxu0 %v7657_v25  ;;  %v7689_v25 = vld [vmem:[#allocation28_spill] sm:$0xff] }
 0x77d   : > { %3047 = vmatprep.subr.bf16.mxu1 %v7658_v27  ;;  %3088 = vmatprep.subr.bf16.mxu0 %v7659_v28 }
 0x780   : > { %3048 = vmatpush2.bf16.msra.mxu1 %v7660_v30  ;;  %3089 = vmatpush2.bf16.msra.mxu0 %v7661_v32 }
 0x781   : > { %3049 = vmatprep.subr.bf16.mxu1 %v7662_v56  ;;  %3090 = vmatprep.subr.bf16.mxu0 %v7663_v14 }
 0x784   : > { %3050 = vmatpush2.bf16.msra.mxu1 %v7664_v55  ;;  %3091 = vmatpush2.bf16.msra.mxu0 %v7665_v10  ;;  %v7690_v10 = vld [vmem:[#allocation97_spill] sm:$0xff] }
 0x785   : > { %3051 = vmatprep.subr.bf16.mxu1 %v7666_v13  ;;  %3092 = vmatprep.subr.bf16.mxu0 %v7667_v9 }
 0x788   : > { %3052 = vmatpush2.bf16.msra.mxu1 %v7668_v34  ;;  %3093 = vmatpush2.bf16.msra.mxu0 %v7669_v35 }
 0x789   : > { %3053 = vmatprep.subr.bf16.mxu1 %v7670_v36  ;;  %3094 = vmatprep.subr.bf16.mxu0 %v7671_v41 }
 0x78c   : > { %3054 = vmatpush2.bf16.msra.mxu1 %v7672_v38  ;;  %3095 = vmatpush2.bf16.msra.mxu0 %v7673_v7  ;;  %v7691_v38 = vld [vmem:[#allocation99_spill] sm:$0xff] }
 0x78d   : > { %3055 = vmatprep.subr.bf16.mxu1 %v7674_v26  ;;  %3096 = vmatprep.subr.bf16.mxu0 %v7675_v18 }
 0x790   : > { %3056 = vmatpush2.bf16.msra.mxu1 %v7676_v2  ;;  %3097 = vmatpush2.bf16.msra.mxu0 %v7677_v4 }
 0x791   : > { %3057 = vmatprep.subr.bf16.mxu1 %v7678_v33  ;;  %3098 = vmatprep.subr.bf16.mxu0 %v7679_v11 }
 0x794   : > { %3058 = vmatpush2.bf16.msra.mxu1 %v7680_v29  ;;  %3099 = vmatpush2.bf16.msra.mxu0 %v7681_v8 }
 0x795   : > { %3059 = vmatprep.subr.bf16.mxu1 %v7682_v31  ;;  %3100 = vmatprep.subr.bf16.mxu0 %v7683_v50 }
 0x798   : > { %3060 = vmatpush2.bf16.msra.mxu1 %v7684_v43  ;;  %3101 = vmatpush2.bf16.msra.mxu0 %v7685_v54  ;;  %v7692_v43 = vld [vmem:[#allocation100_spill] sm:$0xff] }
 0x799   : > { %3140 = vmatprep.subr.bf16.mxu1 %v6444_v15  ;;  %3181 = vmatprep.subr.bf16.mxu0 %v6447_v47 }
 0x7fb   : > { %v2840_v6 = vpop.f32.mrf.mxu1  ;;  %v2881_v37 = vpop.f32.mrf.mxu0 }
 0x7fc   : > { %v2841_v46 = vadd.f32 %v2840_v6, %v7686_v59  ;;  %v2882_v27 = vadd.f32 %v2881_v37, %v7689_v25  ;;  %v7693_v6 = vld [vmem:[#allocation98_spill] sm:$0xff] }
 0x7fd   : > { %v2842_v49 = vpop.f32.mrf.mxu1  ;;  %v2883_v3 = vpop.f32.mrf.mxu0 }
 0x7fe   : > { %v4032_v61 = vmul.f32 -1.442695, %v2841_v46  ;;  %v2843_v63 = vadd.f32 %v2842_v49, %v7687_v62  ;;  %v2884_v22 = vadd.f32 %v2883_v3, %v7688_v20 }
 0x7ff   : > { %v2844_v0 = vpop.f32.mrf.mxu1  ;;  %v2885_v1 = vpop.f32.mrf.mxu0 }
 0x800   : > { %4513 = vpow2.f32 %v4032_v61  ;;  %v4033_v16 = vmul.f32 -1.442695, %v2843_v63  ;;  %v4034_v23 = vmul.f32 -1.442695, %v2884_v22 }
 0x801   : > { %v2845_v17 = vpop.f32.mrf.mxu1  ;;  %v2886_v19 = vpop.f32.mrf.mxu0 }
 0x802   : > { %4515 = vpow2.f32 %v4033_v16 }
 0x803   : > { %4517 = vpow2.f32 %v4034_v23 }
 0x80d   : > { %v4514_v24 = vpop.eup %4513 }
 0x80e   : > { %v2891_v28 = vadd.f32 1.0, %v4514_v24 }
 0x80f   : > { %v4516_v30 = vpop.eup %4515 }
 0x810   : > { %4519 = vrcp.f32 %v2891_v28  ;;  %v2897_v32 = vadd.f32 1.0, %v4516_v30  ;;  %v4518_v55 = vpop.eup %4517 }
 0x811   : > { %4521 = vtanh.f32 %v2882_v27  ;;  %v2904_v18 = vadd.f32 1.0, %v4518_v55 }
 0x812   : > { %4523 = vrcp.f32 %v2897_v32 }
 0x81b   : > { %v2951_v56 = vpop.f32.mrf.mxu1  ;;  %v2992_v14 = vpop.f32.mrf.mxu0 }
 0x81c   : > { %v2999_v13 = vadd.f32 %v2951_v56, %v7690_v10  ;;  %v3001_v37 = vadd.f32 %v2992_v14, %v7693_v6  ;;  %v6483_v10 = vld [vmem:[#allocation7 + $0x88] ss:$16 sps:$4 sm:$0xff]  }
 0x81d   : > { %v4520_v9 = vpop.eup %4519  ;;  %v2953_v34 = vpop.f32.mrf.mxu1  ;;  %v6543_v6 = vld [vmem:[#allocation9 + $0xe8] ss:$16 sps:$4 sm:$0xff]  }
 0x81e   : > { %v2994_v35 = vpop.f32.mrf.mxu0  ;;  %v4522_v36 = vpop.eup %4521  ;;  %v4035_v41 = vmul.f32 -1.442695, %v2999_v13  ;;  %v3000_v7 = vadd.f32 %v2953_v34, %v7691_v38  ;;  %v6486_v13 = vld [vmem:[#allocation7 + $0x64] ss:$16 sps:$4 sm:$0xff]   ;;  %v6492_v34 = vld [vmem:[#allocation7 + $0x60] ss:$16 sps:$4 sm:$0xff]  }
 0x81f   : > { %v4524_v26 = vpop.eup %4523  ;;  %v2955_v2 = vpop.f32.mrf.mxu1  ;;  %v2908_v33 = vmul.f32 %v4522_v36, %v4520_v9  ;;  %v3002_v54 = vadd.f32 %v2994_v35, %v7692_v43  ;;  %v6489_v9 = vld [vmem:[#allocation7 + $0x6c] ss:$16 sps:$4 sm:$0xff]   ;;  %v6495_v35 = vld [vmem:[#allocation7 + $0x68] ss:$16 sps:$4 sm:$0xff]   ;;  %v6498_v36 = vld [vmem:[#allocation7 + $0x44] ss:$16 sps:$4 sm:$0xff]  }
 0x820   : > { %v2996_v4 = vpop.f32.mrf.mxu0  ;;  %v2907_v11 = vmul.f32 %v4524_v26, %v6315_v48  ;;  %4525 = vpow2.f32 %v4035_v41  ;;  %v4036_v29 = vmul.f32 -1.442695, %v3000_v7  ;;  %v6501_v41 = vld [vmem:[#allocation7 + $0x4c] ss:$16 sps:$4 sm:$0xff]   ;;  %v6504_v38 = vld [vmem:[#allocation7 + $0x40] ss:$16 sps:$4 sm:$0xff]  }
 0x821   : > { %v2956_v8 = vpop.f32.mrf.mxu1  ;;  %v4037_v46 = vmul.f32 -1.442695, %v3002_v54  ;;  %v6507_v7 = vld [vmem:[#allocation7 + $0x48] ss:$16 sps:$4 sm:$0xff]   ;;  %v6510_v26 = vld [vmem:[#allocation7 + $0x24] ss:$16 sps:$4 sm:$0xff]  }
 0x822   : > { %v2997_v31 = vpop.f32.mrf.mxu0  ;;  %4527 = vpow2.f32 %v4036_v29  ;;  %v6457_v50 = vadd.f32 %v2908_v33, %v2907_v11  ;;  %v6516_v2 = vld [vmem:[#allocation7 + $0x20] ss:$16 sps:$4 sm:$0xff]   ;;  %v6519_v4 = vld [vmem:[#allocation7 + $0x28] ss:$16 sps:$4 sm:$0xff]   ;;  %v6522_v33 = vld [vmem:[#allocation7 + $0x4] ss:$16 sps:$4 sm:$0xff]  }
 0x823   : > { %4529 = vrcp.f32 %v2904_v18  ;;  %v6513_v18 = vld [vmem:[#allocation7 + $0x2c] ss:$16 sps:$4 sm:$0xff]   ;;  %v6528_v29 = vld [vmem:[#allocation7] ss:$16 sps:$4 sm:$0xff]   ;;  %v6531_v8 = vld [vmem:[#allocation7 + $0x8] ss:$16 sps:$4 sm:$0xff]  }
 0x824   : > { %4531 = vtanh.f32 %v6457_v50  ;;  %v6525_v11 = vld [vmem:[#allocation7 + $0xc] ss:$16 sps:$4 sm:$0xff]   ;;  %v6534_v31 = vld [vmem:[#allocation9 + $0xe4] ss:$16 sps:$4 sm:$0xff]   ;;  %v6540_v54 = vld [vmem:[#allocation9 + $0xe0] ss:$16 sps:$4 sm:$0xff]  }
 0x825   : > { %4533 = vtanh.f32 %v3001_v37  ;;  %v6537_v43 = vld [vmem:[#allocation9 + $0xec] ss:$16 sps:$4 sm:$0xff]   ;;  %v6546_v37 = vld [vmem:[#allocation9 + $0xc4] ss:$16 sps:$4 sm:$0xff]  }
 0x826   : > { %4535 = vpow2.f32 %v4037_v46  ;;  %v6549_v46 = vld [vmem:[#allocation9 + $0xcc] ss:$16 sps:$4 sm:$0xff]  }
 0x82d   : > { %v4526_v49 = vpop.eup %4525 }
 0x82e   : > { %v3006_v3 = vadd.f32 1.0, %v4526_v49  ;;  %v6552_v49 = vld [vmem:[#allocation9 + $0xc0] ss:$16 sps:$4 sm:$0xff]  }
 0x82f   : > { %v4528_v61 = vpop.eup %4527 }
 0x830   : > { %v4530_v48 = vpop.eup %4529  ;;  %4537 = vrcp.f32 %v3006_v3  ;;  %v3012_v63 = vadd.f32 1.0, %v4528_v61  ;;  %v6555_v3 = vld [vmem:[#allocation9 + $0xc8] ss:$16 sps:$4 sm:$0xff]   ;;  %v6558_v61 = vld [vmem:[#allocation9 + $0xa4] ss:$16 sps:$4 sm:$0xff]  }
 0x831   : > { %v4532_v0 = vpop.eup %4531 }
 0x832   : > { %4539 = vrcp.f32 %v3012_v63  ;;  %v2911_v1 = vmul.f32 %v4532_v0, %v4530_v48  ;;  %v4534_v17 = vpop.eup %4533  ;;  %v6561_v48 = vld [vmem:[#allocation9 + $0xac] ss:$16 sps:$4 sm:$0xff]   ;;  %v6564_v63 = vld [vmem:[#allocation9 + $0xa0] ss:$16 sps:$4 sm:$0xff]   ;;  %v6567_v0 = vld [vmem:[#allocation9 + $0xa8] ss:$16 sps:$4 sm:$0xff]  }
 0x833   : > { %v4536_v19 = vpop.eup %4535  ;;  %7694 = vst [vmem:[#allocation78_spill] sm:$0xff] %v6564_v63  ;;  %7695 = vst [vmem:[#allocation79_spill] sm:$0xff] %v6567_v0 }
 0x834   : > { %v3028_v16 = vpack.c.bf16 %v2911_v1, %v2911_v1  ;;  %v3019_v27 = vadd.f32 1.0, %v4536_v19  ;;  %v6570_v1 = vld [vmem:[#allocation9 + $0x84] ss:$16 sps:$4 sm:$0xff]   ;;  %v6579_v19 = vld [vmem:[#allocation9 + $0x88] ss:$16 sps:$4 sm:$0xff]  }
 0x835   : > { %7696 = vst [vmem:[#allocation85_spill] sm:$0xff] %v6570_v1  ;;  %7699 = vst [vmem:[#allocation86_spill] sm:$0xff] %v6579_v19 }
 0x836   : > { %3061 = vmatprep.mubr.bf16.mxu1 %v3028_v16  ;;  %3102 = vmatprep.mubr.bf16.mxu0 %v3028_v16  ;;  %4541 = vrcp.f32 %v3019_v27  ;;  %v6573_v16 = vld [vmem:[#allocation9 + $0x8c] ss:$16 sps:$4 sm:$0xff]   ;;  %v6591_v27 = vld [vmem:[#allocation9 + $0x68] ss:$16 sps:$4 sm:$0xff]  }
 0x837   : > { %7697 = vst [vmem:[#allocation87_spill] sm:$0xff] %v6573_v16  ;;  %7703 = vst [vmem:[#allocation90_spill] sm:$0xff] %v6591_v27 }
 0x83d   : > { %v4538_v22 = vpop.eup %4537 }
 0x83e   : > { %v3023_v23 = vmul.f32 %v4538_v22, %v4534_v17  ;;  %v6576_v17 = vld [vmem:[#allocation9 + $0x80] ss:$16 sps:$4 sm:$0xff]   ;;  %v6582_v22 = vld [vmem:[#allocation9 + $0x64] ss:$16 sps:$4 sm:$0xff]  }
 0x83f   : > { %v4540_v24 = vpop.eup %4539  ;;  %7698 = vst [vmem:[#allocation88_spill] sm:$0xff] %v6576_v17  ;;  %7700 = vst [vmem:[#allocation89_spill] sm:$0xff] %v6582_v22 }
 0x840   : > { %v3022_v28 = vmul.f32 %v4540_v24, %v6321_v39  ;;  %v6480_v39 = vld [vmem:[#allocation7 + $0x80] ss:$16 sps:$4 sm:$0xff]  }
 0x841   : > { %v6588_v24 = vld [vmem:[#allocation9 + $0x60] ss:$16 sps:$4 sm:$0xff]  }
 0x842   : > { %v6463_v30 = vadd.f32 %v3023_v23, %v3022_v28  ;;  %v6585_v23 = vld [vmem:[#allocation9 + $0x6c] ss:$16 sps:$4 sm:$0xff]   ;;  %7702 = vst [vmem:[#allocation92_spill] sm:$0xff] %v6588_v24  ;;  %v6594_v28 = vld [vmem:[#allocation9 + $0x44] ss:$16 sps:$4 sm:$0xff]  }
 0x843   : > { %v4542_v32 = vpop.eup %4541  ;;  %7701 = vst [vmem:[#allocation91_spill] sm:$0xff] %v6585_v23  ;;  %7704 = vst [vmem:[#allocation31_spill] sm:$0xff] %v6594_v28 }
 0x844   : > { %4543 = vtanh.f32 %v6463_v30 }
 0x851   : > { %v4544_v56 = vpop.eup %4543 }
 0x852   : > { %v3026_v14 = vmul.f32 %v4544_v56, %v4542_v32  ;;  %v6597_v32 = vld [vmem:[#allocation9 + $0x4c] ss:$16 sps:$4 sm:$0xff]   ;;  %v6600_v56 = vld [vmem:[#allocation9 + $0x40] ss:$16 sps:$4 sm:$0xff]  }
 0x853   : > { %7705 = vst [vmem:[#allocation32_spill] sm:$0xff] %v6597_v32  ;;  %7706 = vst [vmem:[#allocation33_spill] sm:$0xff] %v6600_v56 }
 0x854   : > { %v3027_v55 = vpack.c.bf16 %v3026_v14, %v3026_v14  ;;  %v6603_v14 = vld [vmem:[#allocation9 + $0x48] ss:$16 sps:$4 sm:$0xff]  }
 0x855   : > { %7707 = vst [vmem:[#allocation34_spill] sm:$0xff] %v6603_v14 }
 0x856   : > { %3062 = vmatmul.mubr.bf16.vlgmr.msra.gmra.mxu1 %v3027_v55  ;;  %3103 = vmatmul.mubr.bf16.vlgmr.msra.gmra.mxu0 %v3027_v55 }
 0x857   : > { %3141 = vmatpush1.bf16.msra.mxu1 %v6324_v12  ;;  %3182 = vmatpush1.bf16.msra.mxu0 %v6327_v51 }
 0x858   : > { %3142 = vmatprep.subr.bf16.mxu1 %v6330_v60  ;;  %3183 = vmatprep.subr.bf16.mxu0 %v6333_v57 }
 0x859   : > { %3172 = vmatprep.mubr.bf16.mxu1 %v7398_v5  ;;  %3213 = vmatprep.mubr.bf16.mxu0 %v7398_v5 }
 0x85b   : > { %3143 = vmatpush1.bf16.msra.mxu1 %v6338_v42  ;;  %3184 = vmatpush1.bf16.msra.mxu0 %v6341_v45 }
 0x85c   : > { %3144 = vmatprep.subr.bf16.mxu1 %v6344_v40  ;;  %3185 = vmatprep.subr.bf16.mxu0 %v6347_v21 }
 0x85f   : > { %3145 = vmatpush1.bf16.msra.mxu1 %v6350_v44  ;;  %3186 = vmatpush1.bf16.msra.mxu0 %v6353_v52 }
 0x860   : > { %3146 = vmatprep.subr.bf16.mxu1 %v6356_v53  ;;  %3187 = vmatprep.subr.bf16.mxu0 %v6359_v58 }
 0x863   : > { %3147 = vmatpush1.bf16.msra.mxu1 %v6480_v39  ;;  %3188 = vmatpush1.bf16.msra.mxu0 %v6483_v10 }
 0x864   : > { %3148 = vmatprep.subr.bf16.mxu1 %v6486_v13  ;;  %3189 = vmatprep.subr.bf16.mxu0 %v6489_v9 }
 0x867   : > { %3149 = vmatpush1.bf16.msra.mxu1 %v6492_v34  ;;  %3190 = vmatpush1.bf16.msra.mxu0 %v6495_v35 }
 0x868   : > { %3150 = vmatprep.subr.bf16.mxu1 %v6498_v36  ;;  %3191 = vmatprep.subr.bf16.mxu0 %v6501_v41 }
 0x86b   : > { %3151 = vmatpush1.bf16.msra.mxu1 %v6504_v38  ;;  %3192 = vmatpush1.bf16.msra.mxu0 %v6507_v7 }
 0x86c   : > { %3152 = vmatprep.subr.bf16.mxu1 %v6510_v26  ;;  %3193 = vmatprep.subr.bf16.mxu0 %v6513_v18 }
 0x86f   : > { %3153 = vmatpush1.bf16.msra.mxu1 %v6516_v2  ;;  %3194 = vmatpush1.bf16.msra.mxu0 %v6519_v4 }
 0x870   : > { %3154 = vmatprep.subr.bf16.mxu1 %v6522_v33  ;;  %3195 = vmatprep.subr.bf16.mxu0 %v6525_v11 }
 0x873   : > { %3155 = vmatpush1.bf16.msra.mxu1 %v6528_v29  ;;  %3196 = vmatpush1.bf16.msra.mxu0 %v6531_v8 }
 0x874   : > { %3252 = vmatprep.subr.bf16.mxu1 %v6534_v31  ;;  %3293 = vmatprep.subr.bf16.mxu0 %v6537_v43 }
 0x876   : > { %3173 = vmatmul.mubr.bf16.vlgmr.msra.gmra.mxu1 %v3027_v55  ;;  %3214 = vmatmul.mubr.bf16.vlgmr.msra.gmra.mxu0 %v3027_v55  ;;  %v6606_v55 = vld [vmem:[#allocation9 + $0x24] ss:$16 sps:$4 sm:$0xff]  }
 0x877   : > { %3253 = vmatpush1.bf16.msra.mxu1 %v6540_v54  ;;  %3294 = vmatpush1.bf16.msra.mxu0 %v6543_v6  ;;  %7708 = vst [vmem:[#allocation35_spill] sm:$0xff] %v6606_v55 }
 0x878   : > { %3254 = vmatprep.subr.bf16.mxu1 %v6546_v37  ;;  %3295 = vmatprep.subr.bf16.mxu0 %v6549_v46 }
 0x87b   : > { %3255 = vmatpush1.bf16.msra.mxu1 %v6552_v49  ;;  %3296 = vmatpush1.bf16.msra.mxu0 %v6555_v3 }
 0x87c   : > { %3256 = vmatprep.subr.bf16.mxu1 %v6558_v61  ;;  %3297 = vmatprep.subr.bf16.mxu0 %v6561_v48 }
 0x87f   : > { %3257 = vmatpush1.bf16.msra.mxu1 %v6564_v63  ;;  %3298 = vmatpush1.bf16.msra.mxu0 %v6567_v0 }
 0x880   : > { %3258 = vmatprep.subr.bf16.mxu1 %v6570_v1  ;;  %3299 = vmatprep.subr.bf16.mxu0 %v6573_v16 }
 0x883   : > { %3259 = vmatpush1.bf16.msra.mxu1 %v6576_v17  ;;  %3300 = vmatpush1.bf16.msra.mxu0 %v6579_v19 }
 0x884   : > { %3260 = vmatprep.subr.bf16.mxu1 %v6582_v22  ;;  %3301 = vmatprep.subr.bf16.mxu0 %v6585_v23 }
 0x887   : > { %3261 = vmatpush1.bf16.msra.mxu1 %v6588_v24  ;;  %3302 = vmatpush1.bf16.msra.mxu0 %v6591_v27  ;;  %v6609_v27 = vld [vmem:[#allocation9 + $0x2c] ss:$16 sps:$4 sm:$0xff]  }
 0x888   : > { %3262 = vmatprep.subr.bf16.mxu1 %v6594_v28  ;;  %3303 = vmatprep.subr.bf16.mxu0 %v6597_v32  ;;  %7709 = vst [vmem:[#allocation36_spill] sm:$0xff] %v6609_v27  ;;  %v6612_v28 = vld [vmem:[#allocation9 + $0x20] ss:$16 sps:$4 sm:$0xff]   ;;  %v6615_v32 = vld [vmem:[#allocation9 + $0x28] ss:$16 sps:$4 sm:$0xff]  }
 0x889   : > { %7710 = vst [vmem:[#allocation23_spill] sm:$0xff] %v6612_v28  ;;  %7711 = vst [vmem:[#allocation24_spill] sm:$0xff] %v6615_v32 }
 0x88b   : > { %3263 = vmatpush1.bf16.msra.mxu1 %v6600_v56  ;;  %3304 = vmatpush1.bf16.msra.mxu0 %v6603_v14  ;;  %v6618_v56 = vld [vmem:[#allocation9 + $0x4] ss:$16 sps:$4 sm:$0xff]   ;;  %v6621_v14 = vld [vmem:[#allocation9 + $0xc] ss:$16 sps:$4 sm:$0xff]  }
 0x88c   : > { %3264 = vmatprep.subr.bf16.mxu1 %v6606_v55  ;;  %3305 = vmatprep.subr.bf16.mxu0 %v6609_v27  ;;  %7712 = vst [vmem:[#allocation80_spill] sm:$0xff] %v6618_v56  ;;  %7713 = vst [vmem:[#allocation81_spill] sm:$0xff] %v6621_v14  ;;  %v6624_v55 = vld [vmem:[#allocation9] ss:$16 sps:$4 sm:$0xff]   ;;  %v6627_v27 = vld [vmem:[#allocation9 + $0x8] ss:$16 sps:$4 sm:$0xff]  }
 0x88d   : > { %7714 = vst [vmem:[#allocation83_spill] sm:$0xff] %v6624_v55  ;;  %7715 = vst [vmem:[#allocation84_spill] sm:$0xff] %v6627_v27 }
 0x88f   : > { %3265 = vmatpush1.bf16.msra.mxu1 %v6612_v28  ;;  %3306 = vmatpush1.bf16.msra.mxu0 %v6615_v32  ;;  %v6630_v28 = vld [vmem:[#allocation9 + $0x1e4] ss:$16 sps:$4 sm:$0xff]   ;;  %v6633_v32 = vld [vmem:[#allocation9 + $0x1ec] ss:$16 sps:$4 sm:$0xff]  }
 0x890   : > { %3266 = vmatprep.subr.bf16.mxu1 %v6618_v56  ;;  %3307 = vmatprep.subr.bf16.mxu0 %v6621_v14  ;;  %7716 = vst [vmem:[#allocation29_spill] sm:$0xff] %v6630_v28  ;;  %7717 = vst [vmem:[#allocation30_spill] sm:$0xff] %v6633_v32  ;;  %v6636_v56 = vld [vmem:[#allocation9 + $0x1e0] ss:$16 sps:$4 sm:$0xff]   ;;  %v6639_v14 = vld [vmem:[#allocation9 + $0x1e8] ss:$16 sps:$4 sm:$0xff]  }
 0x891   : > { %7718 = vst [vmem:[#allocation93_spill] sm:$0xff] %v6636_v56  ;;  %7719 = vst [vmem:[#allocation95_spill] sm:$0xff] %v6639_v14 }
 0x893   : > { %3267 = vmatpush1.bf16.msra.mxu1 %v6624_v55  ;;  %3308 = vmatpush1.bf16.msra.mxu0 %v6627_v27  ;;  %v6642_v55 = vld [vmem:[#allocation9 + $0x1c4] ss:$16 sps:$4 sm:$0xff]   ;;  %v6645_v27 = vld [vmem:[#allocation9 + $0x1cc] ss:$16 sps:$4 sm:$0xff]  }
 0x894   : > { %3268 = vmatprep.subr.bf16.mxu1 %v6630_v28  ;;  %3309 = vmatprep.subr.bf16.mxu0 %v6633_v32  ;;  %7720 = vst [vmem:[#allocation96_spill] sm:$0xff] %v6642_v55  ;;  %7721 = vst [vmem:[#allocation94_spill] sm:$0xff] %v6645_v27  ;;  %v6648_v28 = vld [vmem:[#allocation9 + $0x1c0] ss:$16 sps:$4 sm:$0xff]   ;;  %v6651_v32 = vld [vmem:[#allocation9 + $0x1c8] ss:$16 sps:$4 sm:$0xff]  }
 0x895   : > { %7722 = vst [vmem:[#allocation82_spill] sm:$0xff] %v6648_v28  ;;  %7723 = vst [vmem:[#allocation37_spill] sm:$0xff] %v6651_v32 }
 0x897   : > { %3269 = vmatpush2.bf16.msra.mxu1 %v6636_v56  ;;  %3310 = vmatpush2.bf16.msra.mxu0 %v6639_v14  ;;  %v6654_v56 = vld [vmem:[#allocation9 + $0x1a4] ss:$16 sps:$4 sm:$0xff]   ;;  %v6657_v14 = vld [vmem:[#allocation9 + $0x1ac] ss:$16 sps:$4 sm:$0xff]  }
 0x898   : > { %3270 = vmatprep.subr.bf16.mxu1 %v6642_v55  ;;  %3311 = vmatprep.subr.bf16.mxu0 %v6645_v27  ;;  %7724 = vst [vmem:[#allocation38_spill] sm:$0xff] %v6654_v56  ;;  %7725 = vst [vmem:[#allocation39_spill] sm:$0xff] %v6657_v14  ;;  %v6660_v55 = vld [vmem:[#allocation9 + $0x1a0] ss:$16 sps:$4 sm:$0xff]   ;;  %v6663_v27 = vld [vmem:[#allocation9 + $0x1a8] ss:$16 sps:$4 sm:$0xff]  }
 0x899   : > { %7726 = vst [vmem:[#allocation40_spill] sm:$0xff] %v6660_v55  ;;  %7727 = vst [vmem:[#allocation41_spill] sm:$0xff] %v6663_v27 }
 0x89b   : > { %3271 = vmatpush2.bf16.msra.mxu1 %v6648_v28  ;;  %3312 = vmatpush2.bf16.msra.mxu0 %v6651_v32  ;;  %v6666_v28 = vld [vmem:[#allocation9 + $0x184] ss:$16 sps:$4 sm:$0xff]   ;;  %v6669_v32 = vld [vmem:[#allocation9 + $0x18c] ss:$16 sps:$4 sm:$0xff]  }
 0x89c   : > { %3272 = vmatprep.subr.bf16.mxu1 %v6654_v56  ;;  %3313 = vmatprep.subr.bf16.mxu0 %v6657_v14  ;;  %7728 = vst [vmem:[#allocation42_spill] sm:$0xff] %v6666_v28  ;;  %7729 = vst [vmem:[#allocation43_spill] sm:$0xff] %v6669_v32  ;;  %v6672_v56 = vld [vmem:[#allocation9 + $0x180] ss:$16 sps:$4 sm:$0xff]   ;;  %v6675_v14 = vld [vmem:[#allocation9 + $0x188] ss:$16 sps:$4 sm:$0xff]  }
 0x89d   : > { %7730 = vst [vmem:[#allocation44_spill] sm:$0xff] %v6672_v56  ;;  %7731 = vst [vmem:[#allocation45_spill] sm:$0xff] %v6675_v14 }
 0x89f   : > { %3273 = vmatpush2.bf16.msra.mxu1 %v6660_v55  ;;  %3314 = vmatpush2.bf16.msra.mxu0 %v6663_v27  ;;  %v6678_v55 = vld [vmem:[#allocation9 + $0x164] ss:$16 sps:$4 sm:$0xff]   ;;  %v6681_v27 = vld [vmem:[#allocation9 + $0x16c] ss:$16 sps:$4 sm:$0xff]  }
 0x8a0   : > { %3274 = vmatprep.subr.bf16.mxu1 %v6666_v28  ;;  %3315 = vmatprep.subr.bf16.mxu0 %v6669_v32  ;;  %7732 = vst [vmem:[#allocation46_spill] sm:$0xff] %v6678_v55  ;;  %7733 = vst [vmem:[#allocation47_spill] sm:$0xff] %v6681_v27  ;;  %v6684_v28 = vld [vmem:[#allocation9 + $0x160] ss:$16 sps:$4 sm:$0xff]   ;;  %v6687_v32 = vld [vmem:[#allocation9 + $0x168] ss:$16 sps:$4 sm:$0xff]  }
 0x8a1   : > { %7734 = vst [vmem:[#allocation48_spill] sm:$0xff] %v6684_v28  ;;  %7735 = vst [vmem:[#allocation49_spill] sm:$0xff] %v6687_v32 }
 0x8a3   : > { %3275 = vmatpush2.bf16.msra.mxu1 %v6672_v56  ;;  %3316 = vmatpush2.bf16.msra.mxu0 %v6675_v14  ;;  %v6690_v56 = vld [vmem:[#allocation9 + $0x144] ss:$16 sps:$4 sm:$0xff]   ;;  %v6693_v14 = vld [vmem:[#allocation9 + $0x14c] ss:$16 sps:$4 sm:$0xff]  }
 0x8a4   : > { %3276 = vmatprep.subr.bf16.mxu1 %v6678_v55  ;;  %3317 = vmatprep.subr.bf16.mxu0 %v6681_v27  ;;  %7736 = vst [vmem:[#allocation50_spill] sm:$0xff] %v6690_v56  ;;  %7737 = vst [vmem:[#allocation51_spill] sm:$0xff] %v6693_v14  ;;  %v6696_v55 = vld [vmem:[#allocation9 + $0x140] ss:$16 sps:$4 sm:$0xff]   ;;  %v6699_v27 = vld [vmem:[#allocation9 + $0x148] ss:$16 sps:$4 sm:$0xff]  }
 0x8a5   : > { %7738 = vst [vmem:[#allocation52_spill] sm:$0xff] %v6696_v55  ;;  %7739 = vst [vmem:[#allocation53_spill] sm:$0xff] %v6699_v27 }
 0x8a7   : > { %3277 = vmatpush2.bf16.msra.mxu1 %v6684_v28  ;;  %3318 = vmatpush2.bf16.msra.mxu0 %v6687_v32  ;;  %v6702_v28 = vld [vmem:[#allocation9 + $0x124] ss:$16 sps:$4 sm:$0xff]   ;;  %v6705_v32 = vld [vmem:[#allocation9 + $0x12c] ss:$16 sps:$4 sm:$0xff]  }
 0x8a8   : > { %3278 = vmatprep.subr.bf16.mxu1 %v6690_v56  ;;  %3319 = vmatprep.subr.bf16.mxu0 %v6693_v14  ;;  %7740 = vst [vmem:[#allocation54_spill] sm:$0xff] %v6702_v28  ;;  %7741 = vst [vmem:[#allocation55_spill] sm:$0xff] %v6705_v32  ;;  %v6708_v56 = vld [vmem:[#allocation9 + $0x120] ss:$16 sps:$4 sm:$0xff]   ;;  %v6711_v14 = vld [vmem:[#allocation9 + $0x128] ss:$16 sps:$4 sm:$0xff]  }
 0x8a9   : > { %7742 = vst [vmem:[#allocation56_spill] sm:$0xff] %v6708_v56  ;;  %7743 = vst [vmem:[#allocation57_spill] sm:$0xff] %v6711_v14 }
 0x8ab   : > { %3279 = vmatpush2.bf16.msra.mxu1 %v6696_v55  ;;  %3320 = vmatpush2.bf16.msra.mxu0 %v6699_v27  ;;  %v6714_v55 = vld [vmem:[#allocation9 + $0x104] ss:$16 sps:$4 sm:$0xff]   ;;  %v6717_v27 = vld [vmem:[#allocation9 + $0x10c] ss:$16 sps:$4 sm:$0xff]  }
 0x8ac   : > { %3280 = vmatprep.subr.bf16.mxu1 %v6702_v28  ;;  %3321 = vmatprep.subr.bf16.mxu0 %v6705_v32  ;;  %7744 = vst [vmem:[#allocation58_spill] sm:$0xff] %v6714_v55  ;;  %7745 = vst [vmem:[#allocation59_spill] sm:$0xff] %v6717_v27  ;;  %v6720_v28 = vld [vmem:[#allocation9 + $0x100] ss:$16 sps:$4 sm:$0xff]   ;;  %v6723_v32 = vld [vmem:[#allocation9 + $0x108] ss:$16 sps:$4 sm:$0xff]  }
 0x8ad   : > { %7746 = vst [vmem:[#allocation60_spill] sm:$0xff] %v6720_v28  ;;  %7747 = vst [vmem:[#allocation61_spill] sm:$0xff] %v6723_v32 }
 0x8af   : > { %3281 = vmatpush2.bf16.msra.mxu1 %v6708_v56  ;;  %3322 = vmatpush2.bf16.msra.mxu0 %v6711_v14 }
 0x8b0   : > { %3282 = vmatprep.subr.bf16.mxu1 %v6714_v55  ;;  %3323 = vmatprep.subr.bf16.mxu0 %v6717_v27 }
 0x8b3   : > { %3283 = vmatpush2.bf16.msra.mxu1 %v6720_v28  ;;  %3324 = vmatpush2.bf16.msra.mxu0 %v6723_v32 }
 0x8b4   : > { %3363 = vmatprep.subr.bf16.mxu1 %v6444_v15  ;;  %3404 = vmatprep.subr.bf16.mxu0 %v6447_v47 }
 0x916   : > { %v3063_v14 = vpop.f32.mrf.mxu1  ;;  %v3104_v56 = vpop.f32.mrf.mxu0 }
 0x917   : > { %v3064_v55 = vadd.f32 %v3063_v14, %v7686_v59  ;;  %v3105_v0 = vadd.f32 %v3104_v56, %v7689_v25 }
 0x918   : > { %v3065_v24 = vpop.f32.mrf.mxu1  ;;  %v3106_v23 = vpop.f32.mrf.mxu0 }
 0x919   : > { %v4038_v22 = vmul.f32 -1.442695, %v3064_v55  ;;  %v3066_v27 = vadd.f32 %v3065_v24, %v7687_v62  ;;  %v3107_v15 = vadd.f32 %v3106_v23, %v7688_v20  ;;  %v7748_v24 = vld [vmem:[#allocation101_spill] sm:$0xff]  ;;  %v7749_v20 = vld [vmem:[#allocation103_spill] sm:$0xff] }
 0x91a   : > { %v3067_v19 = vpop.f32.mrf.mxu1  ;;  %v3108_v17 = vpop.f32.mrf.mxu0 }
 0x91b   : > { %4545 = vpow2.f32 %v4038_v22  ;;  %v4039_v28 = vmul.f32 -1.442695, %v3066_v27  ;;  %v4040_v32 = vmul.f32 -1.442695, %v3107_v15 }
 0x91c   : > { %v3068_v16 = vpop.f32.mrf.mxu1  ;;  %v3109_v1 = vpop.f32.mrf.mxu0 }
 0x91d   : > { %4547 = vpow2.f32 %v4039_v28 }
 0x91e   : > { %4549 = vpow2.f32 %v4040_v32 }
 0x928   : > { %v4546_v47 = vpop.eup %4545 }
 0x929   : > { %v3114_v63 = vadd.f32 1.0, %v4546_v47 }
 0x92a   : > { %v4548_v14 = vpop.eup %4547 }
 0x92b   : > { %4551 = vrcp.f32 %v3114_v63  ;;  %v3120_v55 = vadd.f32 1.0, %v4548_v14  ;;  %v4550_v22 = vpop.eup %4549 }
 0x92c   : > { %4553 = vtanh.f32 %v3105_v0  ;;  %v3127_v47 = vadd.f32 1.0, %v4550_v22 }
 0x92d   : > { %4555 = vrcp.f32 %v3120_v55 }
 0x936   : > { %v3174_v19 = vpop.f32.mrf.mxu1  ;;  %v3215_v17 = vpop.f32.mrf.mxu0 }
 0x937   : > { %v3222_v16 = vadd.f32 %v3174_v19, %v7748_v24  ;;  %v7750_v24 = vld [vmem:[#allocation104_spill] sm:$0xff] }
 0x938   : > { %v4552_v1 = vpop.eup %4551  ;;  %v3176_v27 = vpop.f32.mrf.mxu1 }
 0x939   : > { %v3217_v28 = vpop.f32.mrf.mxu0  ;;  %v4554_v23 = vpop.eup %4553  ;;  %v4041_v15 = vmul.f32 -1.442695, %v3222_v16  ;;  %v3223_v62 = vadd.f32 %v3176_v27, %v7749_v20  ;;  %v7751_v20 = vld [vmem:[#allocation102_spill] sm:$0xff] }
 0x93a   : > { %v4556_v56 = vpop.eup %4555  ;;  %v3178_v25 = vpop.f32.mrf.mxu1  ;;  %v3131_v63 = vmul.f32 %v4554_v23, %v4552_v1  ;;  %v3225_v16 = vadd.f32 %v3217_v28, %v7750_v24  ;;  %v3224_v27 = vadd.f32 %v3215_v17, %v7751_v20 }
 0x93b   : > { %v3219_v32 = vpop.f32.mrf.mxu0  ;;  %v3130_v0 = vmul.f32 %v4556_v56, %v6457_v50  ;;  %4557 = vpow2.f32 %v4041_v15  ;;  %v4042_v14 = vmul.f32 -1.442695, %v3223_v62 }
 0x93c   : > { %v3179_v55 = vpop.f32.mrf.mxu1  ;;  %v4043_v22 = vmul.f32 -1.442695, %v3225_v16 }
 0x93d   : > { %v3220_v59 = vpop.f32.mrf.mxu0  ;;  %4559 = vpow2.f32 %v4042_v14  ;;  %v6735_v19 = vadd.f32 %v3131_v63, %v3130_v0 }
 0x93e   : > { %4561 = vrcp.f32 %v3127_v47 }
 0x93f   : > { %4563 = vtanh.f32 %v6735_v19 }
 0x940   : > { %4565 = vtanh.f32 %v3224_v27 }
 0x941   : > { %4567 = vpow2.f32 %v4043_v22  ;;  %v7794_v22 = vld [vmem:[#allocation50_spill] sm:$0xff] }
 0x948   : > { %v4558_v25 = vpop.eup %4557 }
 0x949   : > { %v3229_v32 = vadd.f32 1.0, %v4558_v25  ;;  %v7795_v25 = vld [vmem:[#allocation51_spill] sm:$0xff] }
 0x94a   : > { %v4560_v1 = vpop.eup %4559 }
 0x94b   : > { %v4562_v50 = vpop.eup %4561  ;;  %4569 = vrcp.f32 %v3229_v32  ;;  %v3235_v62 = vadd.f32 1.0, %v4560_v1  ;;  %v7796_v32 = vld [vmem:[#allocation52_spill] sm:$0xff]  ;;  %v7797_v1 = vld [vmem:[#allocation53_spill] sm:$0xff] }
 0x94c   : > { %v4564_v59 = vpop.eup %4563 }
 0x94d   : > { %4571 = vrcp.f32 %v3235_v62  ;;  %v3134_v23 = vmul.f32 %v4564_v59, %v4562_v50  ;;  %v4566_v56 = vpop.eup %4565  ;;  %v7798_v50 = vld [vmem:[#allocation54_spill] sm:$0xff]  ;;  %v7799_v62 = vld [vmem:[#allocation55_spill] sm:$0xff]  ;;  %v7800_v59 = vld [vmem:[#allocation56_spill] sm:$0xff] }
 0x94e   : > { %v4568_v47 = vpop.eup %4567 }
 0x94f   : > { %v3251_v15 = vpack.c.bf16 %v3134_v23, %v3134_v23  ;;  %v3242_v0 = vadd.f32 1.0, %v4568_v47  ;;  %v7801_v23 = vld [vmem:[#allocation57_spill] sm:$0xff]  ;;  %v7804_v47 = vld [vmem:[#allocation60_spill] sm:$0xff] }
 0x951   : > { %3284 = vmatprep.mubr.bf16.mxu1 %v3251_v15  ;;  %3325 = vmatprep.mubr.bf16.mxu0 %v3251_v15  ;;  %4573 = vrcp.f32 %v3242_v0  ;;  %v7802_v15 = vld [vmem:[#allocation58_spill] sm:$0xff]  ;;  %v7806_v0 = vld [vmem:[#allocation25_spill] sm:$0xff] }
 0x958   : > { %v4570_v28 = vpop.eup %4569 }
 0x959   : > { %v3246_v63 = vmul.f32 %v4570_v28, %v4566_v56  ;;  %v7803_v56 = vld [vmem:[#allocation59_spill] sm:$0xff]  ;;  %v7805_v28 = vld [vmem:[#allocation61_spill] sm:$0xff] }
 0x95a   : > { %v4572_v17 = vpop.eup %4571 }
 0x95b   : > { %v3245_v14 = vmul.f32 %v4572_v17, %v6463_v30  ;;  %v7765_v30 = vld [vmem:[#allocation34_spill] sm:$0xff] }
 0x95d   : > { %v6741_v55 = vadd.f32 %v3246_v63, %v3245_v14 }
 0x95e   : > { %v4574_v24 = vpop.eup %4573 }
 0x95f   : > { %4575 = vtanh.f32 %v6741_v55 }
 0x96c   : > { %v4576_v16 = vpop.eup %4575 }
 0x96d   : > { %v3249_v20 = vmul.f32 %v4576_v16, %v4574_v24 }
 0x96f   : > { %v3250_v27 = vpack.c.bf16 %v3249_v20, %v3249_v20 }
 0x971   : > { %3285 = vmatmul.mubr.bf16.vlgmr.msra.gmra.mxu1 %v3250_v27  ;;  %3326 = vmatmul.mubr.bf16.vlgmr.msra.gmra.mxu0 %v3250_v27 }
 0x972   : > { %3364 = vmatpush1.bf16.msra.mxu1 %v6324_v12  ;;  %3405 = vmatpush1.bf16.msra.mxu0 %v6327_v51  ;;  %v7753_v12 = vld [vmem:[#allocation79_spill] sm:$0xff]  ;;  %v7754_v51 = vld [vmem:[#allocation85_spill] sm:$0xff] }
 0x973   : > { %3365 = vmatprep.subr.bf16.mxu1 %v6330_v60  ;;  %3406 = vmatprep.subr.bf16.mxu0 %v6333_v57  ;;  %v7755_v60 = vld [vmem:[#allocation87_spill] sm:$0xff]  ;;  %v7756_v57 = vld [vmem:[#allocation88_spill] sm:$0xff] }
 0x974   : > { %3395 = vmatprep.mubr.bf16.mxu1 %v7398_v5  ;;  %3436 = vmatprep.mubr.bf16.mxu0 %v7398_v5  ;;  %v7752_v5 = vld [vmem:[#allocation78_spill] sm:$0xff] }
 0x976   : > { %3366 = vmatpush1.bf16.msra.mxu1 %v6338_v42  ;;  %3407 = vmatpush1.bf16.msra.mxu0 %v6341_v45  ;;  %v7757_v42 = vld [vmem:[#allocation86_spill] sm:$0xff]  ;;  %v7758_v45 = vld [vmem:[#allocation89_spill] sm:$0xff] }
 0x977   : > { %3367 = vmatprep.subr.bf16.mxu1 %v6344_v40  ;;  %3408 = vmatprep.subr.bf16.mxu0 %v6347_v21  ;;  %v7759_v40 = vld [vmem:[#allocation91_spill] sm:$0xff]  ;;  %v7760_v21 = vld [vmem:[#allocation92_spill] sm:$0xff] }
 0x97a   : > { %3368 = vmatpush1.bf16.msra.mxu1 %v6350_v44  ;;  %3409 = vmatpush1.bf16.msra.mxu0 %v6353_v52  ;;  %v7761_v44 = vld [vmem:[#allocation90_spill] sm:$0xff]  ;;  %v7762_v52 = vld [vmem:[#allocation31_spill] sm:$0xff] }
 0x97b   : > { %3369 = vmatprep.subr.bf16.mxu1 %v6356_v53  ;;  %3410 = vmatprep.subr.bf16.mxu0 %v6359_v58  ;;  %v7763_v53 = vld [vmem:[#allocation32_spill] sm:$0xff]  ;;  %v7764_v58 = vld [vmem:[#allocation33_spill] sm:$0xff] }
 0x97e   : > { %3370 = vmatpush1.bf16.msra.mxu1 %v6480_v39  ;;  %3411 = vmatpush1.bf16.msra.mxu0 %v6483_v10  ;;  %v7766_v39 = vld [vmem:[#allocation35_spill] sm:$0xff]  ;;  %v7767_v10 = vld [vmem:[#allocation36_spill] sm:$0xff] }
 0x97f   : > { %3371 = vmatprep.subr.bf16.mxu1 %v6486_v13  ;;  %3412 = vmatprep.subr.bf16.mxu0 %v6489_v9  ;;  %v7768_v13 = vld [vmem:[#allocation23_spill] sm:$0xff]  ;;  %v7769_v9 = vld [vmem:[#allocation24_spill] sm:$0xff] }
 0x982   : > { %3372 = vmatpush1.bf16.msra.mxu1 %v6492_v34  ;;  %3413 = vmatpush1.bf16.msra.mxu0 %v6495_v35  ;;  %v7770_v34 = vld [vmem:[#allocation80_spill] sm:$0xff]  ;;  %v7771_v35 = vld [vmem:[#allocation81_spill] sm:$0xff] }
 0x983   : > { %3373 = vmatprep.subr.bf16.mxu1 %v6498_v36  ;;  %3414 = vmatprep.subr.bf16.mxu0 %v6501_v41  ;;  %v7772_v36 = vld [vmem:[#allocation83_spill] sm:$0xff]  ;;  %v7773_v41 = vld [vmem:[#allocation84_spill] sm:$0xff] }
 0x986   : > { %3374 = vmatpush1.bf16.msra.mxu1 %v6504_v38  ;;  %3415 = vmatpush1.bf16.msra.mxu0 %v6507_v7  ;;  %v7774_v38 = vld [vmem:[#allocation29_spill] sm:$0xff]  ;;  %v7775_v7 = vld [vmem:[#allocation30_spill] sm:$0xff] }
 0x987   : > { %3375 = vmatprep.subr.bf16.mxu1 %v6510_v26  ;;  %3416 = vmatprep.subr.bf16.mxu0 %v6513_v18  ;;  %v7776_v26 = vld [vmem:[#allocation93_spill] sm:$0xff]  ;;  %v7777_v18 = vld [vmem:[#allocation95_spill] sm:$0xff] }
 0x98a   : > { %3376 = vmatpush1.bf16.msra.mxu1 %v6516_v2  ;;  %3417 = vmatpush1.bf16.msra.mxu0 %v6519_v4  ;;  %v7778_v2 = vld [vmem:[#allocation96_spill] sm:$0xff]  ;;  %v7779_v4 = vld [vmem:[#allocation94_spill] sm:$0xff] }
 0x98b   : > { %3377 = vmatprep.subr.bf16.mxu1 %v6522_v33  ;;  %3418 = vmatprep.subr.bf16.mxu0 %v6525_v11  ;;  %v7780_v33 = vld [vmem:[#allocation82_spill] sm:$0xff]  ;;  %v7781_v11 = vld [vmem:[#allocation37_spill] sm:$0xff] }
 0x98e   : > { %3378 = vmatpush1.bf16.msra.mxu1 %v6528_v29  ;;  %3419 = vmatpush1.bf16.msra.mxu0 %v6531_v8  ;;  %v7782_v29 = vld [vmem:[#allocation38_spill] sm:$0xff]  ;;  %v7783_v8 = vld [vmem:[#allocation39_spill] sm:$0xff] }
 0x98f   : > { %3475 = vmatprep.subr.bf16.mxu1 %v6534_v31  ;;  %3516 = vmatprep.subr.bf16.mxu0 %v6537_v43  ;;  %v7784_v31 = vld [vmem:[#allocation40_spill] sm:$0xff]  ;;  %v7785_v43 = vld [vmem:[#allocation41_spill] sm:$0xff] }
 0x991   : > { %3396 = vmatmul.mubr.bf16.vlgmr.msra.gmra.mxu1 %v3250_v27  ;;  %3437 = vmatmul.mubr.bf16.vlgmr.msra.gmra.mxu0 %v3250_v27  ;;  %v7807_v27 = vld [vmem:[#allocation26_spill] sm:$0xff] }
 0x992   : > { %3476 = vmatpush1.bf16.msra.mxu1 %v6540_v54  ;;  %3517 = vmatpush1.bf16.msra.mxu0 %v6543_v6  ;;  %v7786_v54 = vld [vmem:[#allocation42_spill] sm:$0xff]  ;;  %v7787_v6 = vld [vmem:[#allocation43_spill] sm:$0xff] }
 0x993   : > { %3477 = vmatprep.subr.bf16.mxu1 %v6546_v37  ;;  %3518 = vmatprep.subr.bf16.mxu0 %v6549_v46  ;;  %v7788_v37 = vld [vmem:[#allocation44_spill] sm:$0xff]  ;;  %v7789_v46 = vld [vmem:[#allocation45_spill] sm:$0xff] }
 0x996   : > { %3478 = vmatpush1.bf16.msra.mxu1 %v6552_v49  ;;  %3519 = vmatpush1.bf16.msra.mxu0 %v6555_v3  ;;  %v7790_v49 = vld [vmem:[#allocation46_spill] sm:$0xff]  ;;  %v7791_v3 = vld [vmem:[#allocation47_spill] sm:$0xff] }
 0x997   : > { %3479 = vmatprep.subr.bf16.mxu1 %v6558_v61  ;;  %3520 = vmatprep.subr.bf16.mxu0 %v6561_v48  ;;  %v7792_v61 = vld [vmem:[#allocation48_spill] sm:$0xff]  ;;  %v7793_v48 = vld [vmem:[#allocation49_spill] sm:$0xff] }
 0x99a   : > { %3480 = vmatpush1.bf16.msra.mxu1 %v7752_v5  ;;  %3521 = vmatpush1.bf16.msra.mxu0 %v7753_v12 }
 0x99b   : > { %3481 = vmatprep.subr.bf16.mxu1 %v7754_v51  ;;  %3522 = vmatprep.subr.bf16.mxu0 %v7755_v60 }
 0x99e   : > { %3482 = vmatpush1.bf16.msra.mxu1 %v7756_v57  ;;  %3523 = vmatpush1.bf16.msra.mxu0 %v7757_v42 }
 0x99f   : > { %3483 = vmatprep.subr.bf16.mxu1 %v7758_v45  ;;  %3524 = vmatprep.subr.bf16.mxu0 %v7759_v40  ;;  %v7808_v45 = vld [vmem:[#allocation27_spill] sm:$0xff] }
 0x9a2   : > { %3484 = vmatpush1.bf16.msra.mxu1 %v7760_v21  ;;  %3525 = vmatpush1.bf16.msra.mxu0 %v7761_v44 }
 0x9a3   : > { %3485 = vmatprep.subr.bf16.mxu1 %v7762_v52  ;;  %3526 = vmatprep.subr.bf16.mxu0 %v7763_v53  ;;  %v7809_v52 = vld [vmem:[#allocation28_spill] sm:$0xff] }
 0x9a6   : > { %3486 = vmatpush1.bf16.msra.mxu1 %v7764_v58  ;;  %3527 = vmatpush1.bf16.msra.mxu0 %v7765_v30 }
 0x9a7   : > { %3487 = vmatprep.subr.bf16.mxu1 %v7766_v39  ;;  %3528 = vmatprep.subr.bf16.mxu0 %v7767_v10 }
 0x9aa   : > { %3488 = vmatpush1.bf16.msra.mxu1 %v7768_v13  ;;  %3529 = vmatpush1.bf16.msra.mxu0 %v7769_v9 }
 0x9ab   : > { %3489 = vmatprep.subr.bf16.mxu1 %v7770_v34  ;;  %3530 = vmatprep.subr.bf16.mxu0 %v7771_v35  ;;  %v7810_v34 = vld [vmem:[#allocation105_spill] sm:$0xff] }
 0x9ae   : > { %3490 = vmatpush1.bf16.msra.mxu1 %v7772_v36  ;;  %3531 = vmatpush1.bf16.msra.mxu0 %v7773_v41 }
 0x9af   : > { %3491 = vmatprep.subr.bf16.mxu1 %v7774_v38  ;;  %3532 = vmatprep.subr.bf16.mxu0 %v7775_v7 }
 0x9b2   : > { %3492 = vmatpush2.bf16.msra.mxu1 %v7776_v26  ;;  %3533 = vmatpush2.bf16.msra.mxu0 %v7777_v18  ;;  %v7811_v18 = vld [vmem:[#allocation107_spill] sm:$0xff] }
 0x9b3   : > { %3493 = vmatprep.subr.bf16.mxu1 %v7778_v2  ;;  %3534 = vmatprep.subr.bf16.mxu0 %v7779_v4 }
 0x9b6   : > { %3494 = vmatpush2.bf16.msra.mxu1 %v7780_v33  ;;  %3535 = vmatpush2.bf16.msra.mxu0 %v7781_v11 }
 0x9b7   : > { %3495 = vmatprep.subr.bf16.mxu1 %v7782_v29  ;;  %3536 = vmatprep.subr.bf16.mxu0 %v7783_v8 }
 0x9ba   : > { %3496 = vmatpush2.bf16.msra.mxu1 %v7784_v31  ;;  %3537 = vmatpush2.bf16.msra.mxu0 %v7785_v43 }
 0x9bb   : > { %3497 = vmatprep.subr.bf16.mxu1 %v7786_v54  ;;  %3538 = vmatprep.subr.bf16.mxu0 %v7787_v6 }
 0x9be   : > { %3498 = vmatpush2.bf16.msra.mxu1 %v7788_v37  ;;  %3539 = vmatpush2.bf16.msra.mxu0 %v7789_v46  ;;  %v7812_v46 = vld [vmem:[#allocation108_spill] sm:$0xff] }
 0x9bf   : > { %3499 = vmatprep.subr.bf16.mxu1 %v7790_v49  ;;  %3540 = vmatprep.subr.bf16.mxu0 %v7791_v3  ;;  %v7813_v3 = vld [vmem:[#allocation106_spill] sm:$0xff] }
 0x9c2   : > { %3500 = vmatpush2.bf16.msra.mxu1 %v7792_v61  ;;  %3541 = vmatpush2.bf16.msra.mxu0 %v7793_v48 }
 0x9c3   : > { %3501 = vmatprep.subr.bf16.mxu1 %v7794_v22  ;;  %3542 = vmatprep.subr.bf16.mxu0 %v7795_v25 }
 0x9c6   : > { %3502 = vmatpush2.bf16.msra.mxu1 %v7796_v32  ;;  %3543 = vmatpush2.bf16.msra.mxu0 %v7797_v1 }
 0x9c7   : > { %3503 = vmatprep.subr.bf16.mxu1 %v7798_v50  ;;  %3544 = vmatprep.subr.bf16.mxu0 %v7799_v62 }
 0x9ca   : > { %3504 = vmatpush2.bf16.msra.mxu1 %v7800_v59  ;;  %3545 = vmatpush2.bf16.msra.mxu0 %v7801_v23 }
 0x9cb   : > { %3505 = vmatprep.subr.bf16.mxu1 %v7802_v15  ;;  %3546 = vmatprep.subr.bf16.mxu0 %v7803_v56 }
 0x9ce   : > { %3506 = vmatpush2.bf16.msra.mxu1 %v7804_v47  ;;  %3547 = vmatpush2.bf16.msra.mxu0 %v7805_v28 }
 0xa31   : > { %v3286_v63 = vpop.f32.mrf.mxu1  ;;  %v3327_v17 = vpop.f32.mrf.mxu0 }
 0xa32   : > { %v3287_v14 = vadd.f32 %v3286_v63, %v7806_v0  ;;  %v3328_v53 = vadd.f32 %v3327_v17, %v7809_v52 }
 0xa33   : > { %v3288_v24 = vpop.f32.mrf.mxu1  ;;  %v3329_v16 = vpop.f32.mrf.mxu0 }
 0xa34   : > { %v4044_v20 = vmul.f32 -1.442695, %v3287_v14  ;;  %v3289_v5 = vadd.f32 %v3288_v24, %v7807_v27  ;;  %v3330_v40 = vadd.f32 %v3329_v16, %v7808_v45 }
 0xa35   : > { %v3290_v12 = vpop.f32.mrf.mxu1  ;;  %v3331_v51 = vpop.f32.mrf.mxu0 }
 0xa36   : > { %4577 = vpow2.f32 %v4044_v20  ;;  %v4045_v60 = vmul.f32 -1.442695, %v3289_v5  ;;  %v4046_v21 = vmul.f32 -1.442695, %v3330_v40 }
 0xa37   : > { %v3291_v57 = vpop.f32.mrf.mxu1  ;;  %v3332_v42 = vpop.f32.mrf.mxu0 }
 0xa38   : > { %4579 = vpow2.f32 %v4045_v60 }
 0xa39   : > { %4581 = vpow2.f32 %v4046_v21 }
 0xa43   : > { %v4578_v44 = vpop.eup %4577 }
 0xa44   : > { %v3337_v58 = vadd.f32 1.0, %v4578_v44 }
 0xa45   : > { %v4580_v30 = vpop.eup %4579 }
 0xa46   : > { %4583 = vrcp.f32 %v3337_v58  ;;  %v3343_v39 = vadd.f32 1.0, %v4580_v30  ;;  %v4582_v9 = vpop.eup %4581 }
 0xa47   : > { %4585 = vtanh.f32 %v3328_v53  ;;  %v3350_v33 = vadd.f32 1.0, %v4582_v9 }
 0xa48   : > { %4587 = vrcp.f32 %v3343_v39 }
 0xa51   : > { %v3397_v10 = vpop.f32.mrf.mxu1  ;;  %v3438_v13 = vpop.f32.mrf.mxu0 }
 0xa52   : > { %v3445_v35 = vadd.f32 %v3397_v10, %v7810_v34  ;;  %v3447_v61 = vadd.f32 %v3438_v13, %v7813_v3 }
 0xa53   : > { %v4584_v36 = vpop.eup %4583  ;;  %v3399_v41 = vpop.f32.mrf.mxu1 }
 0xa54   : > { %v3440_v38 = vpop.f32.mrf.mxu0  ;;  %v4586_v7 = vpop.eup %4585  ;;  %v4047_v26 = vmul.f32 -1.442695, %v3445_v35  ;;  %v3446_v2 = vadd.f32 %v3399_v41, %v7811_v18 }
 0xa55   : > { %v4588_v4 = vpop.eup %4587  ;;  %v3401_v11 = vpop.f32.mrf.mxu1  ;;  %v3354_v8 = vmul.f32 %v4586_v7, %v4584_v36  ;;  %v3448_v49 = vadd.f32 %v3440_v38, %v7812_v46 }
 0xa56   : > { %v3442_v29 = vpop.f32.mrf.mxu0  ;;  %v3353_v31 = vmul.f32 %v4588_v4, %v6735_v19  ;;  %4589 = vpow2.f32 %v4047_v26  ;;  %v4048_v43 = vmul.f32 -1.442695, %v3446_v2  ;;  %v4055_v4 = vld [vmem:[%s6973_s7] ss:$0 sm:$0xff] }
 0xa57   : > { %v3402_v54 = vpop.f32.mrf.mxu1  ;;  %v4049_v48 = vmul.f32 -1.442695, %v3448_v49 }
 0xa58   : > { %v3443_v6 = vpop.f32.mrf.mxu0  ;;  %4591 = vpow2.f32 %v4048_v43  ;;  %v6847_v37 = vadd.f32 %v3354_v8, %v3353_v31 }
 0xa59   : > { %4593 = vrcp.f32 %v3350_v33 }
 0xa5a   : > { %4595 = vtanh.f32 %v6847_v37 }
 0xa5b   : > { %4597 = vtanh.f32 %v3447_v61 }
 0xa5c   : > { %4599 = vpow2.f32 %v4049_v48 }
 0xa63   : > { %v4590_v22 = vpop.eup %4589 }
 0xa64   : > { %v3452_v25 = vadd.f32 1.0, %v4590_v22 }
 0xa65   : > { %v4592_v32 = vpop.eup %4591 }
 0xa66   : > { %v4594_v19 = vpop.eup %4593  ;;  %4601 = vrcp.f32 %v3452_v25  ;;  %v3458_v1 = vadd.f32 1.0, %v4592_v32 }
 0xa67   : > { %v4596_v50 = vpop.eup %4595 }
 0xa68   : > { %4603 = vrcp.f32 %v3458_v1  ;;  %v3357_v62 = vmul.f32 %v4596_v50, %v4594_v19  ;;  %v4598_v23 = vpop.eup %4597 }
 0xa69   : > { %v4600_v15 = vpop.eup %4599 }
 0xa6a   : > { %v3474_v59 = vpack.c.bf16 %v3357_v62, %v3357_v62  ;;  %v3465_v63 = vadd.f32 1.0, %v4600_v15 }
 0xa6c   : > { %3507 = vmatprep.mubr.bf16.mxu1 %v3474_v59  ;;  %3548 = vmatprep.mubr.bf16.mxu0 %v3474_v59  ;;  %4605 = vrcp.f32 %v3465_v63 }
 0xa73   : > { %v4602_v56 = vpop.eup %4601 }
 0xa74   : > { %v3469_v47 = vmul.f32 %v4602_v56, %v4598_v23 }
 0xa75   : > { %v4604_v28 = vpop.eup %4603 }
 0xa76   : > { %v3468_v17 = vmul.f32 %v4604_v28, %v6741_v55 }
 0xa78   : > { %v3470_v14 = vadd.f32 %v3469_v47, %v3468_v17 }
 0xa79   : > { %v4606_v24 = vpop.eup %4605 }
 0xa7a   : > { %3584 = vst [vmem:[%s6854_s23] sm:$0xff] %v3470_v14  ;;  %4607 = vtanh.f32 %v3470_v14 }
 0xa87   : > { %v4608_v16 = vpop.eup %4607 }
 0xa88   : > { %v3472_v20 = vmul.f32 %v4608_v16, %v4606_v24 }
 0xa8a   : > { %v3473_v5 = vpack.c.bf16 %v3472_v20, %v3472_v20  ;;  %3581 = vst [vmem:[%s6858_s26] sm:$0xff] %v3472_v20 }
 0xa8c   : > { %3508 = vmatmul.mubr.bf16.vlgmr.msra.gmra.mxu1 %v3473_v5  ;;  %3549 = vmatmul.mubr.bf16.vlgmr.msra.gmra.mxu0 %v3473_v5 }
 0xb4c   : > { %v3509_v12 = vpop.f32.mrf.mxu1  ;;  %v3550_v51 = vpop.f32.mrf.mxu0 }
 0xb4d   : > { %v3510_v55 = vadd.f32 %v3509_v12, %v7806_v0  ;;  %v3551_v9 = vadd.f32 %v3550_v51, %v7809_v52 }
 0xb4e   : > { %v3511_v60 = vpop.f32.mrf.mxu1  ;;  %v3552_v57 = vpop.f32.mrf.mxu0 }
 0xb4f   : > { %v4050_v42 = vmul.f32 -1.442695, %v3510_v55  ;;  %v3512_v40 = vadd.f32 %v3511_v60, %v7807_v27  ;;  %v3553_v39 = vadd.f32 %v3552_v57, %v7808_v45 }
 0xb50   : > { %v3513_v21 = vpop.f32.mrf.mxu1  ;;  %v3554_v44 = vpop.f32.mrf.mxu0 }
 0xb51   : > { %4609 = vpow2.f32 %v4050_v42  ;;  %v4051_v53 = vmul.f32 -1.442695, %v3512_v40  ;;  %v4052_v10 = vmul.f32 -1.442695, %v3553_v39 }
 0xb52   : > { %v3514_v58 = vpop.f32.mrf.mxu1  ;;  %v3555_v30 = vpop.f32.mrf.mxu0 }
 0xb53   : > { %4611 = vpow2.f32 %v4051_v53 }
 0xb54   : > { %4613 = vpow2.f32 %v4052_v10 }
 0xb5e   : > { %v4610_v13 = vpop.eup %4609 }
 0xb5f   : > { %v3560_v34 = vadd.f32 1.0, %v4610_v13 }
 0xb60   : > { %v4612_v0 = vpop.eup %4611 }
 0xb61   : > { %4615 = vrcp.f32 %v3560_v34  ;;  %v3566_v35 = vadd.f32 1.0, %v4612_v0  ;;  %v4614_v27 = vpop.eup %4613 }
 0xb62   : > { %4617 = vtanh.f32 %v3551_v9  ;;  %v3573_v7 = vadd.f32 1.0, %v4614_v27 }
 0xb63   : > { %4619 = vrcp.f32 %v3566_v35 }
 0xb64   : > { %4621 = vrcp.f32 %v3573_v7 }
 0xb6e   : > { %v4616_v36 = vpop.eup %4615 }
 0xb6f   : > { %v4618_v41 = vpop.eup %4617 }
 0xb70   : > { %v4620_v38 = vpop.eup %4619  ;;  %v3577_v45 = vmul.f32 %v4618_v41, %v4616_v36 }
 0xb71   : > { %v3576_v52 = vmul.f32 %v4620_v38, %v6847_v37  ;;  %v4622_v18 = vpop.eup %4621 }
 0xb73   : > { %v3578_v26 = vadd.f32 %v3577_v45, %v3576_v52 }
 0xb75   : > { %4623 = vtanh.f32 %v3578_v26  ;;  %4054 = vst [vmem:[%s6854_s23 + $0x8] sm:$0xff] %v3578_v26 }
 0xb82   : > { %v4624_v2 = vpop.eup %4623 }
 0xb83   : > { %v3580_v33 = vmul.f32 %v4624_v2, %v4622_v18 }
 0xb85   : > { %v3594_v11 = vmul.f32 %v4055_v4, %v3580_v33  ;;  %4053 = vst [vmem:[%s6858_s26 + $0x8] sm:$0xff] %v3580_v33  ;;  %s5006_s26 = smov [#allocation12]  }
 0xb86   : > { %s4903_s21 = sshll.u32 %s5006_s26, 4  ;;  %s4904_s21 = int_to_ptr.vmem [resolvable:$false] %s4903_s21 }
 0xb87   : > { %3595 = vadd.xlane.f32.xlu0 %v3594_v11  ;;  %s4905_s24 = scalar_lea.vmem %s4904_s21, 512  ;;  %p4906_p13 = scmp.lt.s32.totalorder %s6872_s27, %s4904_s21 }
 0xb88   : > { %p4907_p2 = scmp.lt.s32.totalorder %s4905_s24, %s4899_s17 }
 0xb8a   : > { %p4908_p6 = por %p4907_p2, %p4906_p13 }
 0xb8c   : > { %p4909_p12 = pnand %p4908_p6, %p4902_p11 }
 0xb8e   : > { %4912 = shalt.err (!%p4909_p12)
}
 0xb8f   : > { %s4913_s16 = scalar_lea.hbm %s6881_s15, 256  ;;  %s4917_s26 = scalar_lea.hbm %s6978_s12, 512 }
 0xb90   : > { %p4914_p5 = scmp.ne.s32.totalorder %s6881_s15, %s4913_s16  ;;  %p4918_p3 = scmp.lt.s32.totalorder %s6881_s15, %s6978_s12 }
 0xb91   : > { %p4919_p7 = scmp.lt.s32.totalorder %s4917_s26, %s4913_s16 }
 0xb92   : > { %p4915_p0 = pnand %p4914_p5, %p7814_p8 }
 0xb93   : > { %p4920_p4 = por %p4919_p7, %p4918_p3 }
 0xb94   : > { %p4916_p1 = pneg %p4915_p0 }
 0xb96   : > { %p4921_p9 = pnand %p4920_p4, %p4916_p1 }
 0xb98   : > { %4924 = shalt.err (!%p4921_p9)
}
 0xb99   : > { %s5007_s17 = smov 128   ;;  %s5008_s21 = smov 256  }
 0xb9a   : > { %s5009_s22 = smov 8   ;;  %s7815_s19 = scalar_lea.sflag [#allocation6], %s5301_s14 }
 0xb9b   : > { %4101 = dma.vmem_to_hbm [thread:$0]  (%p7814_p8), %s6872_s27, 256, %s6881_s15, %s7815_s19, %s5007_s17, %s5008_s21, %s5009_s22  }
 0xb9c   : > { %s7816_s25 = sshll.u32 %s5105_s8, 7  ;;  %s7817_s26 = sshll.u32 %s6854_s23, 4  ;;  %s6918_s26 = int_to_ptr.vmem [resolvable:$true] %s7817_s26 }
 0xb9d   : > { %s6914_s18 = scalar_lea.hbm %s6979_s13, %s7816_s25  ;;  %s3623_s0 = scalar_lea.sflag [#allocation14], %s5301_s14 }
 0xb9e   : > { %s4925_s1 = scalar_lea.vmem %s6918_s26, 256  ;;  %s5010_s3 = smov [#allocation13]  }
 0xb9f   : > { %p4926_p11 = scmp.ne.s32.totalorder %s6918_s26, %s4925_s1  ;;  %s4929_s27 = sshll.u32 %s5010_s3, 4  ;;  %s4930_s27 = int_to_ptr.vmem [resolvable:$false] %s4929_s27 }
 0xba0   : > { %s4931_s8 = scalar_lea.vmem %s4930_s27, 512  ;;  %p4932_p6 = scmp.lt.s32.totalorder %s6918_s26, %s4930_s27 }
 0xba1   : > { %p4927_p13 = pnand %p4926_p11, %p7814_p8  ;;  %p4933_p12 = scmp.lt.s32.totalorder %s4931_s8, %s4925_s1 }
 0xba3   : > { %p4928_p2 = pneg %p4927_p13  ;;  %p4934_p5 = por %p4933_p12, %p4932_p6 }
 0xba5   : > { %p4935_p0 = pnand %p4934_p5, %p4928_p2 }
 0xba7   : > { %4938 = shalt.err (!%p4935_p0)
}
 0xba8   : > { %s4939_s23 = scalar_lea.hbm %s6914_s18, 256  ;;  %s4943_s3 = scalar_lea.hbm %s6979_s13, 512 }
 0xba9   : > { %p4940_p1 = scmp.ne.s32.totalorder %s6914_s18, %s4939_s23  ;;  %p4944_p4 = scmp.lt.s32.totalorder %s6914_s18, %s6979_s13 }
 0xbaa   : > { %p4945_p9 = scmp.lt.s32.totalorder %s4943_s3, %s4939_s23 }
 0xbab   : > { %p4941_p3 = pnand %p4940_p1, %p7814_p8 }
 0xbac   : > { %p4946_p11 = por %p4945_p9, %p4944_p4 }
 0xbad   : > { %p4942_p7 = pneg %p4941_p3 }
 0xbaf   : > { %p4947_p13 = pnand %p4946_p11, %p4942_p7 }
 0xbb1   : > { %4950 = shalt.err (!%p4947_p13)
}
 0xbb2   : > { %4102 = dma.vmem_to_hbm [thread:$0]  (%p7814_p8), %s6918_s26, 256, %s6914_s18, %s3623_s0, %s5007_s17, %s5008_s21, %s5009_s22   ;;  %v4056_v29 = vld [vmem:[#allocation3] ss:$0 sm:$0xff]  ;;  %vm3611_vm9 = vcmask 7168  }
 0xbb3   : > { %s3858_s1 = sshll.u32 %s5207_s2, 3 }
 0xbb4   : > { %s623_s20 = scalar_lea.vmem %s6977_s11, %s3858_s1 }
 0xc10   : > { %v3596_v8 = vpop.xlane.xlu0 %3595 }
 0xc11   : > { %v3604_v31 = vadd.f32 %v4056_v29, %v3596_v8 }
 0xc13   : > { %v4057_v43 = vmul.f32 -1.442695, %v3604_v31 }
 0xc15   : > { %4625 = vpow2.f32 %v4057_v43 }
 0xc22   : > { %v4626_v54 = vpop.eup %4625 }
 0xc23   : > { %v3608_v6 = vadd.f32 1.0, %v4626_v54 }
 0xc25   : > { %4627 = vrcp.f32 %v3608_v6 }
 0xc32   : > { %v4628_v37 = vpop.eup %4627 }
 0xc33   : > { %3612 = vst.msk [vmem:[%s623_s20] sm:$0xff] %vm3611_vm9, %v4628_v37 }
 0xc34 PF: > { %s7818_s27 = sld [smem:[#allocation19_spill]] }
 0xc35   : > { %s7819_s8 = sld [smem:[#allocation22_spill]] }
 0xc3a   : > { %s3675_s0 = sand.u32 1, %s7818_s27  }
 0xc3b   : > { %p7820_p8 = scmp.ne.s32.totalorder %s7819_s8, 0  ;;  %s3676_s17 = scalar_lea.sflag [#allocation6], %s3675_s0 }
 0xc3d   : > { %p4116_p2 = pnand %p3843_p10, %p7820_p8 }
 0xc3f   : > { %p4117_p6 = pneg %p4116_p2 }
 0xc41   : > { %4976 = dma.done.wait (%p4117_p6), %s3676_s17, 256  }
 0xc42   : > { %4978 = vsyncadd (%p4117_p6), %s3676_s17, 4294967040  ;;  %s3685_s2 = scalar_lea.sflag [#allocation14], %s3675_s0 }
 0xc43   : > { %4980 = dma.done.wait (%p4117_p6), %s3685_s2, 256  }
 0xc44   : > { %4982 = vsyncadd (%p4117_p6), %s3685_s2, 4294967040  ;;  %s7821_s30 = sld [smem:[#allocation20_spill]]  ;;  %s7823_s27 = smov %s4989_s28 }
 0xc45   : > { %s7822_s21 = sld [smem:[#allocation21_spill]]  ;;  %s7824_s28 = smov %s4993_s29 }
 0xc4a   : > { %p31_p12 = scmp.ge.s32.totalorder %s7821_s30, 4  }
 0xc4b   : > { %s7825_s29 = smov %s7822_s21 }
 0xc4c   :  { %33 = sbr.rel (!%p31_p12) target bundleno = 12 (0xc), region = 244 }
 0xc51   :  { %3690 = vsyncpa [#allocation5], 1 }
 0xc52   :  { %3692 = vsyncpa [#allocation5 + $0x1], 1 }
 0xc53   :  { %3693 = vsyncpa [#allocation8], 1 }
 0xc54   :  { %3694 = vsyncpa [#allocation6], 1 }
 0xc55   :  { %3696 = vsyncpa [#allocation6 + $0x1], 1 }
 0xc56   :  { %3697 = vsyncpa [#allocation14], 1 }
 0xc57   :  { %3699 = vsyncpa [#allocation14 + $0x1], 1 }

</bundles_post_ra>
